<compile_context>
chip_gen: v6e
topology: v6e:2x2x1
jax: 0.10.0
libtpu: 0.0.40
codegen_flags: <defaults>
</compile_context>

<pallas_src>
import jax
import jax.numpy as jnp
import numpy as np
from jax import lax
from jax.experimental import pallas as pl
from jax.experimental.pallas import tpu as pltpu


def _round_up(x, m):
    return ((x + m - 1) // m) * m


def _vmem_capacity_bytes():
    """Physical VMEM per TensorCore (64 MiB v7x, 128 MiB v5e/v6e)."""
    try:
        cap = getattr(pltpu.get_tpu_info(), "vmem_capacity_bytes", None)
        if cap:
            return int(cap)
    except Exception:
        pass
    return 64 * 1024 * 1024  # conservative (v7x)


def _pad_gate_cols(w, H, Hp):
    """Pad a (..., 4*H) gate-ordered (i,f,g,o) tensor to (..., 4*Hp) so each
    gate group sits lane-aligned at column offset k*Hp."""
    lead = w.shape[:-1]
    w4 = w.reshape(lead + (4, H))
    w4 = jnp.pad(w4, [(0, 0)] * len(lead) + [(0, 0), (0, Hp - H)])
    return w4.reshape(lead + (4 * Hp,))


def _make_lstm_kernel(seq_len, chunk, Btile, E, Hp, needs_mask, unroll):
    def kernel(x_ref, wih_ref, b_ref, whh_ref, wout_ref, bout_ref, out_ref,
               xw_sc, h_sc, c_sc):
        t = pl.program_id(1)  # sequence-chunk axis (serial)

        @pl.when(t == 0)
        def _():
            h_sc[...] = jnp.zeros_like(h_sc)
            c_sc[...] = jnp.zeros_like(c_sc)

        # ---- Input projection for the whole chunk (no serial dependence). ---
        # One big bf16 MXU matmul with f32 accumulation; bias added once here.
        x_flat = x_ref[...].reshape(chunk * Btile, E)                 # bf16
        xw = jnp.dot(x_flat, wih_ref[...],
                     preferred_element_type=jnp.float32) + b_ref[...]
        xw_sc[...] = xw.reshape(chunk, Btile, 4 * Hp)                 # f32

        whh = whh_ref[...]  # bf16, resident across all inner timesteps

        def step(s, carry):
            h, c = carry  # f32 state
            # Only the serial h @ W_hh matmul stays on the critical path.
            gates = xw_sc[s] + jnp.dot(h.astype(jnp.bfloat16), whh,
                                       preferred_element_type=jnp.float32)
            # Lane-aligned gate slices (Hp is a multiple of 128).
            i_g = jax.nn.sigmoid(gates[:, 0 * Hp:1 * Hp])
            f_g = jax.nn.sigmoid(gates[:, 1 * Hp:2 * Hp])
            g_g = jnp.tanh(gates[:, 2 * Hp:3 * Hp])
            o_g = jax.nn.sigmoid(gates[:, 3 * Hp:4 * Hp])
            c_new = f_g * c + i_g * g_g
            h_new = o_g * jnp.tanh(c_new)
            if needs_mask:  # only emitted when chunk does not divide S
                valid = (t * chunk + s) < seq_len
                h_new = jnp.where(valid, h_new, h)
                c_new = jnp.where(valid, c_new, c)
            return h_new, c_new

        h, c = lax.fori_loop(0, chunk, step, (h_sc[...], c_sc[...]),
                             unroll=unroll)
        h_sc[...] = h
        c_sc[...] = c

        @pl.when(t == pl.num_programs(1) - 1)
        def _():
            out_ref[...] = (jnp.dot(h.astype(jnp.bfloat16), wout_ref[...],
                                    preferred_element_type=jnp.float32)
                            + bout_ref[...]).astype(out_ref.dtype)

    return kernel


def lstm_classifier_forward(token_ids, params, chunk=None):
    """token_ids: (batch, seq) int32. Returns logits (batch, output_size)."""
    emb = params["embedding"]          # (vocab, E)
    w_ih = params["w_ih"]              # (E, 4H)
    w_hh = params["w_hh"]              # (H, 4H)
    b = params["b"]                    # (1, 4H)  (b_ih + b_hh)
    w_out = params["w_out"]            # (H, O)
    b_out = params["b_out"]            # (1, O)

    B, S = token_ids.shape
    E = w_ih.shape[0]
    H = w_hh.shape[0]
    O = w_out.shape[1]

    # ---- TPU tile padding: lane (128) for H/O, sublane (16, bf16) for B. ----
    Hp = _round_up(H, 128)
    Op = _round_up(O, 128)

    # Batch tile: bound the per-step gates working set (Btile x 4Hp f32) to
    # ~192 KiB so the unrolled inner loop stays near the 64-vreg file.
    Bp = _round_up(B, 16)
    btile_cap = max(16, ((192 * 1024) // (4 * Hp * 4)) // 16 * 16)
    Btile = min(Bp, btile_cap)
    Bp = _round_up(Bp, Btile)
    n_btiles = Bp // Btile

    # ---- VMEM-aware chunk sizing. ----
    cap = _vmem_capacity_bytes()
    budget = (cap * 3) // 4                       # leave headroom
    fixed = 2 * (E * 4 * Hp * 2                   # W_ih  (bf16, <=2 buffers)
                 + Hp * 4 * Hp * 2                # W_hh
                 + Hp * Op * 2                    # W_out
                 + 4 * Hp * 4 + Op * 4)           # biases (f32)
    fixed += 2 * Btile * Hp * 4                   # h/c scratch
    fixed += 2 * Btile * Op * 4                   # out block (double-buffered)
    per_step = Btile * (2 * 4 * Hp * 4            # xw scratch + matmul temp
                        + 2 * E * 2)              # streamed x (bf16, 2 bufs)

    needs_mask = False
    if chunk is None:
        chunk_max = int(max(1, min(S, (budget - fixed) // per_step, 256)))
        chunk = 1
        for c in range(chunk_max, 0, -1):         # prefer chunk | S (no mask)
            if S % c == 0:
                chunk = c
                break
        if chunk < max(1, chunk_max // 2):        # only tiny divisors exist
            chunk = chunk_max
            needs_mask = (S % chunk) != 0
    else:
        chunk = int(max(1, min(chunk, S)))
        needs_mask = (S % chunk) != 0
    n_chunks = -(-S // chunk)
    Sp = n_chunks * chunk
    unroll = int(max(1, min(chunk, 8)))

    vmem_limit = int(min((cap * 9) // 10, budget + (8 << 20)))

    # ---- Pad params (lane-aligned gate layout); MXU operands in bf16.
    #      Zero padding is numerically exact (padded h/c columns stay 0). ----
    w_ih_p = _pad_gate_cols(w_ih, H, Hp).astype(jnp.bfloat16)            # (E,4Hp)
    b_p = _pad_gate_cols(b, H, Hp).astype(jnp.float32)                   # (1,4Hp)
    w_hh_p = jnp.pad(_pad_gate_cols(w_hh, H, Hp),
                     ((0, Hp - H), (0, 0))).astype(jnp.bfloat16)         # (Hp,4Hp)
    w_out_p = jnp.pad(w_out, ((0, Hp - H), (0, Op - O))).astype(jnp.bfloat16)
    b_out_p = jnp.pad(b_out, ((0, 0), (0, Op - O))).astype(jnp.float32)  # (1,Op)

    # ---- Plain-XLA glue: embedding gather, directly seq-major (transpose the
    #      tiny int32 token array, never the activation). ----
    # TODO(synk): the vocab-table gather itself stays in XLA (jnp.take); a
    # Pallas DMA-gather kernel is not worthwhile for this lookup.
    tok_p = jnp.pad(token_ids, ((0, Bp - B), (0, 0)))                    # (Bp,S)
    x = jnp.take(emb.astype(jnp.bfloat16), tok_p.T, axis=0)              # (S,Bp,E)
    if Sp != S:
        x = jnp.pad(x, ((0, Sp - S), (0, 0), (0, 0)))                    # (Sp,Bp,E)

    kernel = _make_lstm_kernel(S, chunk, Btile, E, Hp, needs_mask, unroll)

    def _call(weight_pm):
        def wspec(shape):
            if weight_pm is None:
                return pl.BlockSpec(shape, lambda bi, ti: (0, 0))
            return pl.BlockSpec(shape, lambda bi, ti: (0, 0),
                                pipeline_mode=weight_pm)

        grid_spec = pltpu.PrefetchScalarGridSpec(
            num_scalar_prefetch=0,
            grid=(n_btiles, n_chunks),
            in_specs=[
                # streamed per (batch tile, seq chunk): embedded tokens (bf16)
                pl.BlockSpec((chunk, Btile, E), lambda bi, ti: (ti, bi, 0)),
                # resident weights (constant index maps)
                wspec((E, 4 * Hp)),     # W_ih
                wspec((1, 4 * Hp)),     # b
                wspec((Hp, 4 * Hp)),    # W_hh
                wspec((Hp, Op)),        # W_out
                wspec((1, Op)),         # b_out
            ],
            out_specs=pl.BlockSpec((Btile, Op), lambda bi, ti: (bi, 0)),
            scratch_shapes=[
                pltpu.VMEM((chunk, Btile, 4 * Hp), jnp.float32),  # xw chunk
                pltpu.VMEM((Btile, Hp), jnp.float32),             # h
                pltpu.VMEM((Btile, Hp), jnp.float32),             # c
            ],
        )
        return pl.pallas_call(
            kernel,
            out_shape=jax.ShapeDtypeStruct((Bp, Op), jnp.float32),
            grid_spec=grid_spec,
            compiler_params=pltpu.CompilerParams(
                # batch tiles are independent (2 TCs on v7x); seq is serial
                dimension_semantics=("parallel", "arbitrary"),
                vmem_limit_bytes=vmem_limit),
        )(x, w_ih_p, b_p, w_hh_p, w_out_p, b_out_p)

    buffered = getattr(pl, "Buffered", None)
    try:
        # Resident weights single-buffered (halves their VMEM footprint).
        out = _call(buffered(1) if buffered is not None else None)
    except Exception:
        if buffered is None:
            raise
        out = _call(None)   # this build rejects Buffered(1): use default

    return out[:B, :O]


def reference_forward(token_ids, params):
    """Pure-JAX f32 reference (same math as the PyTorch module)."""
    emb = params["embedding"]
    w_ih, w_hh, b = params["w_ih"], params["w_hh"], params["b"]
    w_out, b_out = params["w_out"], params["b_out"]
    B = token_ids.shape[0]
    H = w_hh.shape[0]

    x = jnp.take(emb, token_ids, axis=0)
    x = jnp.transpose(x, (1, 0, 2))  # (S, B, E)

    def step(carry, x_t):
        h, c = carry
        gates = x_t @ w_ih + h @ w_hh + b
        i_g = jax.nn.sigmoid(gates[:, 0 * H:1 * H])
        f_g = jax.nn.sigmoid(gates[:, 1 * H:2 * H])
        g_g = jnp.tanh(gates[:, 2 * H:3 * H])
        o_g = jax.nn.sigmoid(gates[:, 3 * H:4 * H])
        c = f_g * c + i_g * g_g
        h = o_g * jnp.tanh(c)
        return (h, c), None

    h0 = jnp.zeros((B, H), jnp.float32)
    c0 = jnp.zeros((B, H), jnp.float32)
    (h_f, _), _ = lax.scan(step, (h0, c0), x)
    return h_f @ w_out + b_out


def make_params(key, vocab_size, embed_dim, hidden_size, output_size):
    ks = jax.random.split(key, 7)
    scale = 0.1
    return {
        "embedding": jax.random.normal(ks[0], (vocab_size, embed_dim), jnp.float32) * scale,
        "w_ih": jax.random.normal(ks[1], (embed_dim, 4 * hidden_size), jnp.float32) * scale,
        "w_hh": jax.random.normal(ks[2], (hidden_size, 4 * hidden_size), jnp.float32) * scale,
        "b": jax.random.normal(ks[3], (1, 4 * hidden_size), jnp.float32) * scale,
        "w_out": jax.random.normal(ks[4], (hidden_size, output_size), jnp.float32) * scale,
        "b_out": jax.random.normal(ks[5], (1, output_size), jnp.float32) * scale,
    }


if __name__ == "__main__":
    batch = 2
    seq = 8
    vocab_size = 50
    embed_dim = 32
    hidden_size = 32
    output_size = 2

    key = jax.random.PRNGKey(0)
    k_tok, k_par = jax.random.split(key)
    params = make_params(k_par, vocab_size, embed_dim, hidden_size, output_size)
    token_ids = jax.random.randint(k_tok, (batch, seq), 0, vocab_size, dtype=jnp.int32)

    ref = jax.block_until_ready(reference_forward(token_ids, params))

    # Default: VMEM-sized chunk (here a single chunk covers the whole sequence).
    logits = jax.block_until_ready(lstm_classifier_forward(token_ids, params))
    np.testing.assert_allclose(np.asarray(logits), np.asarray(ref),
                               rtol=2e-2, atol=5e-3)

    # Exercise the multi-chunk carry path (chunk=2) and the tail-mask path (chunk=3).
    for forced_chunk in (2, 3):
        lg = jax.block_until_ready(
            lstm_classifier_forward(token_ids, params, chunk=forced_chunk))
        np.testing.assert_allclose(np.asarray(lg), np.asarray(ref),
                                   rtol=2e-2, atol=5e-3)

    print("KERNEL_OK")
</pallas_src>

<mosaic_0001>
module attributes {stable_mosaic.version = 11 : i64} {
  func.func @kernel(%arg0: i32, %arg1: i32, %arg2: memref<8x16x32xbf16, #tpu.memory_space<vmem>>, %arg3: memref<32x512xbf16, #tpu.memory_space<vmem>>, %arg4: memref<1x512xf32, #tpu.memory_space<vmem>>, %arg5: memref<128x512xbf16, #tpu.memory_space<vmem>>, %arg6: memref<128x128xbf16, #tpu.memory_space<vmem>>, %arg7: memref<1x128xf32, #tpu.memory_space<vmem>>, %arg8: memref<16x128xf32, #tpu.memory_space<vmem>>, %arg9: memref<8x16x512xf32, #tpu.memory_space<vmem>>, %arg10: memref<16x128xf32, #tpu.memory_space<vmem>>, %arg11: memref<16x128xf32, #tpu.memory_space<vmem>>) attributes {dimension_semantics = [#tpu.dimension_semantics<parallel>, #tpu.dimension_semantics<arbitrary>], iteration_bounds = array<i64: 1, 1>, scalar_prefetch = 0 : i64, scratch_operands = 3 : i64, tpu.core_type = #tpu.core_type<tc>, window_params = [{transform_indices = @transform_0, window_bounds = array<i64: 8, 16, 32>}, {pipeline_mode = #tpu.pipeline_mode<synchronous>, transform_indices = @transform_1, window_bounds = array<i64: 32, 512>}, {pipeline_mode = #tpu.pipeline_mode<synchronous>, transform_indices = @transform_2, window_bounds = array<i64: 1, 512>}, {pipeline_mode = #tpu.pipeline_mode<synchronous>, transform_indices = @transform_3, window_bounds = array<i64: 128, 512>}, {pipeline_mode = #tpu.pipeline_mode<synchronous>, transform_indices = @transform_4, window_bounds = array<i64: 128, 128>}, {pipeline_mode = #tpu.pipeline_mode<synchronous>, transform_indices = @transform_5, window_bounds = array<i64: 1, 128>}, {transform_indices = @transform_6, window_bounds = array<i64: 16, 128>}]} {
    %c0_i32 = arith.constant 0 : i32
    %0 = arith.cmpi eq, %arg1, %c0_i32 : i32
    %1 = arith.extui %0 : i1 to i32
    %c0_i32_0 = arith.constant 0 : i32
    %2 = arith.cmpi ne, %1, %c0_i32_0 : i32
    scf.if %2 {
      %cst_71 = arith.constant 0.000000e+00 : f32
      %268 = vector.broadcast %cst_71 : f32 to vector<16x128xf32>
      %c0_72 = arith.constant 0 : index
      %c0_73 = arith.constant 0 : index
      %269 = vector.load %arg10[%c0_72, %c0_73] : memref<16x128xf32, #tpu.memory_space<vmem>>, vector<16x128xf32>
      tpu.vector_store %arg10[%c0_72, %c0_73], %268 {strides = array<i32>} : memref<16x128xf32, #tpu.memory_space<vmem>>, vector<16x128xf32>,
      %cst_74 = arith.constant 0.000000e+00 : f32
      %270 = vector.broadcast %cst_74 : f32 to vector<16x128xf32>
      %c0_75 = arith.constant 0 : index
      %c0_76 = arith.constant 0 : index
      %271 = vector.load %arg11[%c0_75, %c0_76] : memref<16x128xf32, #tpu.memory_space<vmem>>, vector<16x128xf32>
      tpu.vector_store %arg11[%c0_75, %c0_76], %270 {strides = array<i32>} : memref<16x128xf32, #tpu.memory_space<vmem>>, vector<16x128xf32>,
    } else {
    }
    %c0 = arith.constant 0 : index
    %c0_1 = arith.constant 0 : index
    %c0_2 = arith.constant 0 : index
    %3 = vector.load %arg2[%c0, %c0_1, %c0_2] : memref<8x16x32xbf16, #tpu.memory_space<vmem>>, vector<8x16x32xbf16>
    %4 = vector.shape_cast %3 : vector<8x16x32xbf16> to vector<128x32xbf16>
    %c0_3 = arith.constant 0 : index
    %c0_4 = arith.constant 0 : index
    %5 = vector.load %arg3[%c0_3, %c0_4] : memref<32x512xbf16, #tpu.memory_space<vmem>>, vector<32x512xbf16>
    %cst = arith.constant dense<0.000000e+00> : vector<128x512xf32>
    %6 = tpu.matmul %4, %5, %cst {dimension_numbers = #tpu.dot_dimension_numbers<[1], [0], [0], [1], [0, 0, 1, 1], [], []>} : vector<128x32xbf16>, vector<32x512xbf16>, vector<128x512xf32> -> vector<128x512xf32>
    %c0_5 = arith.constant 0 : index
    %c0_6 = arith.constant 0 : index
    %7 = vector.load %arg4[%c0_5, %c0_6] : memref<1x512xf32, #tpu.memory_space<vmem>>, vector<1x512xf32>
    %8 = vector.broadcast %7 : vector<1x512xf32> to vector<128x512xf32>
    %9 = arith.addf %6, %8 : vector<128x512xf32>
    %10 = vector.shape_cast %9 : vector<128x512xf32> to vector<8x16x512xf32>
    %c0_7 = arith.constant 0 : index
    %c0_8 = arith.constant 0 : index
    %c0_9 = arith.constant 0 : index
    %11 = vector.load %arg9[%c0_7, %c0_8, %c0_9] : memref<8x16x512xf32, #tpu.memory_space<vmem>>, vector<8x16x512xf32>
    tpu.vector_store %arg9[%c0_7, %c0_8, %c0_9], %10 {strides = array<i32>} : memref<8x16x512xf32, #tpu.memory_space<vmem>>, vector<8x16x512xf32>,
    %c0_10 = arith.constant 0 : index
    %c0_11 = arith.constant 0 : index
    %12 = vector.load %arg5[%c0_10, %c0_11] : memref<128x512xbf16, #tpu.memory_space<vmem>>, vector<128x512xbf16>
    %c0_12 = arith.constant 0 : index
    %c0_13 = arith.constant 0 : index
    %13 = vector.load %arg10[%c0_12, %c0_13] : memref<16x128xf32, #tpu.memory_space<vmem>>, vector<16x128xf32>
    %c0_14 = arith.constant 0 : index
    %c0_15 = arith.constant 0 : index
    %14 = vector.load %arg11[%c0_14, %c0_15] : memref<16x128xf32, #tpu.memory_space<vmem>>, vector<16x128xf32>
    %c0_i32_16 = arith.constant 0 : i32
    %15 = arith.index_cast %c0_i32_16 : i32 to index
    %c0_17 = arith.constant 0 : index
    %c0_18 = arith.constant 0 : index
    %16 = vector.load %arg9[%15, %c0_17, %c0_18] : memref<8x16x512xf32, #tpu.memory_space<vmem>>, vector<1x16x512xf32>
    %17 = vector.shape_cast %16 : vector<1x16x512xf32> to vector<16x512xf32>
    %18 = arith.truncf %13 : vector<16x128xf32> to vector<16x128xbf16>
    %cst_19 = arith.constant dense<0.000000e+00> : vector<16x512xf32>
    %19 = tpu.matmul %18, %12, %cst_19 {dimension_numbers = #tpu.dot_dimension_numbers<[1], [0], [0], [1], [0, 0, 1, 1], [], []>} : vector<16x128xbf16>, vector<128x512xbf16>, vector<16x512xf32> -> vector<16x512xf32>
    %20 = arith.addf %17, %19 : vector<16x512xf32>
    %21 = vector.extract_strided_slice %20 {offsets = [0, 0], sizes = [16, 128], strides = [1, 1]} : vector<16x512xf32> to vector<16x128xf32>
    %22 = arith.negf %21 : vector<16x128xf32>
    %23 = math.exp %22 : vector<16x128xf32>
    %cst_20 = arith.constant 1.000000e+00 : f32
    %24 = vector.broadcast %cst_20 : f32 to vector<16x128xf32>
    %25 = arith.addf %24, %23 : vector<16x128xf32>
    %26 = arith.divf %24, %25 : vector<16x128xf32>
    %27 = vector.extract_strided_slice %20 {offsets = [0, 128], sizes = [16, 128], strides = [1, 1]} : vector<16x512xf32> to vector<16x128xf32>
    %28 = arith.negf %27 : vector<16x128xf32>
    %29 = math.exp %28 : vector<16x128xf32>
    %cst_21 = arith.constant 1.000000e+00 : f32
    %30 = vector.broadcast %cst_21 : f32 to vector<16x128xf32>
    %31 = arith.addf %30, %29 : vector<16x128xf32>
    %32 = arith.divf %30, %31 : vector<16x128xf32>
    %33 = vector.extract_strided_slice %20 {offsets = [0, 256], sizes = [16, 128], strides = [1, 1]} : vector<16x512xf32> to vector<16x128xf32>
    %34 = math.tanh %33 : vector<16x128xf32>
    %35 = vector.extract_strided_slice %20 {offsets = [0, 384], sizes = [16, 128], strides = [1, 1]} : vector<16x512xf32> to vector<16x128xf32>
    %36 = arith.negf %35 : vector<16x128xf32>
    %37 = math.exp %36 : vector<16x128xf32>
    %cst_22 = arith.constant 1.000000e+00 : f32
    %38 = vector.broadcast %cst_22 : f32 to vector<16x128xf32>
    %39 = arith.addf %38, %37 : vector<16x128xf32>
    %40 = arith.divf %38, %39 : vector<16x128xf32>
    %41 = arith.mulf %32, %14 : vector<16x128xf32>
    %42 = arith.mulf %26, %34 : vector<16x128xf32>
    %43 = arith.addf %41, %42 : vector<16x128xf32>
    %44 = math.tanh %43 : vector<16x128xf32>
    %45 = arith.mulf %40, %44 : vector<16x128xf32>
    %c1_i32 = arith.constant 1 : i32
    %46 = arith.index_cast %c1_i32 : i32 to index
    %c0_23 = arith.constant 0 : index
    %c0_24 = arith.constant 0 : index
    %47 = vector.load %arg9[%46, %c0_23, %c0_24] : memref<8x16x512xf32, #tpu.memory_space<vmem>>, vector<1x16x512xf32>
    %48 = vector.shape_cast %47 : vector<1x16x512xf32> to vector<16x512xf32>
    %49 = arith.truncf %45 : vector<16x128xf32> to vector<16x128xbf16>
    %cst_25 = arith.constant dense<0.000000e+00> : vector<16x512xf32>
    %50 = tpu.matmul %49, %12, %cst_25 {dimension_numbers = #tpu.dot_dimension_numbers<[1], [0], [0], [1], [0, 0, 1, 1], [], []>} : vector<16x128xbf16>, vector<128x512xbf16>, vector<16x512xf32> -> vector<16x512xf32>
    %51 = arith.addf %48, %50 : vector<16x512xf32>
    %52 = vector.extract_strided_slice %51 {offsets = [0, 0], sizes = [16, 128], strides = [1, 1]} : vector<16x512xf32> to vector<16x128xf32>
    %53 = arith.negf %52 : vector<16x128xf32>
    %54 = math.exp %53 : vector<16x128xf32>
    %cst_26 = arith.constant 1.000000e+00 : f32
    %55 = vector.broadcast %cst_26 : f32 to vector<16x128xf32>
    %56 = arith.addf %55, %54 : vector<16x128xf32>
    %57 = arith.divf %55, %56 : vector<16x128xf32>
    %58 = vector.extract_strided_slice %51 {offsets = [0, 128], sizes = [16, 128], strides = [1, 1]} : vector<16x512xf32> to vector<16x128xf32>
    %59 = arith.negf %58 : vector<16x128xf32>
    %60 = math.exp %59 : vector<16x128xf32>
    %cst_27 = arith.constant 1.000000e+00 : f32
    %61 = vector.broadcast %cst_27 : f32 to vector<16x128xf32>
    %62 = arith.addf %61, %60 : vector<16x128xf32>
    %63 = arith.divf %61, %62 : vector<16x128xf32>
    %64 = vector.extract_strided_slice %51 {offsets = [0, 256], sizes = [16, 128], strides = [1, 1]} : vector<16x512xf32> to vector<16x128xf32>
    %65 = math.tanh %64 : vector<16x128xf32>
    %66 = vector.extract_strided_slice %51 {offsets = [0, 384], sizes = [16, 128], strides = [1, 1]} : vector<16x512xf32> to vector<16x128xf32>
    %67 = arith.negf %66 : vector<16x128xf32>
    %68 = math.exp %67 : vector<16x128xf32>
    %cst_28 = arith.constant 1.000000e+00 : f32
    %69 = vector.broadcast %cst_28 : f32 to vector<16x128xf32>
    %70 = arith.addf %69, %68 : vector<16x128xf32>
    %71 = arith.divf %69, %70 : vector<16x128xf32>
    %72 = arith.mulf %63, %43 : vector<16x128xf32>
    %73 = arith.mulf %57, %65 : vector<16x128xf32>
    %74 = arith.addf %72, %73 : vector<16x128xf32>
    %75 = math.tanh %74 : vector<16x128xf32>
    %76 = arith.mulf %71, %75 : vector<16x128xf32>
    %c2_i32 = arith.constant 2 : i32
    %77 = arith.index_cast %c2_i32 : i32 to index
    %c0_29 = arith.constant 0 : index
    %c0_30 = arith.constant 0 : index
    %78 = vector.load %arg9[%77, %c0_29, %c0_30] : memref<8x16x512xf32, #tpu.memory_space<vmem>>, vector<1x16x512xf32>
    %79 = vector.shape_cast %78 : vector<1x16x512xf32> to vector<16x512xf32>
    %80 = arith.truncf %76 : vector<16x128xf32> to vector<16x128xbf16>
    %cst_31 = arith.constant dense<0.000000e+00> : vector<16x512xf32>
    %81 = tpu.matmul %80, %12, %cst_31 {dimension_numbers = #tpu.dot_dimension_numbers<[1], [0], [0], [1], [0, 0, 1, 1], [], []>} : vector<16x128xbf16>, vector<128x512xbf16>, vector<16x512xf32> -> vector<16x512xf32>
    %82 = arith.addf %79, %81 : vector<16x512xf32>
    %83 = vector.extract_strided_slice %82 {offsets = [0, 0], sizes = [16, 128], strides = [1, 1]} : vector<16x512xf32> to vector<16x128xf32>
    %84 = arith.negf %83 : vector<16x128xf32>
    %85 = math.exp %84 : vector<16x128xf32>
    %cst_32 = arith.constant 1.000000e+00 : f32
    %86 = vector.broadcast %cst_32 : f32 to vector<16x128xf32>
    %87 = arith.addf %86, %85 : vector<16x128xf32>
    %88 = arith.divf %86, %87 : vector<16x128xf32>
    %89 = vector.extract_strided_slice %82 {offsets = [0, 128], sizes = [16, 128], strides = [1, 1]} : vector<16x512xf32> to vector<16x128xf32>
    %90 = arith.negf %89 : vector<16x128xf32>
    %91 = math.exp %90 : vector<16x128xf32>
    %cst_33 = arith.constant 1.000000e+00 : f32
    %92 = vector.broadcast %cst_33 : f32 to vector<16x128xf32>
    %93 = arith.addf %92, %91 : vector<16x128xf32>
    %94 = arith.divf %92, %93 : vector<16x128xf32>
    %95 = vector.extract_strided_slice %82 {offsets = [0, 256], sizes = [16, 128], strides = [1, 1]} : vector<16x512xf32> to vector<16x128xf32>
    %96 = math.tanh %95 : vector<16x128xf32>
    %97 = vector.extract_strided_slice %82 {offsets = [0, 384], sizes = [16, 128], strides = [1, 1]} : vector<16x512xf32> to vector<16x128xf32>
    %98 = arith.negf %97 : vector<16x128xf32>
    %99 = math.exp %98 : vector<16x128xf32>
    %cst_34 = arith.constant 1.000000e+00 : f32
    %100 = vector.broadcast %cst_34 : f32 to vector<16x128xf32>
    %101 = arith.addf %100, %99 : vector<16x128xf32>
    %102 = arith.divf %100, %101 : vector<16x128xf32>
    %103 = arith.mulf %94, %74 : vector<16x128xf32>
    %104 = arith.mulf %88, %96 : vector<16x128xf32>
    %105 = arith.addf %103, %104 : vector<16x128xf32>
    %106 = math.tanh %105 : vector<16x128xf32>
    %107 = arith.mulf %102, %106 : vector<16x128xf32>
    %c3_i32 = arith.constant 3 : i32
    %108 = arith.index_cast %c3_i32 : i32 to index
    %c0_35 = arith.constant 0 : index
    %c0_36 = arith.constant 0 : index
    %109 = vector.load %arg9[%108, %c0_35, %c0_36] : memref<8x16x512xf32, #tpu.memory_space<vmem>>, vector<1x16x512xf32>
    %110 = vector.shape_cast %109 : vector<1x16x512xf32> to vector<16x512xf32>
    %111 = arith.truncf %107 : vector<16x128xf32> to vector<16x128xbf16>
    %cst_37 = arith.constant dense<0.000000e+00> : vector<16x512xf32>
    %112 = tpu.matmul %111, %12, %cst_37 {dimension_numbers = #tpu.dot_dimension_numbers<[1], [0], [0], [1], [0, 0, 1, 1], [], []>} : vector<16x128xbf16>, vector<128x512xbf16>, vector<16x512xf32> -> vector<16x512xf32>
    %113 = arith.addf %110, %112 : vector<16x512xf32>
    %114 = vector.extract_strided_slice %113 {offsets = [0, 0], sizes = [16, 128], strides = [1, 1]} : vector<16x512xf32> to vector<16x128xf32>
    %115 = arith.negf %114 : vector<16x128xf32>
    %116 = math.exp %115 : vector<16x128xf32>
    %cst_38 = arith.constant 1.000000e+00 : f32
    %117 = vector.broadcast %cst_38 : f32 to vector<16x128xf32>
    %118 = arith.addf %117, %116 : vector<16x128xf32>
    %119 = arith.divf %117, %118 : vector<16x128xf32>
    %120 = vector.extract_strided_slice %113 {offsets = [0, 128], sizes = [16, 128], strides = [1, 1]} : vector<16x512xf32> to vector<16x128xf32>
    %121 = arith.negf %120 : vector<16x128xf32>
    %122 = math.exp %121 : vector<16x128xf32>
    %cst_39 = arith.constant 1.000000e+00 : f32
    %123 = vector.broadcast %cst_39 : f32 to vector<16x128xf32>
    %124 = arith.addf %123, %122 : vector<16x128xf32>
    %125 = arith.divf %123, %124 : vector<16x128xf32>
    %126 = vector.extract_strided_slice %113 {offsets = [0, 256], sizes = [16, 128], strides = [1, 1]} : vector<16x512xf32> to vector<16x128xf32>
    %127 = math.tanh %126 : vector<16x128xf32>
    %128 = vector.extract_strided_slice %113 {offsets = [0, 384], sizes = [16, 128], strides = [1, 1]} : vector<16x512xf32> to vector<16x128xf32>
    %129 = arith.negf %128 : vector<16x128xf32>
    %130 = math.exp %129 : vector<16x128xf32>
    %cst_40 = arith.constant 1.000000e+00 : f32
    %131 = vector.broadcast %cst_40 : f32 to vector<16x128xf32>
    %132 = arith.addf %131, %130 : vector<16x128xf32>
    %133 = arith.divf %131, %132 : vector<16x128xf32>
    %134 = arith.mulf %125, %105 : vector<16x128xf32>
    %135 = arith.mulf %119, %127 : vector<16x128xf32>
    %136 = arith.addf %134, %135 : vector<16x128xf32>
    %137 = math.tanh %136 : vector<16x128xf32>
    %138 = arith.mulf %133, %137 : vector<16x128xf32>
    %c4_i32 = arith.constant 4 : i32
    %139 = arith.index_cast %c4_i32 : i32 to index
    %c0_41 = arith.constant 0 : index
    %c0_42 = arith.constant 0 : index
    %140 = vector.load %arg9[%139, %c0_41, %c0_42] : memref<8x16x512xf32, #tpu.memory_space<vmem>>, vector<1x16x512xf32>
    %141 = vector.shape_cast %140 : vector<1x16x512xf32> to vector<16x512xf32>
    %142 = arith.truncf %138 : vector<16x128xf32> to vector<16x128xbf16>
    %cst_43 = arith.constant dense<0.000000e+00> : vector<16x512xf32>
    %143 = tpu.matmul %142, %12, %cst_43 {dimension_numbers = #tpu.dot_dimension_numbers<[1], [0], [0], [1], [0, 0, 1, 1], [], []>} : vector<16x128xbf16>, vector<128x512xbf16>, vector<16x512xf32> -> vector<16x512xf32>
    %144 = arith.addf %141, %143 : vector<16x512xf32>
    %145 = vector.extract_strided_slice %144 {offsets = [0, 0], sizes = [16, 128], strides = [1, 1]} : vector<16x512xf32> to vector<16x128xf32>
    %146 = arith.negf %145 : vector<16x128xf32>
    %147 = math.exp %146 : vector<16x128xf32>
    %cst_44 = arith.constant 1.000000e+00 : f32
    %148 = vector.broadcast %cst_44 : f32 to vector<16x128xf32>
    %149 = arith.addf %148, %147 : vector<16x128xf32>
    %150 = arith.divf %148, %149 : vector<16x128xf32>
    %151 = vector.extract_strided_slice %144 {offsets = [0, 128], sizes = [16, 128], strides = [1, 1]} : vector<16x512xf32> to vector<16x128xf32>
    %152 = arith.negf %151 : vector<16x128xf32>
    %153 = math.exp %152 : vector<16x128xf32>
    %cst_45 = arith.constant 1.000000e+00 : f32
    %154 = vector.broadcast %cst_45 : f32 to vector<16x128xf32>
    %155 = arith.addf %154, %153 : vector<16x128xf32>
    %156 = arith.divf %154, %155 : vector<16x128xf32>
    %157 = vector.extract_strided_slice %144 {offsets = [0, 256], sizes = [16, 128], strides = [1, 1]} : vector<16x512xf32> to vector<16x128xf32>
    %158 = math.tanh %157 : vector<16x128xf32>
    %159 = vector.extract_strided_slice %144 {offsets = [0, 384], sizes = [16, 128], strides = [1, 1]} : vector<16x512xf32> to vector<16x128xf32>
    %160 = arith.negf %159 : vector<16x128xf32>
    %161 = math.exp %160 : vector<16x128xf32>
    %cst_46 = arith.constant 1.000000e+00 : f32
    %162 = vector.broadcast %cst_46 : f32 to vector<16x128xf32>
    %163 = arith.addf %162, %161 : vector<16x128xf32>
    %164 = arith.divf %162, %163 : vector<16x128xf32>
    %165 = arith.mulf %156, %136 : vector<16x128xf32>
    %166 = arith.mulf %150, %158 : vector<16x128xf32>
    %167 = arith.addf %165, %166 : vector<16x128xf32>
    %168 = math.tanh %167 : vector<16x128xf32>
    %169 = arith.mulf %164, %168 : vector<16x128xf32>
    %c5_i32 = arith.constant 5 : i32
    %170 = arith.index_cast %c5_i32 : i32 to index
    %c0_47 = arith.constant 0 : index
    %c0_48 = arith.constant 0 : index
    %171 = vector.load %arg9[%170, %c0_47, %c0_48] : memref<8x16x512xf32, #tpu.memory_space<vmem>>, vector<1x16x512xf32>
    %172 = vector.shape_cast %171 : vector<1x16x512xf32> to vector<16x512xf32>
    %173 = arith.truncf %169 : vector<16x128xf32> to vector<16x128xbf16>
    %cst_49 = arith.constant dense<0.000000e+00> : vector<16x512xf32>
    %174 = tpu.matmul %173, %12, %cst_49 {dimension_numbers = #tpu.dot_dimension_numbers<[1], [0], [0], [1], [0, 0, 1, 1], [], []>} : vector<16x128xbf16>, vector<128x512xbf16>, vector<16x512xf32> -> vector<16x512xf32>
    %175 = arith.addf %172, %174 : vector<16x512xf32>
    %176 = vector.extract_strided_slice %175 {offsets = [0, 0], sizes = [16, 128], strides = [1, 1]} : vector<16x512xf32> to vector<16x128xf32>
    %177 = arith.negf %176 : vector<16x128xf32>
    %178 = math.exp %177 : vector<16x128xf32>
    %cst_50 = arith.constant 1.000000e+00 : f32
    %179 = vector.broadcast %cst_50 : f32 to vector<16x128xf32>
    %180 = arith.addf %179, %178 : vector<16x128xf32>
    %181 = arith.divf %179, %180 : vector<16x128xf32>
    %182 = vector.extract_strided_slice %175 {offsets = [0, 128], sizes = [16, 128], strides = [1, 1]} : vector<16x512xf32> to vector<16x128xf32>
    %183 = arith.negf %182 : vector<16x128xf32>
    %184 = math.exp %183 : vector<16x128xf32>
    %cst_51 = arith.constant 1.000000e+00 : f32
    %185 = vector.broadcast %cst_51 : f32 to vector<16x128xf32>
    %186 = arith.addf %185, %184 : vector<16x128xf32>
    %187 = arith.divf %185, %186 : vector<16x128xf32>
    %188 = vector.extract_strided_slice %175 {offsets = [0, 256], sizes = [16, 128], strides = [1, 1]} : vector<16x512xf32> to vector<16x128xf32>
    %189 = math.tanh %188 : vector<16x128xf32>
    %190 = vector.extract_strided_slice %175 {offsets = [0, 384], sizes = [16, 128], strides = [1, 1]} : vector<16x512xf32> to vector<16x128xf32>
    %191 = arith.negf %190 : vector<16x128xf32>
    %192 = math.exp %191 : vector<16x128xf32>
    %cst_52 = arith.constant 1.000000e+00 : f32
    %193 = vector.broadcast %cst_52 : f32 to vector<16x128xf32>
    %194 = arith.addf %193, %192 : vector<16x128xf32>
    %195 = arith.divf %193, %194 : vector<16x128xf32>
    %196 = arith.mulf %187, %167 : vector<16x128xf32>
    %197 = arith.mulf %181, %189 : vector<16x128xf32>
    %198 = arith.addf %196, %197 : vector<16x128xf32>
    %199 = math.tanh %198 : vector<16x128xf32>
    %200 = arith.mulf %195, %199 : vector<16x128xf32>
    %c6_i32 = arith.constant 6 : i32
    %201 = arith.index_cast %c6_i32 : i32 to index
    %c0_53 = arith.constant 0 : index
    %c0_54 = arith.constant 0 : index
    %202 = vector.load %arg9[%201, %c0_53, %c0_54] : memref<8x16x512xf32, #tpu.memory_space<vmem>>, vector<1x16x512xf32>
    %203 = vector.shape_cast %202 : vector<1x16x512xf32> to vector<16x512xf32>
    %204 = arith.truncf %200 : vector<16x128xf32> to vector<16x128xbf16>
    %cst_55 = arith.constant dense<0.000000e+00> : vector<16x512xf32>
    %205 = tpu.matmul %204, %12, %cst_55 {dimension_numbers = #tpu.dot_dimension_numbers<[1], [0], [0], [1], [0, 0, 1, 1], [], []>} : vector<16x128xbf16>, vector<128x512xbf16>, vector<16x512xf32> -> vector<16x512xf32>
    %206 = arith.addf %203, %205 : vector<16x512xf32>
    %207 = vector.extract_strided_slice %206 {offsets = [0, 0], sizes = [16, 128], strides = [1, 1]} : vector<16x512xf32> to vector<16x128xf32>
    %208 = arith.negf %207 : vector<16x128xf32>
    %209 = math.exp %208 : vector<16x128xf32>
    %cst_56 = arith.constant 1.000000e+00 : f32
    %210 = vector.broadcast %cst_56 : f32 to vector<16x128xf32>
    %211 = arith.addf %210, %209 : vector<16x128xf32>
    %212 = arith.divf %210, %211 : vector<16x128xf32>
    %213 = vector.extract_strided_slice %206 {offsets = [0, 128], sizes = [16, 128], strides = [1, 1]} : vector<16x512xf32> to vector<16x128xf32>
    %214 = arith.negf %213 : vector<16x128xf32>
    %215 = math.exp %214 : vector<16x128xf32>
    %cst_57 = arith.constant 1.000000e+00 : f32
    %216 = vector.broadcast %cst_57 : f32 to vector<16x128xf32>
    %217 = arith.addf %216, %215 : vector<16x128xf32>
    %218 = arith.divf %216, %217 : vector<16x128xf32>
    %219 = vector.extract_strided_slice %206 {offsets = [0, 256], sizes = [16, 128], strides = [1, 1]} : vector<16x512xf32> to vector<16x128xf32>
    %220 = math.tanh %219 : vector<16x128xf32>
    %221 = vector.extract_strided_slice %206 {offsets = [0, 384], sizes = [16, 128], strides = [1, 1]} : vector<16x512xf32> to vector<16x128xf32>
    %222 = arith.negf %221 : vector<16x128xf32>
    %223 = math.exp %222 : vector<16x128xf32>
    %cst_58 = arith.constant 1.000000e+00 : f32
    %224 = vector.broadcast %cst_58 : f32 to vector<16x128xf32>
    %225 = arith.addf %224, %223 : vector<16x128xf32>
    %226 = arith.divf %224, %225 : vector<16x128xf32>
    %227 = arith.mulf %218, %198 : vector<16x128xf32>
    %228 = arith.mulf %212, %220 : vector<16x128xf32>
    %229 = arith.addf %227, %228 : vector<16x128xf32>
    %230 = math.tanh %229 : vector<16x128xf32>
    %231 = arith.mulf %226, %230 : vector<16x128xf32>
    %c7_i32 = arith.constant 7 : i32
    %232 = arith.index_cast %c7_i32 : i32 to index
    %c0_59 = arith.constant 0 : index
    %c0_60 = arith.constant 0 : index
    %233 = vector.load %arg9[%232, %c0_59, %c0_60] : memref<8x16x512xf32, #tpu.memory_space<vmem>>, vector<1x16x512xf32>
    %234 = vector.shape_cast %233 : vector<1x16x512xf32> to vector<16x512xf32>
    %235 = arith.truncf %231 : vector<16x128xf32> to vector<16x128xbf16>
    %cst_61 = arith.constant dense<0.000000e+00> : vector<16x512xf32>
    %236 = tpu.matmul %235, %12, %cst_61 {dimension_numbers = #tpu.dot_dimension_numbers<[1], [0], [0], [1], [0, 0, 1, 1], [], []>} : vector<16x128xbf16>, vector<128x512xbf16>, vector<16x512xf32> -> vector<16x512xf32>
    %237 = arith.addf %234, %236 : vector<16x512xf32>
    %238 = vector.extract_strided_slice %237 {offsets = [0, 0], sizes = [16, 128], strides = [1, 1]} : vector<16x512xf32> to vector<16x128xf32>
    %239 = arith.negf %238 : vector<16x128xf32>
    %240 = math.exp %239 : vector<16x128xf32>
    %cst_62 = arith.constant 1.000000e+00 : f32
    %241 = vector.broadcast %cst_62 : f32 to vector<16x128xf32>
    %242 = arith.addf %241, %240 : vector<16x128xf32>
    %243 = arith.divf %241, %242 : vector<16x128xf32>
    %244 = vector.extract_strided_slice %237 {offsets = [0, 128], sizes = [16, 128], strides = [1, 1]} : vector<16x512xf32> to vector<16x128xf32>
    %245 = arith.negf %244 : vector<16x128xf32>
    %246 = math.exp %245 : vector<16x128xf32>
    %cst_63 = arith.constant 1.000000e+00 : f32
    %247 = vector.broadcast %cst_63 : f32 to vector<16x128xf32>
    %248 = arith.addf %247, %246 : vector<16x128xf32>
    %249 = arith.divf %247, %248 : vector<16x128xf32>
    %250 = vector.extract_strided_slice %237 {offsets = [0, 256], sizes = [16, 128], strides = [1, 1]} : vector<16x512xf32> to vector<16x128xf32>
    %251 = math.tanh %250 : vector<16x128xf32>
    %252 = vector.extract_strided_slice %237 {offsets = [0, 384], sizes = [16, 128], strides = [1, 1]} : vector<16x512xf32> to vector<16x128xf32>
    %253 = arith.negf %252 : vector<16x128xf32>
    %254 = math.exp %253 : vector<16x128xf32>
    %cst_64 = arith.constant 1.000000e+00 : f32
    %255 = vector.broadcast %cst_64 : f32 to vector<16x128xf32>
    %256 = arith.addf %255, %254 : vector<16x128xf32>
    %257 = arith.divf %255, %256 : vector<16x128xf32>
    %258 = arith.mulf %249, %229 : vector<16x128xf32>
    %259 = arith.mulf %243, %251 : vector<16x128xf32>
    %260 = arith.addf %258, %259 : vector<16x128xf32>
    %261 = math.tanh %260 : vector<16x128xf32>
    %262 = arith.mulf %257, %261 : vector<16x128xf32>
    %c8_i32 = arith.constant 8 : i32
    %c0_65 = arith.constant 0 : index
    %c0_66 = arith.constant 0 : index
    %263 = vector.load %arg10[%c0_65, %c0_66] : memref<16x128xf32, #tpu.memory_space<vmem>>, vector<16x128xf32>
    tpu.vector_store %arg10[%c0_65, %c0_66], %262 {strides = array<i32>} : memref<16x128xf32, #tpu.memory_space<vmem>>, vector<16x128xf32>,
    %c0_67 = arith.constant 0 : index
    %c0_68 = arith.constant 0 : index
    %264 = vector.load %arg11[%c0_67, %c0_68] : memref<16x128xf32, #tpu.memory_space<vmem>>, vector<16x128xf32>
    tpu.vector_store %arg11[%c0_67, %c0_68], %260 {strides = array<i32>} : memref<16x128xf32, #tpu.memory_space<vmem>>, vector<16x128xf32>,
    %c0_i32_69 = arith.constant 0 : i32
    %265 = arith.cmpi eq, %arg1, %c0_i32_69 : i32
    %266 = arith.extui %265 : i1 to i32
    %c0_i32_70 = arith.constant 0 : i32
    %267 = arith.cmpi ne, %266, %c0_i32_70 : i32
    scf.if %267 {
      %268 = arith.truncf %262 : vector<16x128xf32> to vector<16x128xbf16>
      %c0_71 = arith.constant 0 : index
      %c0_72 = arith.constant 0 : index
      %269 = vector.load %arg6[%c0_71, %c0_72] : memref<128x128xbf16, #tpu.memory_space<vmem>>, vector<128x128xbf16>
      %cst_73 = arith.constant dense<0.000000e+00> : vector<16x128xf32>
      %270 = tpu.matmul %268, %269, %cst_73 {dimension_numbers = #tpu.dot_dimension_numbers<[1], [0], [0], [1], [0, 0, 1, 1], [], []>} : vector<16x128xbf16>, vector<128x128xbf16>, vector<16x128xf32> -> vector<16x128xf32>
      %c0_74 = arith.constant 0 : index
      %c0_75 = arith.constant 0 : index
      %271 = vector.load %arg7[%c0_74, %c0_75] : memref<1x128xf32, #tpu.memory_space<vmem>>, vector<1x128xf32>
      %272 = vector.broadcast %271 : vector<1x128xf32> to vector<16x128xf32>
      %273 = arith.addf %270, %272 : vector<16x128xf32>
      %c0_76 = arith.constant 0 : index
      %c0_77 = arith.constant 0 : index
      %274 = vector.load %arg8[%c0_76, %c0_77] : memref<16x128xf32, #tpu.memory_space<vmem>>, vector<16x128xf32>
      tpu.vector_store %arg8[%c0_76, %c0_77], %273 {strides = array<i32>} : memref<16x128xf32, #tpu.memory_space<vmem>>, vector<16x128xf32>,
    } else {
    }
    return
  }
  func.func @transform_0(%arg0: i32, %arg1: i32) -> (i32, i32, i32) {
    %c0_i32 = arith.constant 0 : i32
    %c0_i32_0 = arith.constant 0 : i32
    return %arg1, %arg0, %c0_i32 : i32, i32, i32
  }
  func.func @transform_1(%arg0: i32, %arg1: i32) -> (i32, i32) {
    %c0_i32 = arith.constant 0 : i32
    %c0_i32_0 = arith.constant 0 : i32
    %c0_i32_1 = arith.constant 0 : i32
    return %c0_i32, %c0_i32_0 : i32, i32
  }
  func.func @transform_2(%arg0: i32, %arg1: i32) -> (i32, i32) {
    %c0_i32 = arith.constant 0 : i32
    %c0_i32_0 = arith.constant 0 : i32
    %c0_i32_1 = arith.constant 0 : i32
    return %c0_i32, %c0_i32_0 : i32, i32
  }
  func.func @transform_3(%arg0: i32, %arg1: i32) -> (i32, i32) {
    %c0_i32 = arith.constant 0 : i32
    %c0_i32_0 = arith.constant 0 : i32
    %c0_i32_1 = arith.constant 0 : i32
    return %c0_i32, %c0_i32_0 : i32, i32
  }
  func.func @transform_4(%arg0: i32, %arg1: i32) -> (i32, i32) {
    %c0_i32 = arith.constant 0 : i32
    %c0_i32_0 = arith.constant 0 : i32
    %c0_i32_1 = arith.constant 0 : i32
    return %c0_i32, %c0_i32_0 : i32, i32
  }
  func.func @transform_5(%arg0: i32, %arg1: i32) -> (i32, i32) {
    %c0_i32 = arith.constant 0 : i32
    %c0_i32_0 = arith.constant 0 : i32
    %c0_i32_1 = arith.constant 0 : i32
    return %c0_i32, %c0_i32_0 : i32, i32
  }
  func.func @transform_6(%arg0: i32, %arg1: i32) -> (i32, i32) {
    %c0_i32 = arith.constant 0 : i32
    %c0_i32_0 = arith.constant 0 : i32
    return %arg0, %c0_i32 : i32, i32
  }
}

module attributes {stable_mosaic.version = 11 : i64} {
  func.func @kernel(%arg0: i32, %arg1: i32, %arg2: memref<8x16x32xbf16, #tpu.memory_space<vmem>>, %arg3: memref<32x512xbf16, #tpu.memory_space<vmem>>, %arg4: memref<1x512xf32, #tpu.memory_space<vmem>>, %arg5: memref<128x512xbf16, #tpu.memory_space<vmem>>, %arg6: memref<128x128xbf16, #tpu.memory_space<vmem>>, %arg7: memref<1x128xf32, #tpu.memory_space<vmem>>, %arg8: memref<16x128xf32, #tpu.memory_space<vmem>>, %arg9: memref<8x16x512xf32, #tpu.memory_space<vmem>>, %arg10: memref<16x128xf32, #tpu.memory_space<vmem>>, %arg11: memref<16x128xf32, #tpu.memory_space<vmem>>) attributes {dimension_semantics = [#tpu.dimension_semantics<parallel>, #tpu.dimension_semantics<arbitrary>], iteration_bounds = array<i64: 1, 1>, scalar_prefetch = 0 : i64, scratch_operands = 3 : i64, tpu.core_type = #tpu.core_type<tc>, window_params = [{transform_indices = @transform_0, window_bounds = array<i64: 8, 16, 32>}, {pipeline_mode = #tpu.pipeline_mode<synchronous>, transform_indices = @transform_1, window_bounds = array<i64: 32, 512>}, {pipeline_mode = #tpu.pipeline_mode<synchronous>, transform_indices = @transform_2, window_bounds = array<i64: 1, 512>}, {pipeline_mode = #tpu.pipeline_mode<synchronous>, transform_indices = @transform_3, window_bounds = array<i64: 128, 512>}, {pipeline_mode = #tpu.pipeline_mode<synchronous>, transform_indices = @transform_4, window_bounds = array<i64: 128, 128>}, {pipeline_mode = #tpu.pipeline_mode<synchronous>, transform_indices = @transform_5, window_bounds = array<i64: 1, 128>}, {transform_indices = @transform_6, window_bounds = array<i64: 16, 128>}]} {
    %c0_i32 = arith.constant 0 : i32
    %0 = arith.cmpi eq, %arg1, %c0_i32 : i32
    %1 = arith.extui %0 : i1 to i32
    %c0_i32_0 = arith.constant 0 : i32
    %2 = arith.cmpi ne, %1, %c0_i32_0 : i32
    scf.if %2 {
      %cst_71 = arith.constant 0.000000e+00 : f32
      %268 = vector.broadcast %cst_71 : f32 to vector<16x128xf32>
      %c0_72 = arith.constant 0 : index
      %c0_73 = arith.constant 0 : index
      %269 = vector.load %arg10[%c0_72, %c0_73] : memref<16x128xf32, #tpu.memory_space<vmem>>, vector<16x128xf32>
      tpu.vector_store %arg10[%c0_72, %c0_73], %268 {strides = array<i32>} : memref<16x128xf32, #tpu.memory_space<vmem>>, vector<16x128xf32>,
      %cst_74 = arith.constant 0.000000e+00 : f32
      %270 = vector.broadcast %cst_74 : f32 to vector<16x128xf32>
      %c0_75 = arith.constant 0 : index
      %c0_76 = arith.constant 0 : index
      %271 = vector.load %arg11[%c0_75, %c0_76] : memref<16x128xf32, #tpu.memory_space<vmem>>, vector<16x128xf32>
      tpu.vector_store %arg11[%c0_75, %c0_76], %270 {strides = array<i32>} : memref<16x128xf32, #tpu.memory_space<vmem>>, vector<16x128xf32>,
    } else {
    }
    %c0 = arith.constant 0 : index
    %c0_1 = arith.constant 0 : index
    %c0_2 = arith.constant 0 : index
    %3 = vector.load %arg2[%c0, %c0_1, %c0_2] : memref<8x16x32xbf16, #tpu.memory_space<vmem>>, vector<8x16x32xbf16>
    %4 = vector.shape_cast %3 : vector<8x16x32xbf16> to vector<128x32xbf16>
    %c0_3 = arith.constant 0 : index
    %c0_4 = arith.constant 0 : index
    %5 = vector.load %arg3[%c0_3, %c0_4] : memref<32x512xbf16, #tpu.memory_space<vmem>>, vector<32x512xbf16>
    %cst = arith.constant dense<0.000000e+00> : vector<128x512xf32>
    %6 = tpu.matmul %4, %5, %cst {dimension_numbers = #tpu.dot_dimension_numbers<[1], [0], [0], [1], [0, 0, 1, 1], [], []>} : vector<128x32xbf16>, vector<32x512xbf16>, vector<128x512xf32> -> vector<128x512xf32>
    %c0_5 = arith.constant 0 : index
    %c0_6 = arith.constant 0 : index
    %7 = vector.load %arg4[%c0_5, %c0_6] : memref<1x512xf32, #tpu.memory_space<vmem>>, vector<1x512xf32>
    %8 = vector.broadcast %7 : vector<1x512xf32> to vector<128x512xf32>
    %9 = arith.addf %6, %8 : vector<128x512xf32>
    %10 = vector.shape_cast %9 : vector<128x512xf32> to vector<8x16x512xf32>
    %c0_7 = arith.constant 0 : index
    %c0_8 = arith.constant 0 : index
    %c0_9 = arith.constant 0 : index
    %11 = vector.load %arg9[%c0_7, %c0_8, %c0_9] : memref<8x16x512xf32, #tpu.memory_space<vmem>>, vector<8x16x512xf32>
    tpu.vector_store %arg9[%c0_7, %c0_8, %c0_9], %10 {strides = array<i32>} : memref<8x16x512xf32, #tpu.memory_space<vmem>>, vector<8x16x512xf32>,
    %c0_10 = arith.constant 0 : index
    %c0_11 = arith.constant 0 : index
    %12 = vector.load %arg5[%c0_10, %c0_11] : memref<128x512xbf16, #tpu.memory_space<vmem>>, vector<128x512xbf16>
    %c0_12 = arith.constant 0 : index
    %c0_13 = arith.constant 0 : index
    %13 = vector.load %arg10[%c0_12, %c0_13] : memref<16x128xf32, #tpu.memory_space<vmem>>, vector<16x128xf32>
    %c0_14 = arith.constant 0 : index
    %c0_15 = arith.constant 0 : index
    %14 = vector.load %arg11[%c0_14, %c0_15] : memref<16x128xf32, #tpu.memory_space<vmem>>, vector<16x128xf32>
    %c0_i32_16 = arith.constant 0 : i32
    %15 = arith.index_cast %c0_i32_16 : i32 to index
    %c0_17 = arith.constant 0 : index
    %c0_18 = arith.constant 0 : index
    %16 = vector.load %arg9[%15, %c0_17, %c0_18] : memref<8x16x512xf32, #tpu.memory_space<vmem>>, vector<1x16x512xf32>
    %17 = vector.shape_cast %16 : vector<1x16x512xf32> to vector<16x512xf32>
    %18 = arith.truncf %13 : vector<16x128xf32> to vector<16x128xbf16>
    %cst_19 = arith.constant dense<0.000000e+00> : vector<16x512xf32>
    %19 = tpu.matmul %18, %12, %cst_19 {dimension_numbers = #tpu.dot_dimension_numbers<[1], [0], [0], [1], [0, 0, 1, 1], [], []>} : vector<16x128xbf16>, vector<128x512xbf16>, vector<16x512xf32> -> vector<16x512xf32>
    %20 = arith.addf %17, %19 : vector<16x512xf32>
    %21 = vector.extract_strided_slice %20 {offsets = [0, 0], sizes = [16, 128], strides = [1, 1]} : vector<16x512xf32> to vector<16x128xf32>
    %22 = arith.negf %21 : vector<16x128xf32>
    %23 = math.exp %22 : vector<16x128xf32>
    %cst_20 = arith.constant 1.000000e+00 : f32
    %24 = vector.broadcast %cst_20 : f32 to vector<16x128xf32>
    %25 = arith.addf %24, %23 : vector<16x128xf32>
    %26 = arith.divf %24, %25 : vector<16x128xf32>
    %27 = vector.extract_strided_slice %20 {offsets = [0, 128], sizes = [16, 128], strides = [1, 1]} : vector<16x512xf32> to vector<16x128xf32>
    %28 = arith.negf %27 : vector<16x128xf32>
    %29 = math.exp %28 : vector<16x128xf32>
    %cst_21 = arith.constant 1.000000e+00 : f32
    %30 = vector.broadcast %cst_21 : f32 to vector<16x128xf32>
    %31 = arith.addf %30, %29 : vector<16x128xf32>
    %32 = arith.divf %30, %31 : vector<16x128xf32>
    %33 = vector.extract_strided_slice %20 {offsets = [0, 256], sizes = [16, 128], strides = [1, 1]} : vector<16x512xf32> to vector<16x128xf32>
    %34 = math.tanh %33 : vector<16x128xf32>
    %35 = vector.extract_strided_slice %20 {offsets = [0, 384], sizes = [16, 128], strides = [1, 1]} : vector<16x512xf32> to vector<16x128xf32>
    %36 = arith.negf %35 : vector<16x128xf32>
    %37 = math.exp %36 : vector<16x128xf32>
    %cst_22 = arith.constant 1.000000e+00 : f32
    %38 = vector.broadcast %cst_22 : f32 to vector<16x128xf32>
    %39 = arith.addf %38, %37 : vector<16x128xf32>
    %40 = arith.divf %38, %39 : vector<16x128xf32>
    %41 = arith.mulf %32, %14 : vector<16x128xf32>
    %42 = arith.mulf %26, %34 : vector<16x128xf32>
    %43 = arith.addf %41, %42 : vector<16x128xf32>
    %44 = math.tanh %43 : vector<16x128xf32>
    %45 = arith.mulf %40, %44 : vector<16x128xf32>
    %c1_i32 = arith.constant 1 : i32
    %46 = arith.index_cast %c1_i32 : i32 to index
    %c0_23 = arith.constant 0 : index
    %c0_24 = arith.constant 0 : index
    %47 = vector.load %arg9[%46, %c0_23, %c0_24] : memref<8x16x512xf32, #tpu.memory_space<vmem>>, vector<1x16x512xf32>
    %48 = vector.shape_cast %47 : vector<1x16x512xf32> to vector<16x512xf32>
    %49 = arith.truncf %45 : vector<16x128xf32> to vector<16x128xbf16>
    %cst_25 = arith.constant dense<0.000000e+00> : vector<16x512xf32>
    %50 = tpu.matmul %49, %12, %cst_25 {dimension_numbers = #tpu.dot_dimension_numbers<[1], [0], [0], [1], [0, 0, 1, 1], [], []>} : vector<16x128xbf16>, vector<128x512xbf16>, vector<16x512xf32> -> vector<16x512xf32>
    %51 = arith.addf %48, %50 : vector<16x512xf32>
    %52 = vector.extract_strided_slice %51 {offsets = [0, 0], sizes = [16, 128], strides = [1, 1]} : vector<16x512xf32> to vector<16x128xf32>
    %53 = arith.negf %52 : vector<16x128xf32>
    %54 = math.exp %53 : vector<16x128xf32>
    %cst_26 = arith.constant 1.000000e+00 : f32
    %55 = vector.broadcast %cst_26 : f32 to vector<16x128xf32>
    %56 = arith.addf %55, %54 : vector<16x128xf32>
    %57 = arith.divf %55, %56 : vector<16x128xf32>
    %58 = vector.extract_strided_slice %51 {offsets = [0, 128], sizes = [16, 128], strides = [1, 1]} : vector<16x512xf32> to vector<16x128xf32>
    %59 = arith.negf %58 : vector<16x128xf32>
    %60 = math.exp %59 : vector<16x128xf32>
    %cst_27 = arith.constant 1.000000e+00 : f32
    %61 = vector.broadcast %cst_27 : f32 to vector<16x128xf32>
    %62 = arith.addf %61, %60 : vector<16x128xf32>
    %63 = arith.divf %61, %62 : vector<16x128xf32>
    %64 = vector.extract_strided_slice %51 {offsets = [0, 256], sizes = [16, 128], strides = [1, 1]} : vector<16x512xf32> to vector<16x128xf32>
    %65 = math.tanh %64 : vector<16x128xf32>
    %66 = vector.extract_strided_slice %51 {offsets = [0, 384], sizes = [16, 128], strides = [1, 1]} : vector<16x512xf32> to vector<16x128xf32>
    %67 = arith.negf %66 : vector<16x128xf32>
    %68 = math.exp %67 : vector<16x128xf32>
    %cst_28 = arith.constant 1.000000e+00 : f32
    %69 = vector.broadcast %cst_28 : f32 to vector<16x128xf32>
    %70 = arith.addf %69, %68 : vector<16x128xf32>
    %71 = arith.divf %69, %70 : vector<16x128xf32>
    %72 = arith.mulf %63, %43 : vector<16x128xf32>
    %73 = arith.mulf %57, %65 : vector<16x128xf32>
    %74 = arith.addf %72, %73 : vector<16x128xf32>
    %75 = math.tanh %74 : vector<16x128xf32>
    %76 = arith.mulf %71, %75 : vector<16x128xf32>
    %c2_i32 = arith.constant 2 : i32
    %77 = arith.index_cast %c2_i32 : i32 to index
    %c0_29 = arith.constant 0 : index
    %c0_30 = arith.constant 0 : index
    %78 = vector.load %arg9[%77, %c0_29, %c0_30] : memref<8x16x512xf32, #tpu.memory_space<vmem>>, vector<1x16x512xf32>
    %79 = vector.shape_cast %78 : vector<1x16x512xf32> to vector<16x512xf32>
    %80 = arith.truncf %76 : vector<16x128xf32> to vector<16x128xbf16>
    %cst_31 = arith.constant dense<0.000000e+00> : vector<16x512xf32>
    %81 = tpu.matmul %80, %12, %cst_31 {dimension_numbers = #tpu.dot_dimension_numbers<[1], [0], [0], [1], [0, 0, 1, 1], [], []>} : vector<16x128xbf16>, vector<128x512xbf16>, vector<16x512xf32> -> vector<16x512xf32>
    %82 = arith.addf %79, %81 : vector<16x512xf32>
    %83 = vector.extract_strided_slice %82 {offsets = [0, 0], sizes = [16, 128], strides = [1, 1]} : vector<16x512xf32> to vector<16x128xf32>
    %84 = arith.negf %83 : vector<16x128xf32>
    %85 = math.exp %84 : vector<16x128xf32>
    %cst_32 = arith.constant 1.000000e+00 : f32
    %86 = vector.broadcast %cst_32 : f32 to vector<16x128xf32>
    %87 = arith.addf %86, %85 : vector<16x128xf32>
    %88 = arith.divf %86, %87 : vector<16x128xf32>
    %89 = vector.extract_strided_slice %82 {offsets = [0, 128], sizes = [16, 128], strides = [1, 1]} : vector<16x512xf32> to vector<16x128xf32>
    %90 = arith.negf %89 : vector<16x128xf32>
    %91 = math.exp %90 : vector<16x128xf32>
    %cst_33 = arith.constant 1.000000e+00 : f32
    %92 = vector.broadcast %cst_33 : f32 to vector<16x128xf32>
    %93 = arith.addf %92, %91 : vector<16x128xf32>
    %94 = arith.divf %92, %93 : vector<16x128xf32>
    %95 = vector.extract_strided_slice %82 {offsets = [0, 256], sizes = [16, 128], strides = [1, 1]} : vector<16x512xf32> to vector<16x128xf32>
    %96 = math.tanh %95 : vector<16x128xf32>
    %97 = vector.extract_strided_slice %82 {offsets = [0, 384], sizes = [16, 128], strides = [1, 1]} : vector<16x512xf32> to vector<16x128xf32>
    %98 = arith.negf %97 : vector<16x128xf32>
    %99 = math.exp %98 : vector<16x128xf32>
    %cst_34 = arith.constant 1.000000e+00 : f32
    %100 = vector.broadcast %cst_34 : f32 to vector<16x128xf32>
    %101 = arith.addf %100, %99 : vector<16x128xf32>
    %102 = arith.divf %100, %101 : vector<16x128xf32>
    %103 = arith.mulf %94, %74 : vector<16x128xf32>
    %104 = arith.mulf %88, %96 : vector<16x128xf32>
    %105 = arith.addf %103, %104 : vector<16x128xf32>
    %106 = math.tanh %105 : vector<16x128xf32>
    %107 = arith.mulf %102, %106 : vector<16x128xf32>
    %c3_i32 = arith.constant 3 : i32
    %108 = arith.index_cast %c3_i32 : i32 to index
    %c0_35 = arith.constant 0 : index
    %c0_36 = arith.constant 0 : index
    %109 = vector.load %arg9[%108, %c0_35, %c0_36] : memref<8x16x512xf32, #tpu.memory_space<vmem>>, vector<1x16x512xf32>
    %110 = vector.shape_cast %109 : vector<1x16x512xf32> to vector<16x512xf32>
    %111 = arith.truncf %107 : vector<16x128xf32> to vector<16x128xbf16>
    %cst_37 = arith.constant dense<0.000000e+00> : vector<16x512xf32>
    %112 = tpu.matmul %111, %12, %cst_37 {dimension_numbers = #tpu.dot_dimension_numbers<[1], [0], [0], [1], [0, 0, 1, 1], [], []>} : vector<16x128xbf16>, vector<128x512xbf16>, vector<16x512xf32> -> vector<16x512xf32>
    %113 = arith.addf %110, %112 : vector<16x512xf32>
    %114 = vector.extract_strided_slice %113 {offsets = [0, 0], sizes = [16, 128], strides = [1, 1]} : vector<16x512xf32> to vector<16x128xf32>
    %115 = arith.negf %114 : vector<16x128xf32>
    %116 = math.exp %115 : vector<16x128xf32>
    %cst_38 = arith.constant 1.000000e+00 : f32
    %117 = vector.broadcast %cst_38 : f32 to vector<16x128xf32>
    %118 = arith.addf %117, %116 : vector<16x128xf32>
    %119 = arith.divf %117, %118 : vector<16x128xf32>
    %120 = vector.extract_strided_slice %113 {offsets = [0, 128], sizes = [16, 128], strides = [1, 1]} : vector<16x512xf32> to vector<16x128xf32>
    %121 = arith.negf %120 : vector<16x128xf32>
    %122 = math.exp %121 : vector<16x128xf32>
    %cst_39 = arith.constant 1.000000e+00 : f32
    %123 = vector.broadcast %cst_39 : f32 to vector<16x128xf32>
    %124 = arith.addf %123, %122 : vector<16x128xf32>
    %125 = arith.divf %123, %124 : vector<16x128xf32>
    %126 = vector.extract_strided_slice %113 {offsets = [0, 256], sizes = [16, 128], strides = [1, 1]} : vector<16x512xf32> to vector<16x128xf32>
    %127 = math.tanh %126 : vector<16x128xf32>
    %128 = vector.extract_strided_slice %113 {offsets = [0, 384], sizes = [16, 128], strides = [1, 1]} : vector<16x512xf32> to vector<16x128xf32>
    %129 = arith.negf %128 : vector<16x128xf32>
    %130 = math.exp %129 : vector<16x128xf32>
    %cst_40 = arith.constant 1.000000e+00 : f32
    %131 = vector.broadcast %cst_40 : f32 to vector<16x128xf32>
    %132 = arith.addf %131, %130 : vector<16x128xf32>
    %133 = arith.divf %131, %132 : vector<16x128xf32>
    %134 = arith.mulf %125, %105 : vector<16x128xf32>
    %135 = arith.mulf %119, %127 : vector<16x128xf32>
    %136 = arith.addf %134, %135 : vector<16x128xf32>
    %137 = math.tanh %136 : vector<16x128xf32>
    %138 = arith.mulf %133, %137 : vector<16x128xf32>
    %c4_i32 = arith.constant 4 : i32
    %139 = arith.index_cast %c4_i32 : i32 to index
    %c0_41 = arith.constant 0 : index
    %c0_42 = arith.constant 0 : index
    %140 = vector.load %arg9[%139, %c0_41, %c0_42] : memref<8x16x512xf32, #tpu.memory_space<vmem>>, vector<1x16x512xf32>
    %141 = vector.shape_cast %140 : vector<1x16x512xf32> to vector<16x512xf32>
    %142 = arith.truncf %138 : vector<16x128xf32> to vector<16x128xbf16>
    %cst_43 = arith.constant dense<0.000000e+00> : vector<16x512xf32>
    %143 = tpu.matmul %142, %12, %cst_43 {dimension_numbers = #tpu.dot_dimension_numbers<[1], [0], [0], [1], [0, 0, 1, 1], [], []>} : vector<16x128xbf16>, vector<128x512xbf16>, vector<16x512xf32> -> vector<16x512xf32>
    %144 = arith.addf %141, %143 : vector<16x512xf32>
    %145 = vector.extract_strided_slice %144 {offsets = [0, 0], sizes = [16, 128], strides = [1, 1]} : vector<16x512xf32> to vector<16x128xf32>
    %146 = arith.negf %145 : vector<16x128xf32>
    %147 = math.exp %146 : vector<16x128xf32>
    %cst_44 = arith.constant 1.000000e+00 : f32
    %148 = vector.broadcast %cst_44 : f32 to vector<16x128xf32>
    %149 = arith.addf %148, %147 : vector<16x128xf32>
    %150 = arith.divf %148, %149 : vector<16x128xf32>
    %151 = vector.extract_strided_slice %144 {offsets = [0, 128], sizes = [16, 128], strides = [1, 1]} : vector<16x512xf32> to vector<16x128xf32>
    %152 = arith.negf %151 : vector<16x128xf32>
    %153 = math.exp %152 : vector<16x128xf32>
    %cst_45 = arith.constant 1.000000e+00 : f32
    %154 = vector.broadcast %cst_45 : f32 to vector<16x128xf32>
    %155 = arith.addf %154, %153 : vector<16x128xf32>
    %156 = arith.divf %154, %155 : vector<16x128xf32>
    %157 = vector.extract_strided_slice %144 {offsets = [0, 256], sizes = [16, 128], strides = [1, 1]} : vector<16x512xf32> to vector<16x128xf32>
    %158 = math.tanh %157 : vector<16x128xf32>
    %159 = vector.extract_strided_slice %144 {offsets = [0, 384], sizes = [16, 128], strides = [1, 1]} : vector<16x512xf32> to vector<16x128xf32>
    %160 = arith.negf %159 : vector<16x128xf32>
    %161 = math.exp %160 : vector<16x128xf32>
    %cst_46 = arith.constant 1.000000e+00 : f32
    %162 = vector.broadcast %cst_46 : f32 to vector<16x128xf32>
    %163 = arith.addf %162, %161 : vector<16x128xf32>
    %164 = arith.divf %162, %163 : vector<16x128xf32>
    %165 = arith.mulf %156, %136 : vector<16x128xf32>
    %166 = arith.mulf %150, %158 : vector<16x128xf32>
    %167 = arith.addf %165, %166 : vector<16x128xf32>
    %168 = math.tanh %167 : vector<16x128xf32>
    %169 = arith.mulf %164, %168 : vector<16x128xf32>
    %c5_i32 = arith.constant 5 : i32
    %170 = arith.index_cast %c5_i32 : i32 to index
    %c0_47 = arith.constant 0 : index
    %c0_48 = arith.constant 0 : index
    %171 = vector.load %arg9[%170, %c0_47, %c0_48] : memref<8x16x512xf32, #tpu.memory_space<vmem>>, vector<1x16x512xf32>
    %172 = vector.shape_cast %171 : vector<1x16x512xf32> to vector<16x512xf32>
    %173 = arith.truncf %169 : vector<16x128xf32> to vector<16x128xbf16>
    %cst_49 = arith.constant dense<0.000000e+00> : vector<16x512xf32>
    %174 = tpu.matmul %173, %12, %cst_49 {dimension_numbers = #tpu.dot_dimension_numbers<[1], [0], [0], [1], [0, 0, 1, 1], [], []>} : vector<16x128xbf16>, vector<128x512xbf16>, vector<16x512xf32> -> vector<16x512xf32>
    %175 = arith.addf %172, %174 : vector<16x512xf32>
    %176 = vector.extract_strided_slice %175 {offsets = [0, 0], sizes = [16, 128], strides = [1, 1]} : vector<16x512xf32> to vector<16x128xf32>
    %177 = arith.negf %176 : vector<16x128xf32>
    %178 = math.exp %177 : vector<16x128xf32>
    %cst_50 = arith.constant 1.000000e+00 : f32
    %179 = vector.broadcast %cst_50 : f32 to vector<16x128xf32>
    %180 = arith.addf %179, %178 : vector<16x128xf32>
    %181 = arith.divf %179, %180 : vector<16x128xf32>
    %182 = vector.extract_strided_slice %175 {offsets = [0, 128], sizes = [16, 128], strides = [1, 1]} : vector<16x512xf32> to vector<16x128xf32>
    %183 = arith.negf %182 : vector<16x128xf32>
    %184 = math.exp %183 : vector<16x128xf32>
    %cst_51 = arith.constant 1.000000e+00 : f32
    %185 = vector.broadcast %cst_51 : f32 to vector<16x128xf32>
    %186 = arith.addf %185, %184 : vector<16x128xf32>
    %187 = arith.divf %185, %186 : vector<16x128xf32>
    %188 = vector.extract_strided_slice %175 {offsets = [0, 256], sizes = [16, 128], strides = [1, 1]} : vector<16x512xf32> to vector<16x128xf32>
    %189 = math.tanh %188 : vector<16x128xf32>
    %190 = vector.extract_strided_slice %175 {offsets = [0, 384], sizes = [16, 128], strides = [1, 1]} : vector<16x512xf32> to vector<16x128xf32>
    %191 = arith.negf %190 : vector<16x128xf32>
    %192 = math.exp %191 : vector<16x128xf32>
    %cst_52 = arith.constant 1.000000e+00 : f32
    %193 = vector.broadcast %cst_52 : f32 to vector<16x128xf32>
    %194 = arith.addf %193, %192 : vector<16x128xf32>
    %195 = arith.divf %193, %194 : vector<16x128xf32>
    %196 = arith.mulf %187, %167 : vector<16x128xf32>
    %197 = arith.mulf %181, %189 : vector<16x128xf32>
    %198 = arith.addf %196, %197 : vector<16x128xf32>
    %199 = math.tanh %198 : vector<16x128xf32>
    %200 = arith.mulf %195, %199 : vector<16x128xf32>
    %c6_i32 = arith.constant 6 : i32
    %201 = arith.index_cast %c6_i32 : i32 to index
    %c0_53 = arith.constant 0 : index
    %c0_54 = arith.constant 0 : index
    %202 = vector.load %arg9[%201, %c0_53, %c0_54] : memref<8x16x512xf32, #tpu.memory_space<vmem>>, vector<1x16x512xf32>
    %203 = vector.shape_cast %202 : vector<1x16x512xf32> to vector<16x512xf32>
    %204 = arith.truncf %200 : vector<16x128xf32> to vector<16x128xbf16>
    %cst_55 = arith.constant dense<0.000000e+00> : vector<16x512xf32>
    %205 = tpu.matmul %204, %12, %cst_55 {dimension_numbers = #tpu.dot_dimension_numbers<[1], [0], [0], [1], [0, 0, 1, 1], [], []>} : vector<16x128xbf16>, vector<128x512xbf16>, vector<16x512xf32> -> vector<16x512xf32>
    %206 = arith.addf %203, %205 : vector<16x512xf32>
    %207 = vector.extract_strided_slice %206 {offsets = [0, 0], sizes = [16, 128], strides = [1, 1]} : vector<16x512xf32> to vector<16x128xf32>
    %208 = arith.negf %207 : vector<16x128xf32>
    %209 = math.exp %208 : vector<16x128xf32>
    %cst_56 = arith.constant 1.000000e+00 : f32
    %210 = vector.broadcast %cst_56 : f32 to vector<16x128xf32>
    %211 = arith.addf %210, %209 : vector<16x128xf32>
    %212 = arith.divf %210, %211 : vector<16x128xf32>
    %213 = vector.extract_strided_slice %206 {offsets = [0, 128], sizes = [16, 128], strides = [1, 1]} : vector<16x512xf32> to vector<16x128xf32>
    %214 = arith.negf %213 : vector<16x128xf32>
    %215 = math.exp %214 : vector<16x128xf32>
    %cst_57 = arith.constant 1.000000e+00 : f32
    %216 = vector.broadcast %cst_57 : f32 to vector<16x128xf32>
    %217 = arith.addf %216, %215 : vector<16x128xf32>
    %218 = arith.divf %216, %217 : vector<16x128xf32>
    %219 = vector.extract_strided_slice %206 {offsets = [0, 256], sizes = [16, 128], strides = [1, 1]} : vector<16x512xf32> to vector<16x128xf32>
    %220 = math.tanh %219 : vector<16x128xf32>
    %221 = vector.extract_strided_slice %206 {offsets = [0, 384], sizes = [16, 128], strides = [1, 1]} : vector<16x512xf32> to vector<16x128xf32>
    %222 = arith.negf %221 : vector<16x128xf32>
    %223 = math.exp %222 : vector<16x128xf32>
    %cst_58 = arith.constant 1.000000e+00 : f32
    %224 = vector.broadcast %cst_58 : f32 to vector<16x128xf32>
    %225 = arith.addf %224, %223 : vector<16x128xf32>
    %226 = arith.divf %224, %225 : vector<16x128xf32>
    %227 = arith.mulf %218, %198 : vector<16x128xf32>
    %228 = arith.mulf %212, %220 : vector<16x128xf32>
    %229 = arith.addf %227, %228 : vector<16x128xf32>
    %230 = math.tanh %229 : vector<16x128xf32>
    %231 = arith.mulf %226, %230 : vector<16x128xf32>
    %c7_i32 = arith.constant 7 : i32
    %232 = arith.index_cast %c7_i32 : i32 to index
    %c0_59 = arith.constant 0 : index
    %c0_60 = arith.constant 0 : index
    %233 = vector.load %arg9[%232, %c0_59, %c0_60] : memref<8x16x512xf32, #tpu.memory_space<vmem>>, vector<1x16x512xf32>
    %234 = vector.shape_cast %233 : vector<1x16x512xf32> to vector<16x512xf32>
    %235 = arith.truncf %231 : vector<16x128xf32> to vector<16x128xbf16>
    %cst_61 = arith.constant dense<0.000000e+00> : vector<16x512xf32>
    %236 = tpu.matmul %235, %12, %cst_61 {dimension_numbers = #tpu.dot_dimension_numbers<[1], [0], [0], [1], [0, 0, 1, 1], [], []>} : vector<16x128xbf16>, vector<128x512xbf16>, vector<16x512xf32> -> vector<16x512xf32>
    %237 = arith.addf %234, %236 : vector<16x512xf32>
    %238 = vector.extract_strided_slice %237 {offsets = [0, 0], sizes = [16, 128], strides = [1, 1]} : vector<16x512xf32> to vector<16x128xf32>
    %239 = arith.negf %238 : vector<16x128xf32>
    %240 = math.exp %239 : vector<16x128xf32>
    %cst_62 = arith.constant 1.000000e+00 : f32
    %241 = vector.broadcast %cst_62 : f32 to vector<16x128xf32>
    %242 = arith.addf %241, %240 : vector<16x128xf32>
    %243 = arith.divf %241, %242 : vector<16x128xf32>
    %244 = vector.extract_strided_slice %237 {offsets = [0, 128], sizes = [16, 128], strides = [1, 1]} : vector<16x512xf32> to vector<16x128xf32>
    %245 = arith.negf %244 : vector<16x128xf32>
    %246 = math.exp %245 : vector<16x128xf32>
    %cst_63 = arith.constant 1.000000e+00 : f32
    %247 = vector.broadcast %cst_63 : f32 to vector<16x128xf32>
    %248 = arith.addf %247, %246 : vector<16x128xf32>
    %249 = arith.divf %247, %248 : vector<16x128xf32>
    %250 = vector.extract_strided_slice %237 {offsets = [0, 256], sizes = [16, 128], strides = [1, 1]} : vector<16x512xf32> to vector<16x128xf32>
    %251 = math.tanh %250 : vector<16x128xf32>
    %252 = vector.extract_strided_slice %237 {offsets = [0, 384], sizes = [16, 128], strides = [1, 1]} : vector<16x512xf32> to vector<16x128xf32>
    %253 = arith.negf %252 : vector<16x128xf32>
    %254 = math.exp %253 : vector<16x128xf32>
    %cst_64 = arith.constant 1.000000e+00 : f32
    %255 = vector.broadcast %cst_64 : f32 to vector<16x128xf32>
    %256 = arith.addf %255, %254 : vector<16x128xf32>
    %257 = arith.divf %255, %256 : vector<16x128xf32>
    %258 = arith.mulf %249, %229 : vector<16x128xf32>
    %259 = arith.mulf %243, %251 : vector<16x128xf32>
    %260 = arith.addf %258, %259 : vector<16x128xf32>
    %261 = math.tanh %260 : vector<16x128xf32>
    %262 = arith.mulf %257, %261 : vector<16x128xf32>
    %c8_i32 = arith.constant 8 : i32
    %c0_65 = arith.constant 0 : index
    %c0_66 = arith.constant 0 : index
    %263 = vector.load %arg10[%c0_65, %c0_66] : memref<16x128xf32, #tpu.memory_space<vmem>>, vector<16x128xf32>
    tpu.vector_store %arg10[%c0_65, %c0_66], %262 {strides = array<i32>} : memref<16x128xf32, #tpu.memory_space<vmem>>, vector<16x128xf32>,
    %c0_67 = arith.constant 0 : index
    %c0_68 = arith.constant 0 : index
    %264 = vector.load %arg11[%c0_67, %c0_68] : memref<16x128xf32, #tpu.memory_space<vmem>>, vector<16x128xf32>
    tpu.vector_store %arg11[%c0_67, %c0_68], %260 {strides = array<i32>} : memref<16x128xf32, #tpu.memory_space<vmem>>, vector<16x128xf32>,
    %c0_i32_69 = arith.constant 0 : i32
    %265 = arith.cmpi eq, %arg1, %c0_i32_69 : i32
    %266 = arith.extui %265 : i1 to i32
    %c0_i32_70 = arith.constant 0 : i32
    %267 = arith.cmpi ne, %266, %c0_i32_70 : i32
    scf.if %267 {
      %268 = arith.truncf %262 : vector<16x128xf32> to vector<16x128xbf16>
      %c0_71 = arith.constant 0 : index
      %c0_72 = arith.constant 0 : index
      %269 = vector.load %arg6[%c0_71, %c0_72] : memref<128x128xbf16, #tpu.memory_space<vmem>>, vector<128x128xbf16>
      %cst_73 = arith.constant dense<0.000000e+00> : vector<16x128xf32>
      %270 = tpu.matmul %268, %269, %cst_73 {dimension_numbers = #tpu.dot_dimension_numbers<[1], [0], [0], [1], [0, 0, 1, 1], [], []>} : vector<16x128xbf16>, vector<128x128xbf16>, vector<16x128xf32> -> vector<16x128xf32>
      %c0_74 = arith.constant 0 : index
      %c0_75 = arith.constant 0 : index
      %271 = vector.load %arg7[%c0_74, %c0_75] : memref<1x128xf32, #tpu.memory_space<vmem>>, vector<1x128xf32>
      %272 = vector.broadcast %271 : vector<1x128xf32> to vector<16x128xf32>
      %273 = arith.addf %270, %272 : vector<16x128xf32>
      %c0_76 = arith.constant 0 : index
      %c0_77 = arith.constant 0 : index
      %274 = vector.load %arg8[%c0_76, %c0_77] : memref<16x128xf32, #tpu.memory_space<vmem>>, vector<16x128xf32>
      tpu.vector_store %arg8[%c0_76, %c0_77], %273 {strides = array<i32>} : memref<16x128xf32, #tpu.memory_space<vmem>>, vector<16x128xf32>,
    } else {
    }
    return
  }
  func.func @transform_0(%arg0: i32, %arg1: i32) -> (i32, i32, i32) {
    %c0_i32 = arith.constant 0 : i32
    %c0_i32_0 = arith.constant 0 : i32
    return %arg1, %arg0, %c0_i32 : i32, i32, i32
  }
  func.func @transform_1(%arg0: i32, %arg1: i32) -> (i32, i32) {
    %c0_i32 = arith.constant 0 : i32
    %c0_i32_0 = arith.constant 0 : i32
    %c0_i32_1 = arith.constant 0 : i32
    return %c0_i32, %c0_i32_0 : i32, i32
  }
  func.func @transform_2(%arg0: i32, %arg1: i32) -> (i32, i32) {
    %c0_i32 = arith.constant 0 : i32
    %c0_i32_0 = arith.constant 0 : i32
    %c0_i32_1 = arith.constant 0 : i32
    return %c0_i32, %c0_i32_0 : i32, i32
  }
  func.func @transform_3(%arg0: i32, %arg1: i32) -> (i32, i32) {
    %c0_i32 = arith.constant 0 : i32
    %c0_i32_0 = arith.constant 0 : i32
    %c0_i32_1 = arith.constant 0 : i32
    return %c0_i32, %c0_i32_0 : i32, i32
  }
  func.func @transform_4(%arg0: i32, %arg1: i32) -> (i32, i32) {
    %c0_i32 = arith.constant 0 : i32
    %c0_i32_0 = arith.constant 0 : i32
    %c0_i32_1 = arith.constant 0 : i32
    return %c0_i32, %c0_i32_0 : i32, i32
  }
  func.func @transform_5(%arg0: i32, %arg1: i32) -> (i32, i32) {
    %c0_i32 = arith.constant 0 : i32
    %c0_i32_0 = arith.constant 0 : i32
    %c0_i32_1 = arith.constant 0 : i32
    return %c0_i32, %c0_i32_0 : i32, i32
  }
  func.func @transform_6(%arg0: i32, %arg1: i32) -> (i32, i32) {
    %c0_i32 = arith.constant 0 : i32
    %c0_i32_0 = arith.constant 0 : i32
    return %arg0, %c0_i32 : i32, i32
  }
}

</mosaic_0001>

<bundles_post_ra>
// kernel: tpu_custom_call.1
= control target key start
LH: loop header
LB: loop body
LE: loop exit
PB: predicated region body
PF: predicated region fallthrough
CT: control target
= control target key end

     0   :  { %11 = vsyncpa [#allocation6], 0  ;;  %s3586_s0 = inlined_call_operand.hbm [shape: bf16[8,16,32], index: 0, kind: input, shape index: {}]   ;;  %s3587_s1 = inlined_call_operand.hbm [shape: bf16[32,512], index: 1, kind: input, shape index: {}]   ;;  %s3588_s2 = inlined_call_operand.hbm [shape: f32[1,512], index: 2, kind: input, shape index: {}]   ;;  %s3589_s3 = inlined_call_operand.hbm [shape: bf16[128,512], index: 3, kind: input, shape index: {}]   ;;  %s3590_s4 = inlined_call_operand.hbm [shape: bf16[128,128], index: 4, kind: input, shape index: {}]   ;;  %s3591_s5 = inlined_call_operand.vmem [shape: f32[1,128], index: 5, kind: input, shape index: {}]   ;;  %s3592_s6 = inlined_call_operand.hbm [shape: f32[16,128], index: 6, kind: output, shape index: {}]  }
   0x1   :  { %12 = vsyncpa [#allocation9], 0 }
   0x2   :  { %13 = vsyncpa [#allocation12], 0 }
   0x3   :  { %14 = vsyncpa [#allocation7], 0  ;;  %s2754_s21 = smov [#allocation8]  }
   0x4   :  { %s32_s22 = sshll.u32 %s2754_s21, 4  ;;  %s33_s22 = int_to_ptr.vmem [resolvable:$true] %s32_s22 }
   0x5   :  { %s2634_s23 = scalar_lea.vmem %s33_s22, 1024  ;;  %p2639_p1 = scmp.lt.s32.totalorder %s33_s22, %s33_s22 }
   0x6   :  { %p2635_p0 = scmp.ne.s32.totalorder %s33_s22, %s2634_s23  ;;  %p2640_p2 = scmp.lt.s32.totalorder %s2634_s23, %s2634_s23 }
   0x8   :  { %p2641_p3 = por %p2640_p2, %p2639_p1 }
   0xa   :  { %p2642_p4 = pnand %p2641_p3, %p2635_p0 }
   0xc   :  { %2645 = shalt.err (!%p2642_p4)
}
   0xd   :  { %s2755_s24 = smov 256   ;;  %s2756_s25 = smov 16  }
   0xe   :  { %38 = dma.hbm_to_vmem [thread:$0]  %s3587_s1, 1024, %s33_s22, [#allocation9], %s2755_s24, %s2755_s24, %s2756_s25  }
   0xf   :  { %s2757_s28 = smov [#allocation11]   ;;  %s2758_s30 = smov [#allocation5]  }
  0x10   :  { %s54_s29 = sshll.u32 %s2757_s28, 4  ;;  %s20_s7 = sshll.u32 %s2758_s30, 4  ;;  %s55_s29 = int_to_ptr.vmem [resolvable:$true] %s54_s29  ;;  %s21_s7 = int_to_ptr.vmem [resolvable:$true] %s20_s7 }
  0x11   :  { %s2654_s8 = scalar_lea.vmem %s55_s29, 4096  ;;  %p2659_p6 = scmp.lt.s32.totalorder %s55_s29, %s55_s29 }
  0x12   :  { %p2655_p5 = scmp.ne.s32.totalorder %s55_s29, %s2654_s8  ;;  %p2660_p7 = scmp.lt.s32.totalorder %s2654_s8, %s2654_s8 }
  0x14   :  { %p2661_p8 = por %p2660_p7, %p2659_p6 }
  0x16   :  { %p2662_p9 = pnand %p2661_p8, %p2655_p5 }
  0x18   :  { %2665 = shalt.err (!%p2662_p9)
}
  0x19   :  { %60 = dma.hbm_to_vmem [thread:$0]  %s3589_s3, 4096, %s55_s29, [#allocation12], %s2755_s24, %s2755_s24, %s2756_s25  }
  0x1a   :  { %s2674_s11 = scalar_lea.vmem %s21_s7, 1024  ;;  %p2679_p11 = scmp.lt.s32.totalorder %s21_s7, %s21_s7 }
  0x1b   :  { %p2675_p10 = scmp.ne.s32.totalorder %s21_s7, %s2674_s11  ;;  %p2680_p12 = scmp.lt.s32.totalorder %s2674_s11, %s2674_s11 }
  0x1d   :  { %p2681_p13 = por %p2680_p12, %p2679_p11 }
  0x1f   :  { %p2682_p0 = pnand %p2681_p13, %p2675_p10 }
  0x21   :  { %2685 = shalt.err (!%p2682_p0)
}
  0x22   :  { %s2759_s1 = smov 64   ;;  %s2760_s12 = smov 4  }
  0x23   :  { %26 = dma.hbm_to_vmem [thread:$0]  %s3586_s0, 1024, %s21_s7, [#allocation6], %s2759_s1, %s2759_s1, %s2760_s12  }
  0x24   :  { %s2761_s15 = smov [#allocation10]   ;;  %s2762_s17 = smov [#allocation13]  }
  0x25   :  { %s45_s16 = sshll.u32 %s2761_s15, 4  ;;  %s66_s18 = sshll.u32 %s2762_s17, 4  ;;  %s46_s16 = int_to_ptr.vmem [resolvable:$true] %s45_s16  ;;  %s67_s18 = int_to_ptr.vmem [resolvable:$true] %s66_s18 }
  0x26   :  { %s2694_s3 = scalar_lea.vmem %s46_s16, 64  ;;  %p2699_p2 = scmp.lt.s32.totalorder %s46_s16, %s46_s16 }
  0x27   :  { %p2695_p1 = scmp.ne.s32.totalorder %s46_s16, %s2694_s3  ;;  %p2700_p3 = scmp.lt.s32.totalorder %s2694_s3, %s2694_s3 }
  0x29   :  { %p2701_p4 = por %p2700_p3, %p2699_p2 }
  0x2b   :  { %p2702_p5 = pnand %p2701_p4, %p2695_p1 }
  0x2d   :  { %2705 = shalt.err (!%p2702_p5)
}
  0x2e   :  { %48 = dma.hbm_to_vmem [thread:$0]  %s3588_s2, 64, %s46_s16, [#allocation9]  }
  0x2f   :  { %s2714_s21 = scalar_lea.vmem %s67_s18, 1024  ;;  %p2719_p7 = scmp.lt.s32.totalorder %s67_s18, %s67_s18 }
  0x30   :  { %p2715_p6 = scmp.ne.s32.totalorder %s67_s18, %s2714_s21  ;;  %p2720_p8 = scmp.lt.s32.totalorder %s2714_s21, %s2714_s21 }
  0x32   :  { %p2721_p9 = por %p2720_p8, %p2719_p7 }
  0x34   :  { %p2722_p10 = pnand %p2721_p9, %p2715_p6 }
  0x36   :  { %2725 = shalt.err (!%p2722_p10)
}
  0x37   :  { %72 = dma.hbm_to_vmem [thread:$0]  %s3590_s4, 1024, %s67_s18, [#allocation12], %s2759_s1, %s2759_s1, %s2760_s12  }
  0x38   :  { %2746 = dma.done.wait [#allocation6], 1024  }
  0x39   :  { %2747 = vsyncadd [#allocation6], 4294966272 }
  0x3a   :  { %2748 = dma.done.wait [#allocation9], 1088  }
  0x3b   :  { %2749 = vsyncadd [#allocation9], 4294966208 }
  0x3c   :  { %2750 = dma.done.wait [#allocation12], 5120  }
  0x3d   :  { %2751 = vsyncadd [#allocation12], 4294962176  ;;  %v3593_v0 = vmov 0   ;;  %v2262_v1 = vld [vmem:[#allocation8 + $0x24] ss:$16 sps:$4 sm:$0xff]   ;;  %vm225_vm0 = vcmask 261120   ;;  %v125_v50 = vlaneseq }
  0x3e   :  { %282 = vmatprep.mubr.bf16.mxu0 %v3593_v0  ;;  %342 = vmatprep.mubr.bf16.mxu1 %v3593_v0  ;;  %v2264_v2 = vld [vmem:[#allocation8 + $0x20] ss:$16 sps:$4 sm:$0xff]   ;;  %v2265_v3 = vld [vmem:[#allocation8 + $0x4] ss:$16 sps:$4 sm:$0xff]   ;;  %v2272_v6 = vld [vmem:[#allocation8 + $0x2c] ss:$16 sps:$4 sm:$0xff]  }
  0x3f   :  { %262 = vmatprep.subr.bf16.mxu0 %v2262_v1  ;;  %2242 = vmatprep.subr.bf16.mxu1 %v2262_v1  ;;  %v2267_v4 = vld [vmem:[#allocation8] ss:$16 sps:$4 sm:$0xff]   ;;  %v2270_v8 = vld [vmem:[#allocation8 + $0x28] ss:$16 sps:$4 sm:$0xff]   ;;  %v2277_v9 = vld [vmem:[#allocation8 + $0xc] ss:$16 sps:$4 sm:$0xff]  }
  0x40   :  { %263 = vmatpush1.bf16.msra.mxu0 %v2264_v2  ;;  %2244 = vmatpush1.bf16.msra.mxu1 %v2264_v2  ;;  %v2268_v5 = vld [vmem:[#allocation5] sm:$0xff]   ;;  %v2822_v7 = vld [vmem:[#allocation5 + $0x30] sm:$0xff]   ;;  %v2827_v10 = vld [vmem:[#allocation11 + $0xe4] ss:$16 sps:$4 sm:$0xff]   ;;  %v2764_v49 = vmov 0.0|0.0   ;;  %v126_v51 = vshrl.u32 %v125_v50, 7 }
  0x41   :  { %264 = vmatprep.subr.bf16.mxu0 %v2265_v3  ;;  %2243 = vmatprep.subr.bf16.mxu1 %v2265_v3  ;;  %v2829_v11 = vld [vmem:[#allocation11 + $0xe0] ss:$16 sps:$4 sm:$0xff]   ;;  %v2275_v12 = vld [vmem:[#allocation8 + $0x8] ss:$16 sps:$4 sm:$0xff]   ;;  %v2833_v14 = vld [vmem:[#allocation11 + $0xec] ss:$16 sps:$4 sm:$0xff]  }
  0x42   :  { %v2273_v13 = vld [vmem:[#allocation5 + $0x8] sm:$0xff]   ;;  %v2838_v16 = vld [vmem:[#allocation5 + $0x38] sm:$0xff]   ;;  %v2843_v17 = vld [vmem:[#allocation11 + $0xc0] ss:$16 sps:$4 sm:$0xff]   ;;  %v127_v52 = vsub.s32 0, %v126_v51  ;;  %v131_v54 = vsub.s32 1, %v126_v51 }
  0x43   :  { %v2836_v15 = vld [vmem:[#allocation11 + $0xc4] ss:$16 sps:$4 sm:$0xff]   ;;  %v2853_v19 = vld [vmem:[#allocation11 + $0xa0] ss:$16 sps:$4 sm:$0xff]   ;;  %v2858_v22 = vld [vmem:[#allocation11 + $0xe8] ss:$16 sps:$4 sm:$0xff]  }
  0x44   :  { %265 = vmatpush1.bf16.msra.mxu0 %v2267_v4  ;;  %2245 = vmatpush1.bf16.msra.mxu1 %v2267_v4  ;;  %v2845_v18 = vld [vmem:[#allocation11 + $0xa4] ss:$16 sps:$4 sm:$0xff]   ;;  %v2281_v21 = vld [vmem:[#allocation5 + $0x10] sm:$0xff]   ;;  %v2872_v26 = vld [vmem:[#allocation11 + $0xc8] ss:$16 sps:$4 sm:$0xff]   ;;  %vm2766_vm1 = vmmov 0  }
  0x45   :  { %375 = vmatprep.subr.bf16.mxu1 %v2272_v6  ;;  %745 = vmatprep.subr.bf16.mxu0 %v2827_v10  ;;  %v2856_v20 = vld [vmem:[#allocation11 + $0x84] ss:$16 sps:$4 sm:$0xff]   ;;  %v2860_v23 = vld [vmem:[#allocation11 + $0xcc] ss:$16 sps:$4 sm:$0xff]   ;;  %v2864_v24 = vld [vmem:[#allocation11 + $0x80] ss:$16 sps:$4 sm:$0xff]  }
  0x46   :  { %v2868_v25 = vld [vmem:[#allocation11 + $0x64] ss:$16 sps:$4 sm:$0xff]   ;;  %v2876_v27 = vld [vmem:[#allocation11 + $0xac] ss:$16 sps:$4 sm:$0xff]   ;;  %v2879_v28 = vld [vmem:[#allocation11 + $0x60] ss:$16 sps:$4 sm:$0xff]  }
  0x47   :  { %2108 = vmatmul.mubr.msk.bf16.vlgmr.msra.gmra.mxu0 %vm225_vm0, %v2268_v5  ;;  %2114 = vmatmul.mubr.msk.bf16.vlgmr.msra.gmra.mxu1 %vm225_vm0, %v2822_v7  ;;  %v2288_v29 = vld [vmem:[#allocation5 + $0x18] sm:$0xff]   ;;  %v2888_v32 = vld [vmem:[#allocation11 + $0x40] ss:$16 sps:$4 sm:$0xff]   ;;  %v2891_v33 = vld [vmem:[#allocation11 + $0x8c] ss:$16 sps:$4 sm:$0xff]   ;;  %s2767_s23 = smov [#allocation14]  }
  0x48   :  { %376 = vmatpush1.bf16.msra.mxu1 %v2270_v8  ;;  %292 = vmatprep.mubr.bf16.mxu0 %v3593_v0  ;;  %v2883_v30 = vld [vmem:[#allocation11 + $0xa8] ss:$16 sps:$4 sm:$0xff]   ;;  %v2885_v31 = vld [vmem:[#allocation11 + $0x44] ss:$16 sps:$4 sm:$0xff]   ;;  %v2901_v36 = vld [vmem:[#allocation11 + $0x20] ss:$16 sps:$4 sm:$0xff]  }
  0x49   :  { %352 = vmatprep.mubr.bf16.mxu1 %v3593_v0  ;;  %377 = vmatprep.subr.bf16.mxu1 %v2277_v9  ;;  %v2895_v34 = vld [vmem:[#allocation11 + $0x24] ss:$16 sps:$4 sm:$0xff]   ;;  %v2897_v35 = vld [vmem:[#allocation11 + $0x88] ss:$16 sps:$4 sm:$0xff]   ;;  %v2903_v37 = vld [vmem:[#allocation11 + $0x6c] ss:$16 sps:$4 sm:$0xff]  }
  0x4a   :  { %746 = vmatpush1.bf16.msra.mxu0 %v2829_v11  ;;  %v2298_v38 = vld [vmem:[#allocation5 + $0x20] sm:$0xff]   ;;  %v2911_v39 = vld [vmem:[#allocation11 + $0x4] ss:$16 sps:$4 sm:$0xff]   ;;  %v2913_v40 = vld [vmem:[#allocation11 + $0x68] ss:$16 sps:$4 sm:$0xff]   ;;  %s2078_s24 = sshll.u32 %s2767_s23, 4  ;;  %s2079_s24 = int_to_ptr.vmem [resolvable:$true] %s2078_s24 }
  0x4b   :  { %747 = vmatprep.subr.bf16.mxu0 %v2836_v15  ;;  %v2916_v41 = vld [vmem:[#allocation11] ss:$16 sps:$4 sm:$0xff]   ;;  %v2919_v42 = vld [vmem:[#allocation11 + $0x4c] ss:$16 sps:$4 sm:$0xff]   ;;  %v2927_v43 = vld [vmem:[#allocation11 + $0x48] ss:$16 sps:$4 sm:$0xff]   ;;  %p2731_p12 = scmp.lt.s32.totalorder %s2079_s24, %s2079_s24 }
  0x4c   :  { %378 = vmatpush1.bf16.msra.mxu1 %v2275_v12  ;;  %v2931_v44 = vld [vmem:[#allocation11 + $0x2c] ss:$16 sps:$4 sm:$0xff]   ;;  %v2308_v45 = vld [vmem:[#allocation5 + $0x28] sm:$0xff]   ;;  %s2726_s25 = scalar_lea.vmem %s2079_s24, 256 }
  0x4d   :  { %788 = vmatprep.subr.bf16.mxu1 %v2833_v14  ;;  %v2935_v46 = vld [vmem:[#allocation11 + $0x28] ss:$16 sps:$4 sm:$0xff]   ;;  %v2938_v47 = vld [vmem:[#allocation11 + $0xc] ss:$16 sps:$4 sm:$0xff]   ;;  %p2727_p11 = scmp.ne.s32.totalorder %s2079_s24, %s2726_s25  ;;  %p2732_p13 = scmp.lt.s32.totalorder %s2726_s25, %s2726_s25 }
  0x4e   :  { %748 = vmatpush1.bf16.msra.mxu0 %v2843_v17  ;;  %v2945_v48 = vld [vmem:[#allocation11 + $0x8] ss:$16 sps:$4 sm:$0xff]   ;;  %v123_v53 = vld [vmem:[#allocation10] sm:$0xf] }
  0x4f   :  { %2109 = vmatmul.mubr.msk.bf16.gmra.mxu0 %vm225_vm0, %v2273_v13  ;;  %2115 = vmatmul.mubr.msk.bf16.gmra.mxu1 %vm225_vm0, %v2838_v16  ;;  %v2994_v55 = vrot.slane %v123_v53, %v127_v52  ;;  %v2996_v56 = vrot.slane %v123_v53, %v131_v54  ;;  %p2733_p0 = por %p2732_p13, %p2731_p12 }
  0x50   :  { %302 = vmatprep.mubr.bf16.mxu0 %v3593_v0  ;;  %395 = vmatprep.mubr.bf16.mxu1 %v3593_v0 }
  0x51   :  { %749 = vmatprep.subr.bf16.mxu0 %v2845_v18  ;;  %p2734_p1 = pnand %p2733_p0, %p2727_p11 }
  0x52   :  { %750 = vmatpush1.bf16.msra.mxu0 %v2853_v19 }
  0x53   :  { %751 = vmatprep.subr.bf16.mxu0 %v2856_v20 }
  0x56   :  { %752 = vmatpush1.bf16.msra.mxu0 %v2864_v24 }
  0x57   :  { %2110 = vmatmul.mubr.msk.bf16.gmra.mxu0 %vm225_vm0, %v2281_v21  ;;  %2116 = vmatmul.mubr.msk.bf16.vlgmr.msra.gmra.mxu1 %vm225_vm0, %v2268_v5 }
  0x58   :  { %789 = vmatpush1.bf16.msra.mxu1 %v2858_v22  ;;  %312 = vmatprep.mubr.bf16.mxu0 %v3593_v0 }
  0x59   :  { %405 = vmatprep.mubr.bf16.mxu1 %v3593_v0  ;;  %790 = vmatprep.subr.bf16.mxu1 %v2860_v23 }
  0x5a   :  { %753 = vmatprep.subr.bf16.mxu0 %v2868_v25 }
  0x5b   :  { %754 = vmatpush1.bf16.msra.mxu0 %v2879_v28 }
  0x5c   :  { %791 = vmatpush1.bf16.msra.mxu1 %v2872_v26  ;;  %755 = vmatprep.subr.bf16.mxu0 %v2885_v31 }
  0x5d   :  { %792 = vmatprep.subr.bf16.mxu1 %v2876_v27 }
  0x5f   :  { %2111 = vmatmul.mubr.msk.bf16.gmra.mxu0 %vm225_vm0, %v2288_v29  ;;  %2117 = vmatmul.mubr.msk.bf16.gmra.mxu1 %vm225_vm0, %v2273_v13 }
  0x60   :  { %322 = vmatprep.mubr.bf16.mxu0 %v3593_v0  ;;  %415 = vmatprep.mubr.bf16.mxu1 %v3593_v0 }
  0x61   :  { %793 = vmatpush1.bf16.msra.mxu1 %v2883_v30  ;;  %756 = vmatpush1.bf16.msra.mxu0 %v2888_v32 }
  0x62   :  { %794 = vmatprep.subr.bf16.mxu1 %v2891_v33  ;;  %757 = vmatprep.subr.bf16.mxu0 %v2895_v34 }
  0x65   :  { %795 = vmatpush1.bf16.msra.mxu1 %v2897_v35  ;;  %758 = vmatpush1.bf16.msra.mxu0 %v2901_v36 }
  0x66   :  { %796 = vmatprep.subr.bf16.mxu1 %v2903_v37  ;;  %759 = vmatprep.subr.bf16.mxu0 %v2911_v39 }
  0x67   :  { %2112 = vmatmul.mubr.msk.bf16.gmra.mxu0 %vm225_vm0, %v2298_v38  ;;  %2118 = vmatmul.mubr.msk.bf16.gmra.mxu1 %vm225_vm0, %v2281_v21 }
  0x68   :  { %332 = vmatprep.mubr.bf16.mxu0 %v3593_v0  ;;  %425 = vmatprep.mubr.bf16.mxu1 %v3593_v0 }
  0x69   :  { %797 = vmatpush1.bf16.msra.mxu1 %v2913_v40  ;;  %760 = vmatpush1.bf16.msra.mxu0 %v2916_v41 }
  0x6a   :  { %798 = vmatprep.subr.bf16.mxu1 %v2919_v42  ;;  %897 = vmatprep.subr.bf16.mxu0 %v2827_v10 }
  0x6d   :  { %799 = vmatpush1.bf16.msra.mxu1 %v2927_v43 }
  0x6e   :  { %800 = vmatprep.subr.bf16.mxu1 %v2931_v44 }
  0x6f   :  { %2113 = vmatmul.mubr.msk.bf16.gmra.mxu0 %vm225_vm0, %v2308_v45  ;;  %2119 = vmatmul.mubr.msk.bf16.gmra.mxu1 %vm225_vm0, %v2288_v29 }
  0x70   :  { %435 = vmatprep.mubr.bf16.mxu1 %v3593_v0  ;;  %777 = vmatprep.mubr.bf16.mxu0 %v3593_v0 }
  0x71   :  { %801 = vmatpush1.bf16.msra.mxu1 %v2935_v46 }
  0x72   :  { %802 = vmatprep.subr.bf16.mxu1 %v2938_v47 }
  0x75   :  { %803 = vmatpush1.bf16.msra.mxu1 %v2945_v48 }
  0x76   :  { %940 = vmatprep.subr.bf16.mxu1 %v2833_v14 }
  0x77   :  { %2120 = vmatmul.mubr.msk.bf16.gmra.mxu1 %vm225_vm0, %v2298_v38  ;;  %778 = vmatmul.mubr.bf16.vlgmr.msra.gmra.mxu0 %v2764_v49 }
  0x78   :  { %445 = vmatprep.mubr.bf16.mxu1 %v3593_v0  ;;  %898 = vmatpush1.bf16.msra.mxu0 %v2829_v11 }
  0x79   :  { %899 = vmatprep.subr.bf16.mxu0 %v2836_v15  ;;  %929 = vmatprep.mubr.bf16.mxu0 %v3593_v0 }
  0x7c   :  { %900 = vmatpush1.bf16.msra.mxu0 %v2843_v17 }
  0x7d   :  { %901 = vmatprep.subr.bf16.mxu0 %v2845_v18 }
  0x7f   :  { %2121 = vmatmul.mubr.msk.bf16.gmra.mxu1 %vm225_vm0, %v2308_v45 }
  0x80   :  { %455 = vmatprep.mubr.bf16.mxu1 %v3593_v0  ;;  %902 = vmatpush1.bf16.msra.mxu0 %v2853_v19 }
  0x81   :  { %903 = vmatprep.subr.bf16.mxu0 %v2856_v20 }
  0x84   :  { %904 = vmatpush1.bf16.msra.mxu0 %v2864_v24 }
  0x85   :  { %905 = vmatprep.subr.bf16.mxu0 %v2868_v25 }
  0x87   :  { %2122 = vmatmul.mubr.msk.bf16.gmra.mxu1 %vm225_vm0, %v2822_v7 }
  0x88   :  { %465 = vmatprep.mubr.bf16.mxu1 %v3593_v0  ;;  %906 = vmatpush1.bf16.msra.mxu0 %v2879_v28 }
  0x89   :  { %907 = vmatprep.subr.bf16.mxu0 %v2885_v31 }
  0x8c   :  { %908 = vmatpush1.bf16.msra.mxu0 %v2888_v32 }
  0x8d   :  { %909 = vmatprep.subr.bf16.mxu0 %v2895_v34 }
  0x8f   :  { %2123 = vmatmul.mubr.msk.bf16.gmra.mxu1 %vm225_vm0, %v2838_v16 }
  0x90   :  { %820 = vmatprep.mubr.bf16.mxu1 %v3593_v0  ;;  %910 = vmatpush1.bf16.msra.mxu0 %v2901_v36 }
  0x91   :  { %911 = vmatprep.subr.bf16.mxu0 %v2911_v39 }
  0x94   :  { %912 = vmatpush1.bf16.msra.mxu0 %v2916_v41 }
  0x95   :  { %1049 = vmatprep.subr.bf16.mxu0 %v2827_v10 }
  0x97   :  { %821 = vmatmul.mubr.bf16.vlgmr.msra.gmra.mxu1 %v2764_v49 }
  0x98   :  { %941 = vmatpush1.bf16.msra.mxu1 %v2858_v22  ;;  %972 = vmatprep.mubr.bf16.mxu1 %v3593_v0 }
  0x99   :  { %942 = vmatprep.subr.bf16.mxu1 %v2860_v23 }
  0x9c   :  { %943 = vmatpush1.bf16.msra.mxu1 %v2872_v26 }
  0x9d   :  { %944 = vmatprep.subr.bf16.mxu1 %v2876_v27 }
  0xa0   :  { %945 = vmatpush1.bf16.msra.mxu1 %v2883_v30 }
  0xa1   :  { %946 = vmatprep.subr.bf16.mxu1 %v2891_v33 }
  0xa4   :  { %947 = vmatpush1.bf16.msra.mxu1 %v2897_v35 }
  0xa5   :  { %948 = vmatprep.subr.bf16.mxu1 %v2903_v37 }
  0xa8   :  { %949 = vmatpush1.bf16.msra.mxu1 %v2913_v40 }
  0xa9   :  { %950 = vmatprep.subr.bf16.mxu1 %v2919_v42 }
  0xac   :  { %951 = vmatpush1.bf16.msra.mxu1 %v2927_v43 }
  0xad   :  { %952 = vmatprep.subr.bf16.mxu1 %v2931_v44 }
  0xb0   :  { %953 = vmatpush1.bf16.msra.mxu1 %v2935_v46 }
  0xb1   :  { %954 = vmatprep.subr.bf16.mxu1 %v2938_v47 }
  0xb4   :  { %955 = vmatpush1.bf16.msra.mxu1 %v2945_v48 }
  0xb5   :  { %1092 = vmatprep.subr.bf16.mxu1 %v2833_v14 }
 0x107   :  { %v2998_v57 = vpop.f32.mrf.mxu0  ;;  %v344_v58 = vpop.f32.mrf.mxu1 }
 0x108   :  { %v3001_v59 = vadd.f32 %v344_v58, %v2994_v55 }
 0x109   :  { %v3003_v60 = vpop.f32.mrf.mxu0  ;;  %v346_v61 = vpop.f32.mrf.mxu1 }
 0x10a   :  { %3595 = vst [vmem:[#allocation19_spill] sm:$0xff] %v3001_v59  ;;  %v3006_v62 = vadd.f32 %v346_v61, %v2996_v56 }
 0x10b   :  { %v3008_v63 = vpop.f32.mrf.mxu0  ;;  %v348_v1 = vpop.f32.mrf.mxu1 }
 0x10c   :  { %3596 = vst [vmem:[#allocation20_spill] sm:$0xff] %v3006_v62  ;;  %v3011_v2 = vadd.f32 %v348_v1, %v2994_v55 }
 0x10d   :  { %v3013_v3 = vpop.f32.mrf.mxu0  ;;  %v350_v4 = vpop.f32.mrf.mxu1 }
 0x10e   :  { %3597 = vst [vmem:[#allocation21_spill] sm:$0xff] %v3011_v2  ;;  %v3016_v5 = vadd.f32 %v350_v4, %v2996_v56 }
 0x10f   :  { %v294_v6 = vpop.f32.mrf.mxu0  ;;  %v354_v7 = vpop.f32.mrf.mxu1 }
 0x110   :  { %3598 = vst [vmem:[#allocation22_spill] sm:$0xff] %v3016_v5  ;;  %v3019_v8 = vadd.f32 %v294_v6, %v2994_v55  ;;  %v3022_v9 = vadd.f32 %v354_v7, %v2994_v55 }
 0x111   :  { %v296_v12 = vpop.f32.mrf.mxu0  ;;  %v356_v13 = vpop.f32.mrf.mxu1 }
 0x112   :  { %3599 = vst [vmem:[#allocation23_spill] sm:$0xff] %v3022_v9  ;;  %v3025_v16 = vadd.f32 %v296_v12, %v2996_v56  ;;  %v3028_v21 = vadd.f32 %v356_v13, %v2996_v56  ;;  %v135_v12 = vsub.s32 2, %v126_v51 }
 0x113   :  { %v298_v29 = vpop.f32.mrf.mxu0  ;;  %v358_v38 = vpop.f32.mrf.mxu1 }
 0x114   :  { %3600 = vst [vmem:[#allocation24_spill] sm:$0xff] %v3028_v21  ;;  %v3031_v45 = vadd.f32 %v298_v29, %v2994_v55  ;;  %v3034_v49 = vadd.f32 %v358_v38, %v2994_v55 }
 0x115   :  { %v300_v50 = vpop.f32.mrf.mxu0  ;;  %v360_v52 = vpop.f32.mrf.mxu1 }
 0x116   :  { %3601 = vst [vmem:[#allocation25_spill] sm:$0xff] %v3034_v49  ;;  %v3037_v54 = vadd.f32 %v300_v50, %v2996_v56  ;;  %v3040_v58 = vadd.f32 %v360_v52, %v2996_v56  ;;  %v139_v50 = vsub.s32 3, %v126_v51  ;;  %v3059_v49 = vrot.slane %v123_v53, %v135_v12 }
 0x117   :  { %v304_v61 = vpop.f32.mrf.mxu0  ;;  %v3042_v1 = vpop.f32.mrf.mxu1 }
 0x118   :  { %3602 = vst [vmem:[#allocation26_spill] sm:$0xff] %v3040_v58  ;;  %v3045_v4 = vadd.f32 %v304_v61, %v2994_v55  ;;  %v3064_v5 = vrot.slane %v123_v53, %v139_v50 }
 0x119   :  { %v306_v6 = vpop.f32.mrf.mxu0  ;;  %v3047_v7 = vpop.f32.mrf.mxu1 }
 0x11a   :  { %3603 = vst [vmem:[#allocation27_spill] sm:$0xff] %v3045_v4  ;;  %v3050_v13 = vadd.f32 %v306_v6, %v2996_v56 }
 0x11b   :  { %v308_v29 = vpop.f32.mrf.mxu0  ;;  %v3052_v38 = vpop.f32.mrf.mxu1 }
 0x11c   :  { %3604 = vst [vmem:[#allocation28_spill] sm:$0xff] %v3050_v13  ;;  %v3055_v52 = vadd.f32 %v308_v29, %v2994_v55 }
 0x11d   :  { %v310_v0 = vpop.f32.mrf.mxu0  ;;  %v3057_v58 = vpop.f32.mrf.mxu1 }
 0x11e   :  { %3605 = vst [vmem:[#allocation29_spill] sm:$0xff] %v3055_v52  ;;  %v3062_v61 = vadd.f32 %v310_v0, %v2996_v56 }
 0x11f   :  { %v314_v21 = vpop.f32.mrf.mxu0  ;;  %v407_v9 = vpop.f32.mrf.mxu1 }
 0x120   :  { %3606 = vst [vmem:[#allocation30_spill] sm:$0xff] %v3062_v61  ;;  %v3067_v6 = vadd.f32 %v314_v21, %v2994_v55  ;;  %v3070_v51 = vadd.f32 %v407_v9, %v3059_v49 }
 0x121   :  { %v316_v29 = vpop.f32.mrf.mxu0  ;;  %v409_v2 = vpop.f32.mrf.mxu1 }
 0x122   :  { %3607 = vst [vmem:[#allocation31_spill] sm:$0xff] %v3067_v6  ;;  %3608 = vst [vmem:[#allocation32_spill] sm:$0xff] %v3070_v51  ;;  %v3073_v62 = vadd.f32 %v316_v29, %v2996_v56  ;;  %v3076_v12 = vadd.f32 %v409_v2, %v3064_v5 }
 0x123   :  { %v318_v0 = vpop.f32.mrf.mxu0  ;;  %v411_v59 = vpop.f32.mrf.mxu1 }
 0x124   :  { %3609 = vst [vmem:[#allocation33_spill] sm:$0xff] %v3073_v62  ;;  %v3079_v61 = vadd.f32 %v318_v0, %v2994_v55  ;;  %v3082_v53 = vadd.f32 %v411_v59, %v3059_v49 }
 0x125   :  { %v320_v21 = vpop.f32.mrf.mxu0  ;;  %v413_v50 = vpop.f32.mrf.mxu1 }
 0x126   :  { %3610 = vst [vmem:[#allocation34_spill] sm:$0xff] %v3079_v61  ;;  %3611 = vst [vmem:[#allocation35_spill] sm:$0xff] %v3082_v53  ;;  %v3085_v9 = vadd.f32 %v320_v21, %v2996_v56  ;;  %v3088_v6 = vadd.f32 %v413_v50, %v3064_v5 }
 0x127   :  { %v324_v29 = vpop.f32.mrf.mxu0  ;;  %v417_v62 = vpop.f32.mrf.mxu1 }
 0x128   :  { %3612 = vst [vmem:[#allocation36_spill] sm:$0xff] %v3085_v9  ;;  %3613 = vst [vmem:[#allocation37_spill] sm:$0xff] %v3088_v6  ;;  %v3091_v2 = vadd.f32 %v324_v29, %v2994_v55  ;;  %v3094_v52 = vadd.f32 %v417_v62, %v3059_v49 }
 0x129   :  { %v326_v0 = vpop.f32.mrf.mxu0  ;;  %v419_v61 = vpop.f32.mrf.mxu1 }
 0x12a   :  { %3614 = vst [vmem:[#allocation38_spill] sm:$0xff] %v3091_v2  ;;  %3615 = vst [vmem:[#allocation39_spill] sm:$0xff] %v3094_v52  ;;  %v3097_v59 = vadd.f32 %v326_v0, %v2996_v56  ;;  %v3100_v13 = vadd.f32 %v419_v61, %v3064_v5 }
 0x12b   :  { %v328_v21 = vpop.f32.mrf.mxu0  ;;  %v421_v9 = vpop.f32.mrf.mxu1 }
 0x12c   :  { %3616 = vst [vmem:[#allocation40_spill] sm:$0xff] %v3097_v59  ;;  %3617 = vst [vmem:[#allocation41_spill] sm:$0xff] %v3100_v13  ;;  %v3103_v50 = vadd.f32 %v328_v21, %v2994_v55  ;;  %v3106_v4 = vadd.f32 %v421_v9, %v3059_v49 }
 0x12d   :  { %v330_v29 = vpop.f32.mrf.mxu0  ;;  %v423_v2 = vpop.f32.mrf.mxu1 }
 0x12e   :  { %3618 = vst [vmem:[#allocation42_spill] sm:$0xff] %v3103_v50  ;;  %3619 = vst [vmem:[#allocation43_spill] sm:$0xff] %v3106_v4  ;;  %v3109_v62 = vadd.f32 %v330_v29, %v2996_v56  ;;  %v3112_v52 = vadd.f32 %v423_v2, %v3064_v5 }
 0x12f   :  { %v334_v0 = vpop.f32.mrf.mxu0  ;;  %v427_v59 = vpop.f32.mrf.mxu1 }
 0x130   :  { %3620 = vst [vmem:[#allocation44_spill] sm:$0xff] %v3109_v62  ;;  %3621 = vst [vmem:[#allocation45_spill] sm:$0xff] %v3112_v52  ;;  %v3115_v61 = vadd.f32 %v334_v0, %v2994_v55  ;;  %v3118_v13 = vadd.f32 %v427_v59, %v3059_v49 }
 0x131   :  { %v336_v21 = vpop.f32.mrf.mxu0  ;;  %v429_v50 = vpop.f32.mrf.mxu1 }
 0x132   :  { %3622 = vst [vmem:[#allocation46_spill] sm:$0xff] %v3115_v61  ;;  %3623 = vst [vmem:[#allocation47_spill] sm:$0xff] %v3118_v13  ;;  %v3121_v9 = vadd.f32 %v336_v21, %v2996_v56  ;;  %v3124_v4 = vadd.f32 %v429_v50, %v3064_v5 }
 0x133   :  { %v338_v29 = vpop.f32.mrf.mxu0  ;;  %v431_v62 = vpop.f32.mrf.mxu1 }
 0x134   :  { %3624 = vst [vmem:[#allocation48_spill] sm:$0xff] %v3121_v9  ;;  %3625 = vst [vmem:[#allocation49_spill] sm:$0xff] %v3124_v4  ;;  %v3127_v2 = vadd.f32 %v338_v29, %v2994_v55  ;;  %v3130_v52 = vadd.f32 %v431_v62, %v3059_v49  ;;  %v285_v29 = vadd.f32 %v2998_v57, %v2994_v55 }
 0x135   :  { %v340_v0 = vpop.f32.mrf.mxu0  ;;  %v433_v61 = vpop.f32.mrf.mxu1 }
 0x136   :  { %3626 = vst [vmem:[#allocation50_spill] sm:$0xff] %v3127_v2  ;;  %3627 = vst [vmem:[#allocation51_spill] sm:$0xff] %v3130_v52  ;;  %v3133_v59 = vadd.f32 %v340_v0, %v2996_v56  ;;  %v3136_v13 = vadd.f32 %v433_v61, %v3064_v5  ;;  %v287_v0 = vadd.f32 %v3003_v60, %v2996_v56 }
 0x137   :  { %v437_v21 = vpop.f32.mrf.mxu1  ;;  %v779_v9 = vpop.f32.mrf.mxu0 }
 0x138   :  { %3628 = vst [vmem:[#allocation52_spill] sm:$0xff] %v3133_v59  ;;  %3629 = vst [vmem:[#allocation53_spill] sm:$0xff] %v3136_v13  ;;  %v3139_v50 = vadd.f32 %v437_v21, %v3059_v49  ;;  %v831_v61 = vadd.f32 %v779_v9, %v285_v29 }
 0x139   :  { %v439_v4 = vpop.f32.mrf.mxu1  ;;  %v781_v53 = vpop.f32.mrf.mxu0 }
 0x13a   :  { %3630 = vst [vmem:[#allocation54_spill] sm:$0xff] %v3139_v50  ;;  %v3144_v62 = vadd.f32 %v439_v4, %v3064_v5  ;;  %v832_v13 = vadd.f32 %v781_v53, %v287_v0  ;;  %v289_v50 = vadd.f32 %v3008_v63, %v2994_v55  ;;  %v291_v4 = vadd.f32 %v3013_v3, %v2996_v56 }
 0x13b   :  { %v441_v59 = vpop.f32.mrf.mxu1  ;;  %v783_v2 = vpop.f32.mrf.mxu0  ;;  %v2156_v60 = vmul.f32 -1.442695, %v831_v61 }
 0x13c   :  { %3631 = vst [vmem:[#allocation55_spill] sm:$0xff] %v3144_v62  ;;  %v3149_v52 = vadd.f32 %v441_v59, %v3059_v49  ;;  %v835_v51 = vadd.f32 %v783_v2, %v289_v50  ;;  %v2158_v59 = vmul.f32 -1.442695, %v832_v13 }
 0x13d   :  { %v443_v21 = vpop.f32.mrf.mxu1  ;;  %v785_v57 = vpop.f32.mrf.mxu0  ;;  %2338 = vpow2.f32 %v2156_v60 }
 0x13e   :  { %v3154_v6 = vadd.f32 %v443_v21, %v3064_v5  ;;  %v836_v29 = vadd.f32 %v785_v57, %v291_v4  ;;  %v2157_v63 = vmul.f32 -1.442695, %v835_v51  ;;  %2340 = vpow2.f32 %v2158_v59 }
 0x13f   :  { %v447_v62 = vpop.f32.mrf.mxu1 }
 0x140   :  { %v3159_v9 = vadd.f32 %v447_v62, %v3059_v49  ;;  %v2159_v56 = vmul.f32 -1.442695, %v836_v29  ;;  %2342 = vpow2.f32 %v2157_v63 }
 0x141   :  { %v449_v53 = vpop.f32.mrf.mxu1 }
 0x142   :  { %v3162_v0 = vadd.f32 %v449_v53, %v3064_v5  ;;  %2344 = vpow2.f32 %v2159_v56 }
 0x143   :  { %v451_v55 = vpop.f32.mrf.mxu1 }
 0x144   :  { %v3165_v21 = vadd.f32 %v451_v55, %v3059_v49 }
 0x145   :  { %v453_v3 = vpop.f32.mrf.mxu1 }
 0x146   :  { %3632 = vst [vmem:[#allocation56_spill] sm:$0xff] %v3165_v21  ;;  %v3168_v2 = vadd.f32 %v453_v3, %v3064_v5 }
 0x147   :  { %v457_v50 = vpop.f32.mrf.mxu1 }
 0x148   :  { %v3171_v13 = vadd.f32 %v457_v50, %v3059_v49 }
 0x149   :  { %v459_v62 = vpop.f32.mrf.mxu1 }
 0x14a   :  { %3633 = vst [vmem:[#allocation57_spill] sm:$0xff] %v3171_v13  ;;  %v3174_v61 = vadd.f32 %v459_v62, %v3064_v5  ;;  %v2339_v53 = vpop.eup %2338 }
 0x14b   :  { %v461_v51 = vpop.f32.mrf.mxu1  ;;  %v2341_v63 = vpop.eup %2340  ;;  %v845_v50 = vadd.f32 1.0, %v2339_v53 }
 0x14c   :  { %3634 = vst [vmem:[#allocation58_spill] sm:$0xff] %v3174_v61  ;;  %v3177_v57 = vadd.f32 %v461_v51, %v3059_v49 }
 0x14d   :  { %v463_v4 = vpop.f32.mrf.mxu1  ;;  %v2343_v51 = vpop.eup %2342  ;;  %2346 = vrcp.f32 %v845_v50 }
 0x14e   :  { %3635 = vst [vmem:[#allocation59_spill] sm:$0xff] %v3177_v57  ;;  %v3180_v60 = vadd.f32 %v463_v4, %v3064_v5  ;;  %v857_v57 = vadd.f32 1.0, %v2341_v63  ;;  %v402_v63 = vadd.f32 %v3052_v38, %v3059_v49 }
 0x14f   :  { %v467_v59 = vpop.f32.mrf.mxu1  ;;  %v2345_v4 = vpop.eup %2344 }
 0x150   :  { %3636 = vst [vmem:[#allocation60_spill] sm:$0xff] %v3180_v60  ;;  %v3183_v29 = vadd.f32 %v467_v59, %v3059_v49  ;;  %v398_v60 = vadd.f32 %v3042_v1, %v3059_v49  ;;  %2348 = vrcp.f32 %v857_v57  ;;  %v404_v1 = vadd.f32 %v3057_v58, %v3064_v5 }
 0x151   :  { %v469_v55 = vpop.f32.mrf.mxu1 }
 0x152   :  { %3637 = vst [vmem:[#allocation61_spill] sm:$0xff] %v3183_v29  ;;  %v3186_v56 = vadd.f32 %v469_v55, %v3064_v5  ;;  %v400_v55 = vadd.f32 %v3047_v7, %v3064_v5 }
 0x153   :  { %v471_v3 = vpop.f32.mrf.mxu1 }
 0x154   :  { %3638 = vst [vmem:[#allocation62_spill] sm:$0xff] %v3186_v56  ;;  %v3189_v62 = vadd.f32 %v471_v3, %v3059_v49  ;;  %v846_v56 = vadd.f32 1.0, %v2343_v51  ;;  %v858_v3 = vadd.f32 1.0, %v2345_v4 }
 0x155   :  { %v473_v13 = vpop.f32.mrf.mxu1 }
 0x156   :  { %3639 = vst [vmem:[#allocation63_spill] sm:$0xff] %v3189_v62  ;;  %v3194_v59 = vadd.f32 %v473_v13, %v3064_v5 }
 0x157   :  { %v822_v29 = vpop.f32.mrf.mxu1 }
 0x158   :  { %3640 = vst [vmem:[#allocation64_spill] sm:$0xff] %v3194_v59  ;;  %v833_v53 = vadd.f32 %v822_v29, %v398_v60 }
 0x159   :  { %v824_v62 = vpop.f32.mrf.mxu1 }
 0x15a   :  { %2350 = vtanh.f32 %v833_v53  ;;  %v834_v61 = vadd.f32 %v824_v62, %v400_v55  ;;  %v2347_v60 = vpop.eup %2346 }
 0x15b   :  { %v826_v21 = vpop.f32.mrf.mxu1  ;;  %2352 = vrcp.f32 %v846_v56 }
 0x15c   :  { %v2160_v13 = vmul.f32 -1.442695, %v834_v61  ;;  %v837_v59 = vadd.f32 %v826_v21, %v402_v63  ;;  %2354 = vrcp.f32 %v858_v3 }
 0x15d   :  { %v828_v7 = vpop.f32.mrf.mxu1  ;;  %v2349_v29 = vpop.eup %2348 }
 0x15e   :  { %2356 = vpow2.f32 %v2160_v13  ;;  %v838_v50 = vadd.f32 %v828_v7, %v404_v1  ;;  %v877_v62 = vmul.f32 0.0, %v2349_v29  ;;  %v3641_v29 = vmov 0  }
 0x15f   :  { %2358 = vtanh.f32 %v837_v59 }
 0x160   :  { %v2161_v57 = vmul.f32 -1.442695, %v838_v50 }
 0x162   :  { %2360 = vpow2.f32 %v2161_v57 }
 0x167   :  { %v2351_v51 = vpop.eup %2350 }
 0x168   :  { %v879_v49 = vmul.f32 %v2351_v51, %v2347_v60  ;;  %v2353_v38 = vpop.eup %2352 }
 0x169   :  { %v2355_v4 = vpop.eup %2354 }
 0x16a   :  { %v3202_v53 = vadd.f32 %v879_v49, %v877_v62  ;;  %v878_v21 = vmul.f32 0.0, %v2355_v4 }
 0x16b   :  { %v2357_v55 = vpop.eup %2356 }
 0x16c   :  { %v2359_v5 = vpop.eup %2358  ;;  %v871_v58 = vadd.f32 1.0, %v2357_v55  ;;  %2362 = vtanh.f32 %v3202_v53 }
 0x16d   :  { %v880_v61 = vmul.f32 %v2359_v5, %v2353_v38 }
 0x16e   :  { %2364 = vrcp.f32 %v871_v58 }
 0x16f   :  { %v2361_v56 = vpop.eup %2360  ;;  %v3205_v59 = vadd.f32 %v880_v61, %v878_v21 }
 0x170   :  { %v872_v3 = vadd.f32 1.0, %v2361_v56 }
 0x171   :  { %2366 = vtanh.f32 %v3205_v59 }
 0x172   :  { %2368 = vrcp.f32 %v872_v3 }
 0x179   :  { %v2363_v63 = vpop.eup %2362 }
 0x17b   :  { %v2365_v1 = vpop.eup %2364 }
 0x17c   :  { %v885_v50 = vmul.f32 %v2365_v1, %v2363_v63 }
 0x17e   :  { %v2367_v13 = vpop.eup %2366 }
 0x17f   :  { %v2369_v7 = vpop.eup %2368 }
 0x180   :  { %v886_v57 = vmul.f32 %v2369_v7, %v2367_v13  ;;  %v3642_v13 = vld [vmem:[#allocation32_spill] sm:$0xff] }
 0x182   :  { %v896_v60 = vpack.c.bf16 %v886_v57, %v885_v50  ;;  %v3643_v50 = vld [vmem:[#allocation37_spill] sm:$0xff] }
 0x184   :  { %930 = vmatmul.mubr.bf16.vlgmr.msra.gmra.mxu0 %v896_v60  ;;  %973 = vmatmul.mubr.bf16.vlgmr.msra.gmra.mxu1 %v896_v60 }
 0x185   :  { %1050 = vmatpush1.bf16.msra.mxu0 %v2829_v11  ;;  %1093 = vmatpush1.bf16.msra.mxu1 %v2858_v22 }
 0x186   :  { %1051 = vmatprep.subr.bf16.mxu0 %v2836_v15  ;;  %1094 = vmatprep.subr.bf16.mxu1 %v2860_v23 }
 0x187   :  { %1081 = vmatprep.mubr.bf16.mxu0 %v3641_v29  ;;  %1124 = vmatprep.mubr.bf16.mxu1 %v3641_v29 }
 0x189   :  { %1052 = vmatpush1.bf16.msra.mxu0 %v2843_v17  ;;  %1095 = vmatpush1.bf16.msra.mxu1 %v2872_v26 }
 0x18a   :  { %1053 = vmatprep.subr.bf16.mxu0 %v2845_v18  ;;  %1096 = vmatprep.subr.bf16.mxu1 %v2876_v27 }
 0x18d   :  { %1054 = vmatpush1.bf16.msra.mxu0 %v2853_v19  ;;  %1097 = vmatpush1.bf16.msra.mxu1 %v2883_v30 }
 0x18e   :  { %1055 = vmatprep.subr.bf16.mxu0 %v2856_v20  ;;  %1098 = vmatprep.subr.bf16.mxu1 %v2891_v33 }
 0x191   :  { %1056 = vmatpush1.bf16.msra.mxu0 %v2864_v24  ;;  %1099 = vmatpush1.bf16.msra.mxu1 %v2897_v35 }
 0x192   :  { %1057 = vmatprep.subr.bf16.mxu0 %v2868_v25  ;;  %1100 = vmatprep.subr.bf16.mxu1 %v2903_v37 }
 0x195   :  { %1058 = vmatpush1.bf16.msra.mxu0 %v2879_v28  ;;  %1101 = vmatpush1.bf16.msra.mxu1 %v2913_v40 }
 0x196   :  { %1059 = vmatprep.subr.bf16.mxu0 %v2885_v31  ;;  %1102 = vmatprep.subr.bf16.mxu1 %v2919_v42 }
 0x199   :  { %1060 = vmatpush1.bf16.msra.mxu0 %v2888_v32  ;;  %1103 = vmatpush1.bf16.msra.mxu1 %v2927_v43 }
 0x19a   :  { %1061 = vmatprep.subr.bf16.mxu0 %v2895_v34  ;;  %1104 = vmatprep.subr.bf16.mxu1 %v2931_v44 }
 0x19d   :  { %1062 = vmatpush1.bf16.msra.mxu0 %v2901_v36  ;;  %1105 = vmatpush1.bf16.msra.mxu1 %v2935_v46 }
 0x19e   :  { %1063 = vmatprep.subr.bf16.mxu0 %v2911_v39  ;;  %1106 = vmatprep.subr.bf16.mxu1 %v2938_v47 }
 0x1a1   :  { %1064 = vmatpush1.bf16.msra.mxu0 %v2916_v41  ;;  %1107 = vmatpush1.bf16.msra.mxu1 %v2945_v48 }
 0x1a2   :  { %1201 = vmatprep.subr.bf16.mxu0 %v2827_v10  ;;  %1244 = vmatprep.subr.bf16.mxu1 %v2833_v14 }
 0x244   :  { %v931_v51 = vpop.f32.mrf.mxu0  ;;  %v974_v38 = vpop.f32.mrf.mxu1 }
 0x245   :  { %v983_v49 = vadd.f32 %v931_v51, %v3019_v8  ;;  %v3644_v51 = vld [vmem:[#allocation35_spill] sm:$0xff] }
 0x246   :  { %v933_v62 = vpop.f32.mrf.mxu0  ;;  %v976_v21 = vpop.f32.mrf.mxu1 }
 0x247   :  { %v2162_v4 = vmul.f32 -1.442695, %v983_v49  ;;  %v984_v55 = vadd.f32 %v933_v62, %v3025_v16  ;;  %v986_v8 = vadd.f32 %v976_v21, %v3076_v12  ;;  %v985_v16 = vadd.f32 %v974_v38, %v3642_v13 }
 0x248   :  { %v935_v5 = vpop.f32.mrf.mxu0  ;;  %v978_v14 = vpop.f32.mrf.mxu1 }
 0x249   :  { %2370 = vpow2.f32 %v2162_v4  ;;  %v2164_v58 = vmul.f32 -1.442695, %v984_v55  ;;  %v987_v61 = vadd.f32 %v935_v5, %v3031_v45  ;;  %v2166_v7 = vmul.f32 -1.442695, %v986_v8 }
 0x24a   :  { %v937_v56 = vpop.f32.mrf.mxu0  ;;  %v980_v1 = vpop.f32.mrf.mxu1  ;;  %v989_v45 = vadd.f32 %v978_v14, %v3644_v51 }
 0x24b   :  { %2372 = vpow2.f32 %v2164_v58  ;;  %v2163_v3 = vmul.f32 -1.442695, %v987_v61  ;;  %v988_v10 = vadd.f32 %v937_v56, %v3037_v54  ;;  %v990_v57 = vadd.f32 %v980_v1, %v3643_v50 }
 0x24d   :  { %2374 = vpow2.f32 %v2163_v3  ;;  %v2165_v63 = vmul.f32 -1.442695, %v988_v10  ;;  %v2167_v54 = vmul.f32 -1.442695, %v990_v57 }
 0x24f   :  { %2376 = vpow2.f32 %v2165_v63 }
 0x250   :  { %2378 = vtanh.f32 %v985_v16 }
 0x251   :  { %2380 = vpow2.f32 %v2166_v7 }
 0x256   :  { %v2371_v60 = vpop.eup %2370 }
 0x257   :  { %v997_v49 = vadd.f32 1.0, %v2371_v60 }
 0x258   :  { %v2373_v62 = vpop.eup %2372 }
 0x259   :  { %2382 = vrcp.f32 %v997_v49  ;;  %v1009_v4 = vadd.f32 1.0, %v2373_v62 }
 0x25a   :  { %v2375_v55 = vpop.eup %2374  ;;  %2384 = vtanh.f32 %v989_v45 }
 0x25b   :  { %2386 = vrcp.f32 %v1009_v4  ;;  %v998_v12 = vadd.f32 1.0, %v2375_v55 }
 0x25c   :  { %v2377_v5 = vpop.eup %2376  ;;  %2388 = vpow2.f32 %v2167_v54 }
 0x25d   :  { %2390 = vrcp.f32 %v998_v12  ;;  %v1010_v38 = vadd.f32 1.0, %v2377_v5  ;;  %v2379_v58 = vpop.eup %2378  ;;  %v3651_v12 = vld [vmem:[#allocation45_spill] sm:$0xff] }
 0x25e   :  { %v2381_v21 = vpop.eup %2380 }
 0x25f   :  { %2392 = vrcp.f32 %v1010_v38  ;;  %v1023_v1 = vadd.f32 1.0, %v2381_v21 }
 0x261   :  { %2394 = vrcp.f32 %v1023_v1 }
 0x266   :  { %v2383_v61 = vpop.eup %2382 }
 0x267   :  { %v2385_v56 = vpop.eup %2384  ;;  %v1031_v3 = vmul.f32 %v2383_v61, %v2379_v58  ;;  %v3652_v58 = vld [vmem:[#allocation43_spill] sm:$0xff] }
 0x268   :  { %v2387_v10 = vpop.eup %2386 }
 0x269   :  { %v2389_v14 = vpop.eup %2388  ;;  %v1029_v63 = vmul.f32 %v2387_v10, %v3202_v53 }
 0x26a   :  { %v2391_v8 = vpop.eup %2390  ;;  %v1024_v50 = vadd.f32 1.0, %v2389_v14 }
 0x26b   :  { %v3251_v13 = vadd.f32 %v1031_v3, %v1029_v63  ;;  %v1032_v16 = vmul.f32 %v2391_v8, %v2385_v56 }
 0x26c   :  { %v2393_v7 = vpop.eup %2392 }
 0x26d   :  { %v1030_v57 = vmul.f32 %v2393_v7, %v3205_v59  ;;  %2396 = vtanh.f32 %v3251_v13 }
 0x26e   :  { %2398 = vrcp.f32 %v1024_v50  ;;  %v2395_v51 = vpop.eup %2394 }
 0x26f   :  { %v3254_v60 = vadd.f32 %v1032_v16, %v1030_v57 }
 0x271   :  { %2400 = vtanh.f32 %v3254_v60 }
 0x27a   :  { %v2397_v45 = vpop.eup %2396 }
 0x27b   :  { %v2399_v53 = vpop.eup %2398  ;;  %v1037_v62 = vmul.f32 %v2397_v45, %v2395_v51 }
 0x27e   :  { %v2401_v49 = vpop.eup %2400 }
 0x27f   :  { %v1038_v54 = vmul.f32 %v2401_v49, %v2399_v53 }
 0x281   :  { %v1048_v4 = vpack.c.bf16 %v1038_v54, %v1037_v62 }
 0x283   :  { %1082 = vmatmul.mubr.bf16.vlgmr.msra.gmra.mxu0 %v1048_v4  ;;  %1125 = vmatmul.mubr.bf16.vlgmr.msra.gmra.mxu1 %v1048_v4 }
 0x284   :  { %1202 = vmatpush1.bf16.msra.mxu0 %v2829_v11  ;;  %1245 = vmatpush1.bf16.msra.mxu1 %v2858_v22  ;;  %v3290_v11 = vld [vmem:[#allocation11 + $0xe4] ss:$16 sps:$4 sm:$0xff]  }
 0x285   :  { %1203 = vmatprep.subr.bf16.mxu0 %v2836_v15  ;;  %1246 = vmatprep.subr.bf16.mxu1 %v2860_v23  ;;  %v3293_v15 = vld [vmem:[#allocation11 + $0xec] ss:$16 sps:$4 sm:$0xff]  }
 0x286   :  { %1233 = vmatprep.mubr.bf16.mxu0 %v3641_v29  ;;  %1276 = vmatprep.mubr.bf16.mxu1 %v3641_v29 }
 0x288   :  { %1204 = vmatpush1.bf16.msra.mxu0 %v2843_v17  ;;  %1247 = vmatpush1.bf16.msra.mxu1 %v2872_v26 }
 0x289   :  { %1205 = vmatprep.subr.bf16.mxu0 %v2845_v18  ;;  %1248 = vmatprep.subr.bf16.mxu1 %v2876_v27  ;;  %v3645_v18 = vld [vmem:[#allocation27_spill] sm:$0xff] }
 0x28c   :  { %1206 = vmatpush1.bf16.msra.mxu0 %v2853_v19  ;;  %1249 = vmatpush1.bf16.msra.mxu1 %v2883_v30  ;;  %v3647_v30 = vld [vmem:[#allocation29_spill] sm:$0xff] }
 0x28d   :  { %1207 = vmatprep.subr.bf16.mxu0 %v2856_v20  ;;  %1250 = vmatprep.subr.bf16.mxu1 %v2891_v33 }
 0x290   :  { %1208 = vmatpush1.bf16.msra.mxu0 %v2864_v24  ;;  %1251 = vmatpush1.bf16.msra.mxu1 %v2897_v35  ;;  %v3646_v24 = vld [vmem:[#allocation28_spill] sm:$0xff] }
 0x291   :  { %1209 = vmatprep.subr.bf16.mxu0 %v2868_v25  ;;  %1252 = vmatprep.subr.bf16.mxu1 %v2903_v37 }
 0x294   :  { %1210 = vmatpush1.bf16.msra.mxu0 %v2879_v28  ;;  %1253 = vmatpush1.bf16.msra.mxu1 %v2913_v40 }
 0x295   :  { %1211 = vmatprep.subr.bf16.mxu0 %v2885_v31  ;;  %1254 = vmatprep.subr.bf16.mxu1 %v2919_v42  ;;  %v3650_v42 = vld [vmem:[#allocation39_spill] sm:$0xff] }
 0x298   :  { %1212 = vmatpush1.bf16.msra.mxu0 %v2888_v32  ;;  %1255 = vmatpush1.bf16.msra.mxu1 %v2927_v43 }
 0x299   :  { %1213 = vmatprep.subr.bf16.mxu0 %v2895_v34  ;;  %1256 = vmatprep.subr.bf16.mxu1 %v2931_v44  ;;  %v3648_v34 = vld [vmem:[#allocation30_spill] sm:$0xff] }
 0x29c   :  { %1214 = vmatpush1.bf16.msra.mxu0 %v2901_v36  ;;  %1257 = vmatpush1.bf16.msra.mxu1 %v2935_v46 }
 0x29d   :  { %1215 = vmatprep.subr.bf16.mxu0 %v2911_v39  ;;  %1258 = vmatprep.subr.bf16.mxu1 %v2938_v47  ;;  %v3649_v39 = vld [vmem:[#allocation41_spill] sm:$0xff] }
 0x2a0   :  { %1216 = vmatpush1.bf16.msra.mxu0 %v2916_v41  ;;  %1259 = vmatpush1.bf16.msra.mxu1 %v2945_v48 }
 0x2a1   :  { %1353 = vmatprep.subr.bf16.mxu0 %v3290_v11  ;;  %1396 = vmatprep.subr.bf16.mxu1 %v3293_v15 }
 0x343   :  { %v1083_v17 = vpop.f32.mrf.mxu0  ;;  %v1126_v20 = vpop.f32.mrf.mxu1 }
 0x344   :  { %v1135_v19 = vadd.f32 %v1083_v17, %v3645_v18  ;;  %v1137_v59 = vadd.f32 %v1126_v20, %v3650_v42  ;;  %v3350_v42 = vld [vmem:[#allocation11 + $0x80] ss:$16 sps:$4 sm:$0xff]  }
 0x345   :  { %v1085_v22 = vpop.f32.mrf.mxu0  ;;  %v1128_v28 = vpop.f32.mrf.mxu1 }
 0x346   :  { %v2168_v23 = vmul.f32 -1.442695, %v1135_v19  ;;  %v1136_v25 = vadd.f32 %v1085_v22, %v3646_v24  ;;  %v1138_v40 = vadd.f32 %v1128_v28, %v3649_v39  ;;  %v3341_v39 = vld [vmem:[#allocation11 + $0xa8] ss:$16 sps:$4 sm:$0xff]  }
 0x347   :  { %v1087_v26 = vpop.f32.mrf.mxu0  ;;  %v1130_v36 = vpop.f32.mrf.mxu1 }
 0x348   :  { %2402 = vpow2.f32 %v2168_v23  ;;  %v2170_v27 = vmul.f32 -1.442695, %v1136_v25  ;;  %v1139_v31 = vadd.f32 %v1087_v26, %v3647_v30  ;;  %v2172_v55 = vmul.f32 -1.442695, %v1138_v40  ;;  %v3312_v30 = vld [vmem:[#allocation11 + $0xe0] ss:$16 sps:$4 sm:$0xff]  }
 0x349   :  { %v1089_v32 = vpop.f32.mrf.mxu0  ;;  %v1132_v41 = vpop.f32.mrf.mxu1  ;;  %v1141_v21 = vadd.f32 %v1130_v36, %v3652_v58  ;;  %v3335_v36 = vld [vmem:[#allocation11 + $0xac] ss:$16 sps:$4 sm:$0xff]   ;;  %v3344_v40 = vld [vmem:[#allocation11 + $0x84] ss:$16 sps:$4 sm:$0xff]  }
 0x34a   :  { %2404 = vpow2.f32 %v2170_v27  ;;  %v2169_v33 = vmul.f32 -1.442695, %v1139_v31  ;;  %v1140_v35 = vadd.f32 %v1089_v32, %v3648_v34  ;;  %v1142_v5 = vadd.f32 %v1132_v41, %v3651_v12  ;;  %v3318_v31 = vld [vmem:[#allocation11 + $0xc4] ss:$16 sps:$4 sm:$0xff]   ;;  %v3321_v32 = vld [vmem:[#allocation11 + $0xcc] ss:$16 sps:$4 sm:$0xff]  }
 0x34b   :  { %v3329_v34 = vld [vmem:[#allocation11 + $0xc8] ss:$16 sps:$4 sm:$0xff]   ;;  %v3347_v41 = vld [vmem:[#allocation11 + $0x8c] ss:$16 sps:$4 sm:$0xff]   ;;  %v3368_v58 = vld [vmem:[#allocation11 + $0x44] ss:$16 sps:$4 sm:$0xff]  }
 0x34c   :  { %2406 = vpow2.f32 %v2169_v33  ;;  %v2171_v37 = vmul.f32 -1.442695, %v1140_v35  ;;  %v2173_v3 = vmul.f32 -1.442695, %v1142_v5  ;;  %v3326_v33 = vld [vmem:[#allocation11 + $0xc0] ss:$16 sps:$4 sm:$0xff]  }
 0x34d   :  { %v3332_v35 = vld [vmem:[#allocation11 + $0xa4] ss:$16 sps:$4 sm:$0xff]   ;;  %v3359_v12 = vld [vmem:[#allocation11 + $0x6c] ss:$16 sps:$4 sm:$0xff]   ;;  %v3362_v5 = vld [vmem:[#allocation11 + $0x60] ss:$16 sps:$4 sm:$0xff]  }
 0x34e   :  { %2408 = vpow2.f32 %v2171_v37  ;;  %v3338_v37 = vld [vmem:[#allocation11 + $0xa0] ss:$16 sps:$4 sm:$0xff]  }
 0x34f   :  { %2410 = vtanh.f32 %v1137_v59  ;;  %v3353_v59 = vld [vmem:[#allocation11 + $0x88] ss:$16 sps:$4 sm:$0xff]  }
 0x350   :  { %2412 = vpow2.f32 %v2172_v55  ;;  %v3356_v55 = vld [vmem:[#allocation11 + $0x64] ss:$16 sps:$4 sm:$0xff]  }
 0x355   :  { %v2403_v38 = vpop.eup %2402 }
 0x356   :  { %v1149_v61 = vadd.f32 1.0, %v2403_v38  ;;  %v3365_v38 = vld [vmem:[#allocation11 + $0x68] ss:$16 sps:$4 sm:$0xff]  }
 0x357   :  { %v2405_v56 = vpop.eup %2404 }
 0x358   :  { %2414 = vrcp.f32 %v1149_v61  ;;  %v1161_v10 = vadd.f32 1.0, %v2405_v56  ;;  %v3374_v61 = vld [vmem:[#allocation11 + $0x40] ss:$16 sps:$4 sm:$0xff]   ;;  %v3378_v56 = vld [vmem:[#allocation11 + $0x24] ss:$16 sps:$4 sm:$0xff]  }
 0x359   :  { %v2407_v14 = vpop.eup %2406  ;;  %2416 = vtanh.f32 %v1141_v21  ;;  %v3371_v21 = vld [vmem:[#allocation11 + $0x4c] ss:$16 sps:$4 sm:$0xff]  }
 0x35a   :  { %2418 = vrcp.f32 %v1161_v10  ;;  %v1150_v63 = vadd.f32 1.0, %v2407_v14  ;;  %v3386_v10 = vld [vmem:[#allocation11 + $0x4] ss:$16 sps:$4 sm:$0xff]   ;;  %v3390_v14 = vld [vmem:[#allocation11] ss:$16 sps:$4 sm:$0xff]  }
 0x35b   :  { %v2409_v8 = vpop.eup %2408  ;;  %2420 = vpow2.f32 %v2173_v3  ;;  %v3382_v3 = vld [vmem:[#allocation11 + $0x20] ss:$16 sps:$4 sm:$0xff]  }
 0x35c   :  { %2422 = vrcp.f32 %v1150_v63  ;;  %v1162_v1 = vadd.f32 1.0, %v2409_v8  ;;  %v2411_v16 = vpop.eup %2410 }
 0x35d   :  { %v2413_v7 = vpop.eup %2412 }
 0x35e   :  { %2424 = vrcp.f32 %v1162_v1  ;;  %v1175_v54 = vadd.f32 1.0, %v2413_v7 }
 0x360   :  { %2426 = vrcp.f32 %v1175_v54 }
 0x365   :  { %v2415_v50 = vpop.eup %2414 }
 0x366   :  { %v2417_v57 = vpop.eup %2416  ;;  %v1183_v51 = vmul.f32 %v2415_v50, %v2411_v16  ;;  %v3654_v16 = vld [vmem:[#allocation33_spill] sm:$0xff] }
 0x367   :  { %v2419_v45 = vpop.eup %2418 }
 0x368   :  { %v2421_v53 = vpop.eup %2420  ;;  %v1181_v49 = vmul.f32 %v2419_v45, %v3251_v13 }
 0x369   :  { %v2423_v62 = vpop.eup %2422  ;;  %v1176_v19 = vadd.f32 1.0, %v2421_v53 }
 0x36a   :  { %v3305_v4 = vadd.f32 %v1183_v51, %v1181_v49  ;;  %v1184_v17 = vmul.f32 %v2423_v62, %v2417_v57  ;;  %v3655_v51 = vld [vmem:[#allocation34_spill] sm:$0xff]  ;;  %v3656_v49 = vld [vmem:[#allocation36_spill] sm:$0xff] }
 0x36b   :  { %v2425_v18 = vpop.eup %2424 }
 0x36c   :  { %v1182_v20 = vmul.f32 %v2425_v18, %v3254_v60  ;;  %2428 = vtanh.f32 %v3305_v4  ;;  %v3315_v60 = vld [vmem:[#allocation11 + $0xe8] ss:$16 sps:$4 sm:$0xff]   ;;  %v3657_v18 = vld [vmem:[#allocation49_spill] sm:$0xff] }
 0x36d   :  { %2430 = vrcp.f32 %v1176_v19  ;;  %v2427_v23 = vpop.eup %2426 }
 0x36e   :  { %v3308_v22 = vadd.f32 %v1184_v17, %v1182_v20 }
 0x370   :  { %2432 = vtanh.f32 %v3308_v22 }
 0x379   :  { %v2429_v24 = vpop.eup %2428 }
 0x37a   :  { %v2431_v13 = vpop.eup %2430  ;;  %v1189_v26 = vmul.f32 %v2429_v24, %v2427_v23  ;;  %v3658_v23 = vld [vmem:[#allocation47_spill] sm:$0xff] }
 0x37d   :  { %v2433_v25 = vpop.eup %2432 }
 0x37e   :  { %v1190_v27 = vmul.f32 %v2433_v25, %v2431_v13  ;;  %v3659_v25 = vld [vmem:[#allocation53_spill] sm:$0xff] }
 0x380   :  { %v1200_v28 = vpack.c.bf16 %v1190_v27, %v1189_v26 }
 0x382   :  { %1234 = vmatmul.mubr.bf16.vlgmr.msra.gmra.mxu0 %v1200_v28  ;;  %1277 = vmatmul.mubr.bf16.vlgmr.msra.gmra.mxu1 %v1200_v28  ;;  %v3660_v28 = vld [vmem:[#allocation51_spill] sm:$0xff] }
 0x383   :  { %1354 = vmatpush1.bf16.msra.mxu0 %v3312_v30  ;;  %1397 = vmatpush1.bf16.msra.mxu1 %v3315_v60 }
 0x384   :  { %1355 = vmatprep.subr.bf16.mxu0 %v3318_v31  ;;  %1398 = vmatprep.subr.bf16.mxu1 %v3321_v32 }
 0x385   :  { %1385 = vmatprep.mubr.bf16.mxu0 %v3641_v29  ;;  %1428 = vmatprep.mubr.bf16.mxu1 %v3641_v29 }
 0x387   :  { %1356 = vmatpush1.bf16.msra.mxu0 %v3326_v33  ;;  %1399 = vmatpush1.bf16.msra.mxu1 %v3329_v34 }
 0x388   :  { %1357 = vmatprep.subr.bf16.mxu0 %v3332_v35  ;;  %1400 = vmatprep.subr.bf16.mxu1 %v3335_v36 }
 0x38b   :  { %1358 = vmatpush1.bf16.msra.mxu0 %v3338_v37  ;;  %1401 = vmatpush1.bf16.msra.mxu1 %v3341_v39 }
 0x38c   :  { %1359 = vmatprep.subr.bf16.mxu0 %v3344_v40  ;;  %1402 = vmatprep.subr.bf16.mxu1 %v3347_v41 }
 0x38f   :  { %1360 = vmatpush1.bf16.msra.mxu0 %v3350_v42  ;;  %1403 = vmatpush1.bf16.msra.mxu1 %v3353_v59 }
 0x390   :  { %1361 = vmatprep.subr.bf16.mxu0 %v3356_v55  ;;  %1404 = vmatprep.subr.bf16.mxu1 %v3359_v12 }
 0x393   :  { %1362 = vmatpush1.bf16.msra.mxu0 %v3362_v5  ;;  %1405 = vmatpush1.bf16.msra.mxu1 %v3365_v38 }
 0x394   :  { %1363 = vmatprep.subr.bf16.mxu0 %v3368_v58  ;;  %1406 = vmatprep.subr.bf16.mxu1 %v3371_v21 }
 0x397   :  { %1364 = vmatpush1.bf16.msra.mxu0 %v3374_v61  ;;  %1407 = vmatpush1.bf16.msra.mxu1 %v2927_v43 }
 0x398   :  { %1365 = vmatprep.subr.bf16.mxu0 %v3378_v56  ;;  %1408 = vmatprep.subr.bf16.mxu1 %v2931_v44  ;;  %v3653_v44 = vld [vmem:[#allocation31_spill] sm:$0xff] }
 0x39b   :  { %1366 = vmatpush1.bf16.msra.mxu0 %v3382_v3  ;;  %1409 = vmatpush1.bf16.msra.mxu1 %v2935_v46 }
 0x39c   :  { %1367 = vmatprep.subr.bf16.mxu0 %v3386_v10  ;;  %1410 = vmatprep.subr.bf16.mxu1 %v2938_v47 }
 0x39f   :  { %1368 = vmatpush1.bf16.msra.mxu0 %v3390_v14  ;;  %1411 = vmatpush1.bf16.msra.mxu1 %v2945_v48 }
 0x3a0   :  { %1505 = vmatprep.subr.bf16.mxu0 %v3290_v11  ;;  %1548 = vmatprep.subr.bf16.mxu1 %v3293_v15 }
 0x442   :  { %v1235_v43 = vpop.f32.mrf.mxu0  ;;  %v1278_v46 = vpop.f32.mrf.mxu1 }
 0x443   :  { %v1287_v63 = vadd.f32 %v1235_v43, %v3653_v44  ;;  %v1289_v24 = vadd.f32 %v1278_v46, %v3658_v23 }
 0x444   :  { %v1237_v8 = vpop.f32.mrf.mxu0  ;;  %v1280_v57 = vpop.f32.mrf.mxu1 }
 0x445   :  { %v2174_v1 = vmul.f32 -1.442695, %v1287_v63  ;;  %v1288_v7 = vadd.f32 %v1237_v8, %v3654_v16  ;;  %v1290_v19 = vadd.f32 %v1280_v57, %v3657_v18 }
 0x446   :  { %v1239_v50 = vpop.f32.mrf.mxu0  ;;  %v1282_v54 = vpop.f32.mrf.mxu1 }
 0x447   :  { %2434 = vpow2.f32 %v2174_v1  ;;  %v2176_v47 = vmul.f32 -1.442695, %v1288_v7  ;;  %v1291_v45 = vadd.f32 %v1239_v50, %v3655_v51  ;;  %v2178_v13 = vmul.f32 -1.442695, %v1290_v19 }
 0x448   :  { %v1241_v53 = vpop.f32.mrf.mxu0  ;;  %v1284_v20 = vpop.f32.mrf.mxu1  ;;  %v1293_v43 = vadd.f32 %v1282_v54, %v3660_v28 }
 0x449   :  { %2436 = vpow2.f32 %v2176_v47  ;;  %v2175_v48 = vmul.f32 -1.442695, %v1291_v45  ;;  %v1292_v62 = vadd.f32 %v1241_v53, %v3656_v49  ;;  %v1294_v26 = vadd.f32 %v1284_v20, %v3659_v25 }
 0x44b   :  { %2438 = vpow2.f32 %v2175_v48  ;;  %v2177_v17 = vmul.f32 -1.442695, %v1292_v62  ;;  %v2179_v8 = vmul.f32 -1.442695, %v1294_v26 }
 0x44d   :  { %2440 = vpow2.f32 %v2177_v17 }
 0x44e   :  { %2442 = vtanh.f32 %v1289_v24 }
 0x44f   :  { %2444 = vpow2.f32 %v2178_v13 }
 0x454   :  { %v2435_v27 = vpop.eup %2434 }
 0x455   :  { %v1301_v44 = vadd.f32 1.0, %v2435_v27 }
 0x456   :  { %v2437_v63 = vpop.eup %2436 }
 0x457   :  { %2446 = vrcp.f32 %v1301_v44  ;;  %v1313_v1 = vadd.f32 1.0, %v2437_v63  ;;  %v3439_v63 = vld [vmem:[#allocation11 + $0x2c] ss:$16 sps:$4 sm:$0xff]  }
 0x458   :  { %v2439_v16 = vpop.eup %2438  ;;  %2448 = vtanh.f32 %v1293_v43 }
 0x459   :  { %2450 = vrcp.f32 %v1313_v1  ;;  %v1302_v7 = vadd.f32 1.0, %v2439_v16  ;;  %v3447_v1 = vld [vmem:[#allocation11 + $0xc] ss:$16 sps:$4 sm:$0xff]   ;;  %v3451_v16 = vld [vmem:[#allocation11 + $0x8] ss:$16 sps:$4 sm:$0xff]  }
 0x45a   :  { %v2441_v50 = vpop.eup %2440  ;;  %2452 = vpow2.f32 %v2179_v8  ;;  %v3443_v8 = vld [vmem:[#allocation11 + $0x28] ss:$16 sps:$4 sm:$0xff]  }
 0x45b   :  { %2454 = vrcp.f32 %v1302_v7  ;;  %v1314_v46 = vadd.f32 1.0, %v2441_v50  ;;  %v2443_v47 = vpop.eup %2442  ;;  %v3661_v50 = vld [vmem:[#allocation38_spill] sm:$0xff] }
 0x45c   :  { %v2445_v57 = vpop.eup %2444 }
 0x45d   :  { %2456 = vrcp.f32 %v1314_v46  ;;  %v1327_v17 = vadd.f32 1.0, %v2445_v57 }
 0x45f   :  { %2458 = vrcp.f32 %v1327_v17 }
 0x464   :  { %v2447_v51 = vpop.eup %2446 }
 0x465   :  { %v2449_v45 = vpop.eup %2448  ;;  %v1335_v53 = vmul.f32 %v2447_v51, %v2443_v47 }
 0x466   :  { %v2451_v48 = vpop.eup %2450 }
 0x467   :  { %v2453_v49 = vpop.eup %2452  ;;  %v1333_v62 = vmul.f32 %v2451_v48, %v3305_v4 }
 0x468   :  { %v2455_v54 = vpop.eup %2454  ;;  %v1328_v23 = vadd.f32 1.0, %v2453_v49 }
 0x469   :  { %v3405_v18 = vadd.f32 %v1335_v53, %v1333_v62  ;;  %v1336_v19 = vmul.f32 %v2455_v54, %v2449_v45  ;;  %v3662_v45 = vld [vmem:[#allocation40_spill] sm:$0xff]  ;;  %v3663_v54 = vld [vmem:[#allocation42_spill] sm:$0xff] }
 0x46a   :  { %v2457_v20 = vpop.eup %2456 }
 0x46b   :  { %v1334_v24 = vmul.f32 %v2457_v20, %v3308_v22  ;;  %2460 = vtanh.f32 %v3405_v18  ;;  %v3435_v22 = vld [vmem:[#allocation11 + $0x48] ss:$16 sps:$4 sm:$0xff]  }
 0x46c   :  { %2462 = vrcp.f32 %v1328_v23  ;;  %v2459_v25 = vpop.eup %2458  ;;  %v3664_v23 = vld [vmem:[#allocation44_spill] sm:$0xff] }
 0x46d   :  { %v3408_v13 = vadd.f32 %v1336_v19, %v1334_v24 }
 0x46f   :  { %2464 = vtanh.f32 %v3408_v13 }
 0x478   :  { %v2461_v26 = vpop.eup %2460 }
 0x479   :  { %v2463_v4 = vpop.eup %2462  ;;  %v1341_v28 = vmul.f32 %v2461_v26, %v2459_v25 }
 0x47c   :  { %v2465_v27 = vpop.eup %2464 }
 0x47d   :  { %v1342_v43 = vmul.f32 %v2465_v27, %v2463_v4  ;;  %v3665_v4 = vld [vmem:[#allocation55_spill] sm:$0xff] }
 0x47f   :  { %v1352_v44 = vpack.c.bf16 %v1342_v43, %v1341_v28  ;;  %v3666_v43 = vld [vmem:[#allocation54_spill] sm:$0xff] }
 0x481   :  { %1386 = vmatmul.mubr.bf16.vlgmr.msra.gmra.mxu0 %v1352_v44  ;;  %1429 = vmatmul.mubr.bf16.vlgmr.msra.gmra.mxu1 %v1352_v44 }
 0x482   :  { %1506 = vmatpush1.bf16.msra.mxu0 %v3312_v30  ;;  %1549 = vmatpush1.bf16.msra.mxu1 %v3315_v60 }
 0x483   :  { %1507 = vmatprep.subr.bf16.mxu0 %v3318_v31  ;;  %1550 = vmatprep.subr.bf16.mxu1 %v3321_v32 }
 0x484   :  { %1537 = vmatprep.mubr.bf16.mxu0 %v3641_v29  ;;  %1580 = vmatprep.mubr.bf16.mxu1 %v3641_v29 }
 0x486   :  { %1508 = vmatpush1.bf16.msra.mxu0 %v3326_v33  ;;  %1551 = vmatpush1.bf16.msra.mxu1 %v3329_v34 }
 0x487   :  { %1509 = vmatprep.subr.bf16.mxu0 %v3332_v35  ;;  %1552 = vmatprep.subr.bf16.mxu1 %v3335_v36 }
 0x48a   :  { %1510 = vmatpush1.bf16.msra.mxu0 %v3338_v37  ;;  %1553 = vmatpush1.bf16.msra.mxu1 %v3341_v39 }
 0x48b   :  { %1511 = vmatprep.subr.bf16.mxu0 %v3344_v40  ;;  %1554 = vmatprep.subr.bf16.mxu1 %v3347_v41 }
 0x48e   :  { %1512 = vmatpush1.bf16.msra.mxu0 %v3350_v42  ;;  %1555 = vmatpush1.bf16.msra.mxu1 %v3353_v59 }
 0x48f   :  { %1513 = vmatprep.subr.bf16.mxu0 %v3356_v55  ;;  %1556 = vmatprep.subr.bf16.mxu1 %v3359_v12 }
 0x492   :  { %1514 = vmatpush1.bf16.msra.mxu0 %v3362_v5  ;;  %1557 = vmatpush1.bf16.msra.mxu1 %v3365_v38 }
 0x493   :  { %1515 = vmatprep.subr.bf16.mxu0 %v3368_v58  ;;  %1558 = vmatprep.subr.bf16.mxu1 %v3371_v21 }
 0x496   :  { %1516 = vmatpush1.bf16.msra.mxu0 %v3374_v61  ;;  %1559 = vmatpush1.bf16.msra.mxu1 %v3435_v22 }
 0x497   :  { %1517 = vmatprep.subr.bf16.mxu0 %v3378_v56  ;;  %1560 = vmatprep.subr.bf16.mxu1 %v3439_v63 }
 0x49a   :  { %1518 = vmatpush1.bf16.msra.mxu0 %v3382_v3  ;;  %1561 = vmatpush1.bf16.msra.mxu1 %v3443_v8 }
 0x49b   :  { %1519 = vmatprep.subr.bf16.mxu0 %v3386_v10  ;;  %1562 = vmatprep.subr.bf16.mxu1 %v3447_v1 }
 0x49e   :  { %1520 = vmatpush1.bf16.msra.mxu0 %v3390_v14  ;;  %1563 = vmatpush1.bf16.msra.mxu1 %v3451_v16 }
 0x49f   :  { %1657 = vmatprep.subr.bf16.mxu0 %v3290_v11  ;;  %1700 = vmatprep.subr.bf16.mxu1 %v3293_v15 }
 0x541   :  { %v1387_v7 = vpop.f32.mrf.mxu0  ;;  %v1430_v47 = vpop.f32.mrf.mxu1 }
 0x542   :  { %v1439_v46 = vadd.f32 %v1387_v7, %v3661_v50  ;;  %v1441_v44 = vadd.f32 %v1430_v47, %v3666_v43 }
 0x543   :  { %v1389_v57 = vpop.f32.mrf.mxu0  ;;  %v1432_v62 = vpop.f32.mrf.mxu1 }
 0x544   :  { %v2180_v51 = vmul.f32 -1.442695, %v1439_v46  ;;  %v1440_v53 = vadd.f32 %v1389_v57, %v3662_v45  ;;  %v1442_v27 = vadd.f32 %v1432_v62, %v3665_v4 }
 0x545   :  { %v1391_v48 = vpop.f32.mrf.mxu0  ;;  %v1434_v25 = vpop.f32.mrf.mxu1 }
 0x546   :  { %2466 = vpow2.f32 %v2180_v51  ;;  %v2182_v49 = vmul.f32 -1.442695, %v1440_v53  ;;  %v1443_v17 = vadd.f32 %v1391_v48, %v3663_v54  ;;  %v2184_v7 = vmul.f32 -1.442695, %v1442_v27 }
 0x547   :  { %v1393_v19 = vpop.f32.mrf.mxu0  ;;  %v1436_v28 = vpop.f32.mrf.mxu1  ;;  %v1445_v57 = vadd.f32 %v1434_v25, %v3149_v52 }
 0x548   :  { %2468 = vpow2.f32 %v2182_v49  ;;  %v2181_v20 = vmul.f32 -1.442695, %v1443_v17  ;;  %v1444_v24 = vadd.f32 %v1393_v19, %v3664_v23  ;;  %v1446_v50 = vadd.f32 %v1436_v28, %v3154_v6 }
 0x54a   :  { %2470 = vpow2.f32 %v2181_v20  ;;  %v2183_v26 = vmul.f32 -1.442695, %v1444_v24  ;;  %v2185_v53 = vmul.f32 -1.442695, %v1446_v50 }
 0x54c   :  { %2472 = vpow2.f32 %v2183_v26 }
 0x54d   :  { %2474 = vtanh.f32 %v1441_v44 }
 0x54e   :  { %2476 = vpow2.f32 %v2184_v7 }
 0x553   :  { %v2467_v46 = vpop.eup %2466 }
 0x554   :  { %v1453_v51 = vadd.f32 1.0, %v2467_v46 }
 0x555   :  { %v2469_v45 = vpop.eup %2468 }
 0x556   :  { %2478 = vrcp.f32 %v1453_v51  ;;  %v1465_v48 = vadd.f32 1.0, %v2469_v45 }
 0x557   :  { %v2471_v49 = vpop.eup %2470  ;;  %2480 = vtanh.f32 %v1445_v57 }
 0x558   :  { %2482 = vrcp.f32 %v1465_v48  ;;  %v1454_v62 = vadd.f32 1.0, %v2471_v49  ;;  %v3667_v49 = vld [vmem:[#allocation46_spill] sm:$0xff] }
 0x559   :  { %v2473_v54 = vpop.eup %2472  ;;  %2484 = vpow2.f32 %v2185_v53 }
 0x55a   :  { %2486 = vrcp.f32 %v1454_v62  ;;  %v1466_v47 = vadd.f32 1.0, %v2473_v54  ;;  %v2475_v6 = vpop.eup %2474 }
 0x55b   :  { %v2477_v17 = vpop.eup %2476 }
 0x55c   :  { %2488 = vrcp.f32 %v1466_v47  ;;  %v1479_v4 = vadd.f32 1.0, %v2477_v17  ;;  %v3668_v17 = vld [vmem:[#allocation48_spill] sm:$0xff] }
 0x55e   :  { %2490 = vrcp.f32 %v1479_v4 }
 0x563   :  { %v2479_v19 = vpop.eup %2478 }
 0x564   :  { %v2481_v52 = vpop.eup %2480  ;;  %v1487_v20 = vmul.f32 %v2479_v19, %v2475_v6 }
 0x565   :  { %v2483_v23 = vpop.eup %2482 }
 0x566   :  { %v2485_v24 = vpop.eup %2484  ;;  %v1485_v25 = vmul.f32 %v2483_v23, %v3405_v18 }
 0x567   :  { %v2487_v26 = vpop.eup %2486  ;;  %v1480_v44 = vadd.f32 1.0, %v2485_v24  ;;  %v3669_v24 = vld [vmem:[#allocation50_spill] sm:$0xff] }
 0x568   :  { %v3465_v27 = vadd.f32 %v1487_v20, %v1485_v25  ;;  %v1488_v28 = vmul.f32 %v2487_v26, %v2481_v52 }
 0x569   :  { %v2489_v43 = vpop.eup %2488 }
 0x56a   :  { %v1486_v7 = vmul.f32 %v2489_v43, %v3408_v13  ;;  %2492 = vtanh.f32 %v3465_v27 }
 0x56b   :  { %2494 = vrcp.f32 %v1480_v44  ;;  %v2491_v46 = vpop.eup %2490 }
 0x56c   :  { %v3468_v50 = vadd.f32 %v1488_v28, %v1486_v7 }
 0x56e   :  { %2496 = vtanh.f32 %v3468_v50 }
 0x577   :  { %v2493_v57 = vpop.eup %2492 }
 0x578   :  { %v2495_v18 = vpop.eup %2494  ;;  %v1493_v45 = vmul.f32 %v2493_v57, %v2491_v46 }
 0x57b   :  { %v2497_v51 = vpop.eup %2496 }
 0x57c   :  { %v1494_v53 = vmul.f32 %v2497_v51, %v2495_v18 }
 0x57e   :  { %v1504_v48 = vpack.c.bf16 %v1494_v53, %v1493_v45  ;;  %v3671_v45 = vld [vmem:[#allocation56_spill] sm:$0xff] }
 0x580   :  { %1538 = vmatmul.mubr.bf16.vlgmr.msra.gmra.mxu0 %v1504_v48  ;;  %1581 = vmatmul.mubr.bf16.vlgmr.msra.gmra.mxu1 %v1504_v48 }
 0x581   :  { %1658 = vmatpush1.bf16.msra.mxu0 %v3312_v30  ;;  %1701 = vmatpush1.bf16.msra.mxu1 %v3315_v60 }
 0x582   :  { %1659 = vmatprep.subr.bf16.mxu0 %v3318_v31  ;;  %1702 = vmatprep.subr.bf16.mxu1 %v3321_v32 }
 0x583   :  { %1689 = vmatprep.mubr.bf16.mxu0 %v3641_v29  ;;  %1732 = vmatprep.mubr.bf16.mxu1 %v3641_v29 }
 0x585   :  { %1660 = vmatpush1.bf16.msra.mxu0 %v3326_v33  ;;  %1703 = vmatpush1.bf16.msra.mxu1 %v3329_v34 }
 0x586   :  { %1661 = vmatprep.subr.bf16.mxu0 %v3332_v35  ;;  %1704 = vmatprep.subr.bf16.mxu1 %v3335_v36 }
 0x589   :  { %1662 = vmatpush1.bf16.msra.mxu0 %v3338_v37  ;;  %1705 = vmatpush1.bf16.msra.mxu1 %v3341_v39 }
 0x58a   :  { %1663 = vmatprep.subr.bf16.mxu0 %v3344_v40  ;;  %1706 = vmatprep.subr.bf16.mxu1 %v3347_v41 }
 0x58d   :  { %1664 = vmatpush1.bf16.msra.mxu0 %v3350_v42  ;;  %1707 = vmatpush1.bf16.msra.mxu1 %v3353_v59 }
 0x58e   :  { %1665 = vmatprep.subr.bf16.mxu0 %v3356_v55  ;;  %1708 = vmatprep.subr.bf16.mxu1 %v3359_v12 }
 0x591   :  { %1666 = vmatpush1.bf16.msra.mxu0 %v3362_v5  ;;  %1709 = vmatpush1.bf16.msra.mxu1 %v3365_v38 }
 0x592   :  { %1667 = vmatprep.subr.bf16.mxu0 %v3368_v58  ;;  %1710 = vmatprep.subr.bf16.mxu1 %v3371_v21 }
 0x595   :  { %1668 = vmatpush1.bf16.msra.mxu0 %v3374_v61  ;;  %1711 = vmatpush1.bf16.msra.mxu1 %v3435_v22 }
 0x596   :  { %1669 = vmatprep.subr.bf16.mxu0 %v3378_v56  ;;  %1712 = vmatprep.subr.bf16.mxu1 %v3439_v63 }
 0x599   :  { %1670 = vmatpush1.bf16.msra.mxu0 %v3382_v3  ;;  %1713 = vmatpush1.bf16.msra.mxu1 %v3443_v8 }
 0x59a   :  { %1671 = vmatprep.subr.bf16.mxu0 %v3386_v10  ;;  %1714 = vmatprep.subr.bf16.mxu1 %v3447_v1 }
 0x59d   :  { %1672 = vmatpush1.bf16.msra.mxu0 %v3390_v14  ;;  %1715 = vmatpush1.bf16.msra.mxu1 %v3451_v16 }
 0x59e   :  { %1809 = vmatprep.subr.bf16.mxu0 %v3290_v11  ;;  %1852 = vmatprep.subr.bf16.mxu1 %v3293_v15  ;;  %v3670_v11 = vld [vmem:[#allocation52_spill] sm:$0xff] }
 0x640   :  { %v1539_v13 = vpop.f32.mrf.mxu0  ;;  %v1582_v54 = vpop.f32.mrf.mxu1 }
 0x641   :  { %v1591_v62 = vadd.f32 %v1539_v13, %v3667_v49  ;;  %v1593_v46 = vadd.f32 %v1582_v54, %v3159_v9 }
 0x642   :  { %v1541_v47 = vpop.f32.mrf.mxu0  ;;  %v1584_v23 = vpop.f32.mrf.mxu1 }
 0x643   :  { %v2186_v6 = vmul.f32 -1.442695, %v1591_v62  ;;  %v1592_v19 = vadd.f32 %v1541_v47, %v3668_v17  ;;  %v1594_v44 = vadd.f32 %v1584_v23, %v3162_v0 }
 0x644   :  { %v1543_v52 = vpop.f32.mrf.mxu0  ;;  %v1586_v15 = vpop.f32.mrf.mxu1 }
 0x645   :  { %2498 = vpow2.f32 %v2186_v6  ;;  %v2188_v20 = vmul.f32 -1.442695, %v1592_v19  ;;  %v1595_v25 = vadd.f32 %v1543_v52, %v3669_v24  ;;  %v2190_v57 = vmul.f32 -1.442695, %v1594_v44 }
 0x646   :  { %v1545_v26 = vpop.f32.mrf.mxu0  ;;  %v1588_v7 = vpop.f32.mrf.mxu1  ;;  %v1597_v53 = vadd.f32 %v1586_v15, %v3671_v45 }
 0x647   :  { %2500 = vpow2.f32 %v2188_v20  ;;  %v2187_v4 = vmul.f32 -1.442695, %v1595_v25  ;;  %v1596_v28 = vadd.f32 %v1545_v26, %v3670_v11  ;;  %v1598_v18 = vadd.f32 %v1588_v7, %v3168_v2 }
 0x649   :  { %2502 = vpow2.f32 %v2187_v4  ;;  %v2189_v43 = vmul.f32 -1.442695, %v1596_v28  ;;  %v2191_v49 = vmul.f32 -1.442695, %v1598_v18 }
 0x64b   :  { %2504 = vpow2.f32 %v2189_v43 }
 0x64c   :  { %2506 = vtanh.f32 %v1593_v46 }
 0x64d   :  { %2508 = vpow2.f32 %v2190_v57 }
 0x652   :  { %v2499_v51 = vpop.eup %2498 }
 0x653   :  { %v1605_v48 = vadd.f32 1.0, %v2499_v51 }
 0x654   :  { %v2501_v13 = vpop.eup %2500 }
 0x655   :  { %2510 = vrcp.f32 %v1605_v48  ;;  %v1617_v62 = vadd.f32 1.0, %v2501_v13 }
 0x656   :  { %v2503_v47 = vpop.eup %2502  ;;  %2512 = vtanh.f32 %v1597_v53 }
 0x657   :  { %2514 = vrcp.f32 %v1617_v62  ;;  %v1606_v0 = vadd.f32 1.0, %v2503_v47 }
 0x658   :  { %v2505_v6 = vpop.eup %2504  ;;  %2516 = vpow2.f32 %v2191_v49 }
 0x659   :  { %2518 = vrcp.f32 %v1606_v0  ;;  %v1618_v9 = vadd.f32 1.0, %v2505_v6  ;;  %v2507_v2 = vpop.eup %2506 }
 0x65a   :  { %v2509_v54 = vpop.eup %2508 }
 0x65b   :  { %2520 = vrcp.f32 %v1618_v9  ;;  %v1631_v26 = vadd.f32 1.0, %v2509_v54 }
 0x65d   :  { %2522 = vrcp.f32 %v1631_v26 }
 0x662   :  { %v2511_v17 = vpop.eup %2510 }
 0x663   :  { %v2513_v19 = vpop.eup %2512  ;;  %v1639_v52 = vmul.f32 %v2511_v17, %v2507_v2 }
 0x664   :  { %v2515_v20 = vpop.eup %2514 }
 0x665   :  { %v2517_v23 = vpop.eup %2516  ;;  %v1637_v24 = vmul.f32 %v2515_v20, %v3465_v27 }
 0x666   :  { %v2519_v25 = vpop.eup %2518  ;;  %v1632_v15 = vadd.f32 1.0, %v2517_v23 }
 0x667   :  { %v3515_v4 = vadd.f32 %v1639_v52, %v1637_v24  ;;  %v1640_v11 = vmul.f32 %v2519_v25, %v2513_v19 }
 0x668   :  { %v2521_v28 = vpop.eup %2520 }
 0x669   :  { %v1638_v43 = vmul.f32 %v2521_v28, %v3468_v50  ;;  %2524 = vtanh.f32 %v3515_v4 }
 0x66a   :  { %2526 = vrcp.f32 %v1632_v15  ;;  %v2523_v7 = vpop.eup %2522 }
 0x66b   :  { %v3518_v44 = vadd.f32 %v1640_v11, %v1638_v43 }
 0x66d   :  { %2528 = vtanh.f32 %v3518_v44 }
 0x676   :  { %v2525_v46 = vpop.eup %2524 }
 0x677   :  { %v2527_v27 = vpop.eup %2526  ;;  %v1645_v18 = vmul.f32 %v2525_v46, %v2523_v7 }
 0x67a   :  { %v2529_v57 = vpop.eup %2528 }
 0x67b   :  { %v1646_v51 = vmul.f32 %v2529_v57, %v2527_v27 }
 0x67d   :  { %v1656_v45 = vpack.c.bf16 %v1646_v51, %v1645_v18  ;;  %v2330_v51 = vld [vmem:[#allocation13 + $0x38] sm:$0xff]  }
 0x67f   :  { %1690 = vmatmul.mubr.bf16.vlgmr.msra.gmra.mxu0 %v1656_v45  ;;  %1733 = vmatmul.mubr.bf16.vlgmr.msra.gmra.mxu1 %v1656_v45  ;;  %v2765_v45 = vmov 0.0  }
 0x680   :  { %1810 = vmatpush1.bf16.msra.mxu0 %v3312_v30  ;;  %1853 = vmatpush1.bf16.msra.mxu1 %v3315_v60  ;;  %v3672_v30 = vld [vmem:[#allocation19_spill] sm:$0xff] }
 0x681   :  { %1811 = vmatprep.subr.bf16.mxu0 %v3318_v31  ;;  %1854 = vmatprep.subr.bf16.mxu1 %v3321_v32 }
 0x682   :  { %1841 = vmatprep.mubr.bf16.mxu0 %v3641_v29  ;;  %1884 = vmatprep.mubr.bf16.mxu1 %v3641_v29 }
 0x684   :  { %1812 = vmatpush1.bf16.msra.mxu0 %v3326_v33  ;;  %1855 = vmatpush1.bf16.msra.mxu1 %v3329_v34  ;;  %v3673_v34 = vld [vmem:[#allocation20_spill] sm:$0xff] }
 0x685   :  { %1813 = vmatprep.subr.bf16.mxu0 %v3332_v35  ;;  %1856 = vmatprep.subr.bf16.mxu1 %v3335_v36 }
 0x688   :  { %1814 = vmatpush1.bf16.msra.mxu0 %v3338_v37  ;;  %1857 = vmatpush1.bf16.msra.mxu1 %v3341_v39 }
 0x689   :  { %1815 = vmatprep.subr.bf16.mxu0 %v3344_v40  ;;  %1858 = vmatprep.subr.bf16.mxu1 %v3347_v41  ;;  %v3674_v40 = vld [vmem:[#allocation21_spill] sm:$0xff] }
 0x68c   :  { %1816 = vmatpush1.bf16.msra.mxu0 %v3350_v42  ;;  %1859 = vmatpush1.bf16.msra.mxu1 %v3353_v59 }
 0x68d   :  { %1817 = vmatprep.subr.bf16.mxu0 %v3356_v55  ;;  %1860 = vmatprep.subr.bf16.mxu1 %v3359_v12  ;;  %v3675_v55 = vld [vmem:[#allocation22_spill] sm:$0xff] }
 0x690   :  { %1818 = vmatpush1.bf16.msra.mxu0 %v3362_v5  ;;  %1861 = vmatpush1.bf16.msra.mxu1 %v3365_v38 }
 0x691   :  { %1819 = vmatprep.subr.bf16.mxu0 %v3368_v58  ;;  %1862 = vmatprep.subr.bf16.mxu1 %v3371_v21  ;;  %v3676_v58 = vld [vmem:[#allocation58_spill] sm:$0xff] }
 0x694   :  { %1820 = vmatpush1.bf16.msra.mxu0 %v3374_v61  ;;  %1863 = vmatpush1.bf16.msra.mxu1 %v3435_v22 }
 0x695   :  { %1821 = vmatprep.subr.bf16.mxu0 %v3378_v56  ;;  %1864 = vmatprep.subr.bf16.mxu1 %v3439_v63  ;;  %v3677_v56 = vld [vmem:[#allocation57_spill] sm:$0xff] }
 0x698   :  { %1822 = vmatpush1.bf16.msra.mxu0 %v3382_v3  ;;  %1865 = vmatpush1.bf16.msra.mxu1 %v3443_v8  ;;  %v3679_v8 = vld [vmem:[#allocation59_spill] sm:$0xff] }
 0x699   :  { %1823 = vmatprep.subr.bf16.mxu0 %v3386_v10  ;;  %1866 = vmatprep.subr.bf16.mxu1 %v3447_v1 }
 0x69c   :  { %1824 = vmatpush1.bf16.msra.mxu0 %v3390_v14  ;;  %1867 = vmatpush1.bf16.msra.mxu1 %v3451_v16  ;;  %v3678_v14 = vld [vmem:[#allocation60_spill] sm:$0xff] }
 0x69d   :  { %2222 = vmatprep.subr.bf16.mxu0 %v2765_v45 }
 0x73f   :  { %v1691_v29 = vpop.f32.mrf.mxu0  ;;  %v1734_v31 = vpop.f32.mrf.mxu1 }
 0x740   :  { %v1743_v60 = vadd.f32 %v1691_v29, %v3672_v30  ;;  %v1745_v3 = vadd.f32 %v1734_v31, %v3677_v56  ;;  %v2332_v29 = vld [vmem:[#allocation13 + $0x28] sm:$0xff]   ;;  %v2333_v30 = vld [vmem:[#allocation13 + $0x20] sm:$0xff]   ;;  %v2335_v31 = vld [vmem:[#allocation13 + $0x10] sm:$0xff]  }
 0x741   :  { %v1693_v32 = vpop.f32.mrf.mxu0  ;;  %v1736_v39 = vpop.f32.mrf.mxu1 }
 0x742   :  { %v2192_v33 = vmul.f32 -1.442695, %v1743_v60  ;;  %v1744_v35 = vadd.f32 %v1693_v32, %v3673_v34  ;;  %v1746_v21 = vadd.f32 %v1736_v39, %v3676_v58  ;;  %v2334_v60 = vld [vmem:[#allocation13 + $0x18] sm:$0xff]   ;;  %v2336_v32 = vld [vmem:[#allocation13 + $0x8] sm:$0xff]  }
 0x743   :  { %v1695_v36 = vpop.f32.mrf.mxu0  ;;  %v1738_v5 = vpop.f32.mrf.mxu1 }
 0x744   :  { %2530 = vpow2.f32 %v2192_v33  ;;  %v2194_v37 = vmul.f32 -1.442695, %v1744_v35  ;;  %v1747_v41 = vadd.f32 %v1695_v36, %v3674_v40  ;;  %v2196_v10 = vmul.f32 -1.442695, %v1746_v21  ;;  %v2337_v33 = vld [vmem:[#allocation13] sm:$0xff]   ;;  %v3680_v35 = vld [vmem:[#allocation23_spill] sm:$0xff] }
 0x745   :  { %v1697_v42 = vpop.f32.mrf.mxu0  ;;  %v1740_v61 = vpop.f32.mrf.mxu1  ;;  %v1749_v1 = vadd.f32 %v1738_v5, %v3679_v8  ;;  %v3682_v5 = vld [vmem:[#allocation25_spill] sm:$0xff] }
 0x746   :  { %2532 = vpow2.f32 %v2194_v37  ;;  %v2193_v59 = vmul.f32 -1.442695, %v1747_v41  ;;  %v1748_v12 = vadd.f32 %v1697_v42, %v3675_v55  ;;  %v1750_v22 = vadd.f32 %v1740_v61, %v3678_v14  ;;  %v3681_v41 = vld [vmem:[#allocation24_spill] sm:$0xff]  ;;  %v3683_v61 = vld [vmem:[#allocation26_spill] sm:$0xff]  ;;  %v3685_v8 = vld [vmem:[#allocation61_spill] sm:$0xff] }
 0x747   :  { %v3684_v14 = vld [vmem:[#allocation62_spill] sm:$0xff] }
 0x748   :  { %2534 = vpow2.f32 %v2193_v59  ;;  %v2195_v38 = vmul.f32 -1.442695, %v1748_v12  ;;  %v2197_v53 = vmul.f32 -1.442695, %v1750_v22 }
 0x74a   :  { %2536 = vpow2.f32 %v2195_v38 }
 0x74b   :  { %2538 = vtanh.f32 %v1745_v3 }
 0x74c   :  { %2540 = vpow2.f32 %v2196_v10 }
 0x751   :  { %v2531_v63 = vpop.eup %2530 }
 0x752   :  { %v1757_v16 = vadd.f32 1.0, %v2531_v63 }
 0x753   :  { %v2533_v50 = vpop.eup %2532 }
 0x754   :  { %2542 = vrcp.f32 %v1757_v16  ;;  %v1769_v48 = vadd.f32 1.0, %v2533_v50  ;;  %v3686_v50 = vld [vmem:[#allocation64_spill] sm:$0xff] }
 0x755   :  { %v2535_v13 = vpop.eup %2534  ;;  %2544 = vtanh.f32 %v1749_v1 }
 0x756   :  { %2546 = vrcp.f32 %v1769_v48  ;;  %v1758_v49 = vadd.f32 1.0, %v2535_v13  ;;  %v3687_v13 = vld [vmem:[#allocation63_spill] sm:$0xff] }
 0x757   :  { %v2537_v62 = vpop.eup %2536  ;;  %2548 = vpow2.f32 %v2197_v53 }
 0x758   :  { %2550 = vrcp.f32 %v1758_v49  ;;  %v1770_v47 = vadd.f32 1.0, %v2537_v62  ;;  %v2539_v0 = vpop.eup %2538 }
 0x759   :  { %v2541_v6 = vpop.eup %2540 }
 0x75a   :  { %2552 = vrcp.f32 %v1770_v47  ;;  %v1783_v23 = vadd.f32 1.0, %v2541_v6 }
 0x75c   :  { %2554 = vrcp.f32 %v1783_v23 }
 0x761   :  { %v2543_v9 = vpop.eup %2542 }
 0x762   :  { %v2545_v2 = vpop.eup %2544  ;;  %v1791_v54 = vmul.f32 %v2543_v9, %v2539_v0 }
 0x763   :  { %v2547_v17 = vpop.eup %2546 }
 0x764   :  { %v2549_v19 = vpop.eup %2548  ;;  %v1789_v52 = vmul.f32 %v2547_v17, %v3515_v4 }
 0x765   :  { %v2551_v20 = vpop.eup %2550  ;;  %v1784_v11 = vadd.f32 1.0, %v2549_v19 }
 0x766   :  { %v3563_v24 = vadd.f32 %v1791_v54, %v1789_v52  ;;  %v1792_v25 = vmul.f32 %v2551_v20, %v2545_v2 }
 0x767   :  { %v2553_v26 = vpop.eup %2552 }
 0x768   :  { %v1790_v28 = vmul.f32 %v2553_v26, %v3518_v44  ;;  %2556 = vtanh.f32 %v3563_v24  ;;  %v2331_v44 = vld [vmem:[#allocation13 + $0x30] sm:$0xff]  }
 0x769   :  { %2558 = vrcp.f32 %v1784_v11  ;;  %v2555_v43 = vpop.eup %2554 }
 0x76a   :  { %v3566_v15 = vadd.f32 %v1792_v25, %v1790_v28 }
 0x76c   :  { %2560 = vtanh.f32 %v3566_v15 }
 0x775   :  { %v2557_v7 = vpop.eup %2556 }
 0x776   :  { %v2559_v4 = vpop.eup %2558  ;;  %v1797_v27 = vmul.f32 %v2557_v7, %v2555_v43 }
 0x779   :  { %v2561_v46 = vpop.eup %2560 }
 0x77a   :  { %v1798_v57 = vmul.f32 %v2561_v46, %v2559_v4 }
 0x77c   :  { %v1808_v18 = vpack.c.bf16 %v1798_v57, %v1797_v27 }
 0x77e   :  { %1842 = vmatmul.mubr.bf16.vlgmr.msra.gmra.mxu0 %v1808_v18  ;;  %1885 = vmatmul.mubr.bf16.vlgmr.msra.gmra.mxu1 %v1808_v18 }
 0x77f   :  { %2223 = vmatpush3.bf16.msra.mxu0 %v2330_v51  ;;  %2238 = vmatprep.mubr.msk.bf16.mxu0 %vm2766_vm1, %v2765_v45 }
 0x780   :  { %2224 = vmatprep.subr.bf16.mxu0 %v2765_v45 }
 0x783   :  { %2225 = vmatpush3.bf16.msra.mxu0 %v2331_v44 }
 0x784   :  { %2226 = vmatprep.subr.bf16.mxu0 %v2765_v45 }
 0x787   :  { %2227 = vmatpush3.bf16.msra.mxu0 %v2332_v29 }
 0x788   :  { %2228 = vmatprep.subr.bf16.mxu0 %v2765_v45 }
 0x78b   :  { %2229 = vmatpush3.bf16.msra.mxu0 %v2333_v30 }
 0x78c   :  { %2230 = vmatprep.subr.bf16.mxu0 %v2765_v45 }
 0x78f   :  { %2231 = vmatpush3.bf16.msra.mxu0 %v2334_v60 }
 0x790   :  { %2232 = vmatprep.subr.bf16.mxu0 %v2765_v45 }
 0x793   :  { %2233 = vmatpush3.bf16.msra.mxu0 %v2335_v31 }
 0x794   :  { %2234 = vmatprep.subr.bf16.mxu0 %v2765_v45 }
 0x797   :  { %2235 = vmatpush3.bf16.msra.mxu0 %v2336_v32 }
 0x798   :  { %2236 = vmatprep.subr.bf16.mxu0 %v2765_v45 }
 0x79b   :  { %2237 = vmatpush3.bf16.msra.mxu0 %v2337_v33 }
 0x83e   :  { %v1843_v34 = vpop.f32.mrf.mxu0  ;;  %v1886_v37 = vpop.f32.mrf.mxu1 }
 0x83f   :  { %v1895_v36 = vadd.f32 %v1843_v34, %v3680_v35  ;;  %v1897_v1 = vadd.f32 %v1886_v37, %v3685_v8 }
 0x840   :  { %v1845_v39 = vpop.f32.mrf.mxu0  ;;  %v1888_v12 = vpop.f32.mrf.mxu1 }
 0x841   :  { %v2198_v40 = vmul.f32 -1.442695, %v1895_v36  ;;  %v1896_v42 = vadd.f32 %v1845_v39, %v3681_v41  ;;  %v1898_v22 = vadd.f32 %v1888_v12, %v3684_v14 }
 0x842   :  { %v1847_v59 = vpop.f32.mrf.mxu0  ;;  %v1890_v3 = vpop.f32.mrf.mxu1 }
 0x843   :  { %2562 = vpow2.f32 %v2198_v40  ;;  %v2200_v55 = vmul.f32 -1.442695, %v1896_v42  ;;  %v1899_v38 = vadd.f32 %v1847_v59, %v3682_v5  ;;  %v2202_v16 = vmul.f32 -1.442695, %v1898_v22 }
 0x844   :  { %v1849_v58 = vpop.f32.mrf.mxu0  ;;  %v1892_v63 = vpop.f32.mrf.mxu1  ;;  %v1901_v49 = vadd.f32 %v1890_v3, %v3687_v13 }
 0x845   :  { %2564 = vpow2.f32 %v2200_v55  ;;  %v2199_v21 = vmul.f32 -1.442695, %v1899_v38  ;;  %v1900_v56 = vadd.f32 %v1849_v58, %v3683_v61  ;;  %v1902_v53 = vadd.f32 %v1892_v63, %v3686_v50 }
 0x847   :  { %2566 = vpow2.f32 %v2199_v21  ;;  %v2201_v10 = vmul.f32 -1.442695, %v1900_v56  ;;  %v2203_v0 = vmul.f32 -1.442695, %v1902_v53 }
 0x849   :  { %2568 = vpow2.f32 %v2201_v10 }
 0x84a   :  { %2570 = vtanh.f32 %v1897_v1 }
 0x84b   :  { %2572 = vpow2.f32 %v2202_v16 }
 0x850   :  { %v2563_v48 = vpop.eup %2562 }
 0x851   :  { %v1909_v62 = vadd.f32 1.0, %v2563_v48 }
 0x852   :  { %v2565_v47 = vpop.eup %2564 }
 0x853   :  { %2574 = vrcp.f32 %v1909_v62  ;;  %v1921_v6 = vadd.f32 1.0, %v2565_v47 }
 0x854   :  { %v2567_v9 = vpop.eup %2566  ;;  %2576 = vtanh.f32 %v1901_v49 }
 0x855   :  { %2578 = vrcp.f32 %v1921_v6  ;;  %v1910_v2 = vadd.f32 1.0, %v2567_v9 }
 0x856   :  { %v2569_v54 = vpop.eup %2568  ;;  %2580 = vpow2.f32 %v2203_v0 }
 0x857   :  { %2582 = vrcp.f32 %v1910_v2  ;;  %v1922_v17 = vadd.f32 1.0, %v2569_v54  ;;  %v2571_v19 = vpop.eup %2570 }
 0x858   :  { %v2573_v52 = vpop.eup %2572 }
 0x859   :  { %2584 = vrcp.f32 %v1922_v17  ;;  %v1935_v11 = vadd.f32 1.0, %v2573_v52 }
 0x85b   :  { %2586 = vrcp.f32 %v1935_v11 }
 0x860   :  { %v2575_v20 = vpop.eup %2574 }
 0x861   :  { %v2577_v23 = vpop.eup %2576  ;;  %v1943_v25 = vmul.f32 %v2575_v20, %v2571_v19 }
 0x862   :  { %v2579_v26 = vpop.eup %2578 }
 0x863   :  { %v2581_v28 = vpop.eup %2580  ;;  %v1941_v43 = vmul.f32 %v2579_v26, %v3563_v24  ;;  %v2204_v24 = vld [vmem:[%s3591_s5] ss:$0 sm:$0xff] }
 0x864   :  { %v2583_v7 = vpop.eup %2582  ;;  %v1936_v57 = vadd.f32 1.0, %v2581_v28 }
 0x865   :  { %v1945_v4 = vadd.f32 %v1943_v25, %v1941_v43  ;;  %v1944_v46 = vmul.f32 %v2583_v7, %v2577_v23 }
 0x866   :  { %v2585_v27 = vpop.eup %2584 }
 0x867   :  { %2588 = vtanh.f32 %v1945_v4  ;;  %v1942_v18 = vmul.f32 %v2585_v27, %v3566_v15 }
 0x868   :  { %2590 = vrcp.f32 %v1936_v57  ;;  %v2587_v45 = vpop.eup %2586 }
 0x869   :  { %v1946_v51 = vadd.f32 %v1944_v46, %v1942_v18 }
 0x86b   :  { %2592 = vtanh.f32 %v1946_v51 }
 0x874   :  { %v2589_v44 = vpop.eup %2588 }
 0x875   :  { %v1949_v29 = vmul.f32 %v2589_v44, %v2587_v45  ;;  %v2591_v30 = vpop.eup %2590 }
 0x878   :  { %v2593_v60 = vpop.eup %2592 }
 0x879   :  { %v1950_v31 = vmul.f32 %v2593_v60, %v2591_v30 }
 0x87b   :  { %v1958_v32 = vpack.c.bf16 %v1950_v31, %v1949_v29 }
 0x87d   :  { %2239 = vmatmul.mubr.bf16.vlgmr.msra.gmra.mxu0 %v1958_v32 }
 0x93d   :  { %v2064_v33 = vpop.f32.mrf.mxu0 }
 0x93e   :  { %v2065_v34 = vadd.f32 %v2204_v24, %v2064_v33 }
 0x93f   :  { %v2240_v35 = vpop.f32.mrf.mxu0 }
 0x940   :  { %2071 = vst [vmem:[#allocation14] sm:$0xff] %v2065_v34 }
 0x941   :  { %v2067_v15 = vpop.f32.mrf.mxu0 }
 0x942   :  { %v2068_v36 = vadd.f32 %v2204_v24, %v2067_v15 }
 0x943   :  { %v2241_v37 = vpop.f32.mrf.mxu0 }
 0x944   :  { %2072 = vst [vmem:[#allocation14 + $0x8] sm:$0xff] %v2068_v36 }
 0x945   :  { %2737 = shalt.err (!%p2734_p1)
}
 0x946   :  { %s2768_s26 = smov 128   ;;  %s2769_s5 = smov 8  }
 0x947   :  { %2084 = dma.vmem_to_hbm [thread:$0]  %s2079_s24, 256, %s3592_s6, [#allocation7], %s2768_s26, %s2768_s26, %s2769_s5  }
 0x948   :  { %2752 = dma.done.wait [#allocation7], 256  }
 0x949   :  { %2753 = vsyncadd [#allocation7], 4294967040 }
 0x94a   :  { %2088 = vsyncpa [#allocation6], 1 }
 0x94b   :  { %2089 = vsyncpa [#allocation9], 1 }
 0x94c   :  { %2090 = vsyncpa [#allocation12], 1 }
 0x94d   :  { %2091 = vsyncpa [#allocation7], 1 }

// kernel: tpu_custom_call.1
= control target key start
LH: loop header
LB: loop body
LE: loop exit
PB: predicated region body
PF: predicated region fallthrough
CT: control target
= control target key end

     0   :  { %11 = vsyncpa [#allocation6], 0  ;;  %s3586_s0 = inlined_call_operand.hbm [shape: bf16[8,16,32], index: 0, kind: input, shape index: {}]   ;;  %s3587_s1 = inlined_call_operand.hbm [shape: bf16[32,512], index: 1, kind: input, shape index: {}]   ;;  %s3588_s2 = inlined_call_operand.hbm [shape: f32[1,512], index: 2, kind: input, shape index: {}]   ;;  %s3589_s3 = inlined_call_operand.hbm [shape: bf16[128,512], index: 3, kind: input, shape index: {}]   ;;  %s3590_s4 = inlined_call_operand.hbm [shape: bf16[128,128], index: 4, kind: input, shape index: {}]   ;;  %s3591_s5 = inlined_call_operand.vmem [shape: f32[1,128], index: 5, kind: input, shape index: {}]   ;;  %s3592_s6 = inlined_call_operand.hbm [shape: f32[16,128], index: 6, kind: output, shape index: {}]  }
   0x1   :  { %12 = vsyncpa [#allocation9], 0 }
   0x2   :  { %13 = vsyncpa [#allocation12], 0 }
   0x3   :  { %14 = vsyncpa [#allocation7], 0  ;;  %s2754_s21 = smov [#allocation8]  }
   0x4   :  { %s32_s22 = sshll.u32 %s2754_s21, 4  ;;  %s33_s22 = int_to_ptr.vmem [resolvable:$true] %s32_s22 }
   0x5   :  { %s2634_s23 = scalar_lea.vmem %s33_s22, 1024  ;;  %p2639_p1 = scmp.lt.s32.totalorder %s33_s22, %s33_s22 }
   0x6   :  { %p2635_p0 = scmp.ne.s32.totalorder %s33_s22, %s2634_s23  ;;  %p2640_p2 = scmp.lt.s32.totalorder %s2634_s23, %s2634_s23 }
   0x8   :  { %p2641_p3 = por %p2640_p2, %p2639_p1 }
   0xa   :  { %p2642_p4 = pnand %p2641_p3, %p2635_p0 }
   0xc   :  { %2645 = shalt.err (!%p2642_p4)
}
   0xd   :  { %s2755_s24 = smov 256   ;;  %s2756_s25 = smov 16  }
   0xe   :  { %38 = dma.hbm_to_vmem [thread:$0]  %s3587_s1, 1024, %s33_s22, [#allocation9], %s2755_s24, %s2755_s24, %s2756_s25  }
   0xf   :  { %s2757_s28 = smov [#allocation11]   ;;  %s2758_s30 = smov [#allocation5]  }
  0x10   :  { %s54_s29 = sshll.u32 %s2757_s28, 4  ;;  %s20_s7 = sshll.u32 %s2758_s30, 4  ;;  %s55_s29 = int_to_ptr.vmem [resolvable:$true] %s54_s29  ;;  %s21_s7 = int_to_ptr.vmem [resolvable:$true] %s20_s7 }
  0x11   :  { %s2654_s8 = scalar_lea.vmem %s55_s29, 4096  ;;  %p2659_p6 = scmp.lt.s32.totalorder %s55_s29, %s55_s29 }
  0x12   :  { %p2655_p5 = scmp.ne.s32.totalorder %s55_s29, %s2654_s8  ;;  %p2660_p7 = scmp.lt.s32.totalorder %s2654_s8, %s2654_s8 }
  0x14   :  { %p2661_p8 = por %p2660_p7, %p2659_p6 }
  0x16   :  { %p2662_p9 = pnand %p2661_p8, %p2655_p5 }
  0x18   :  { %2665 = shalt.err (!%p2662_p9)
}
  0x19   :  { %60 = dma.hbm_to_vmem [thread:$0]  %s3589_s3, 4096, %s55_s29, [#allocation12], %s2755_s24, %s2755_s24, %s2756_s25  }
  0x1a   :  { %s2674_s11 = scalar_lea.vmem %s21_s7, 1024  ;;  %p2679_p11 = scmp.lt.s32.totalorder %s21_s7, %s21_s7 }
  0x1b   :  { %p2675_p10 = scmp.ne.s32.totalorder %s21_s7, %s2674_s11  ;;  %p2680_p12 = scmp.lt.s32.totalorder %s2674_s11, %s2674_s11 }
  0x1d   :  { %p2681_p13 = por %p2680_p12, %p2679_p11 }
  0x1f   :  { %p2682_p0 = pnand %p2681_p13, %p2675_p10 }
  0x21   :  { %2685 = shalt.err (!%p2682_p0)
}
  0x22   :  { %s2759_s1 = smov 64   ;;  %s2760_s12 = smov 4  }
  0x23   :  { %26 = dma.hbm_to_vmem [thread:$0]  %s3586_s0, 1024, %s21_s7, [#allocation6], %s2759_s1, %s2759_s1, %s2760_s12  }
  0x24   :  { %s2761_s15 = smov [#allocation10]   ;;  %s2762_s17 = smov [#allocation13]  }
  0x25   :  { %s45_s16 = sshll.u32 %s2761_s15, 4  ;;  %s66_s18 = sshll.u32 %s2762_s17, 4  ;;  %s46_s16 = int_to_ptr.vmem [resolvable:$true] %s45_s16  ;;  %s67_s18 = int_to_ptr.vmem [resolvable:$true] %s66_s18 }
  0x26   :  { %s2694_s3 = scalar_lea.vmem %s46_s16, 64  ;;  %p2699_p2 = scmp.lt.s32.totalorder %s46_s16, %s46_s16 }
  0x27   :  { %p2695_p1 = scmp.ne.s32.totalorder %s46_s16, %s2694_s3  ;;  %p2700_p3 = scmp.lt.s32.totalorder %s2694_s3, %s2694_s3 }
  0x29   :  { %p2701_p4 = por %p2700_p3, %p2699_p2 }
  0x2b   :  { %p2702_p5 = pnand %p2701_p4, %p2695_p1 }
  0x2d   :  { %2705 = shalt.err (!%p2702_p5)
}
  0x2e   :  { %48 = dma.hbm_to_vmem [thread:$0]  %s3588_s2, 64, %s46_s16, [#allocation9]  }
  0x2f   :  { %s2714_s21 = scalar_lea.vmem %s67_s18, 1024  ;;  %p2719_p7 = scmp.lt.s32.totalorder %s67_s18, %s67_s18 }
  0x30   :  { %p2715_p6 = scmp.ne.s32.totalorder %s67_s18, %s2714_s21  ;;  %p2720_p8 = scmp.lt.s32.totalorder %s2714_s21, %s2714_s21 }
  0x32   :  { %p2721_p9 = por %p2720_p8, %p2719_p7 }
  0x34   :  { %p2722_p10 = pnand %p2721_p9, %p2715_p6 }
  0x36   :  { %2725 = shalt.err (!%p2722_p10)
}
  0x37   :  { %72 = dma.hbm_to_vmem [thread:$0]  %s3590_s4, 1024, %s67_s18, [#allocation12], %s2759_s1, %s2759_s1, %s2760_s12  }
  0x38   :  { %2746 = dma.done.wait [#allocation6], 1024  }
  0x39   :  { %2747 = vsyncadd [#allocation6], 4294966272 }
  0x3a   :  { %2748 = dma.done.wait [#allocation9], 1088  }
  0x3b   :  { %2749 = vsyncadd [#allocation9], 4294966208 }
  0x3c   :  { %2750 = dma.done.wait [#allocation12], 5120  }
  0x3d   :  { %2751 = vsyncadd [#allocation12], 4294962176  ;;  %v3593_v0 = vmov 0   ;;  %v2262_v1 = vld [vmem:[#allocation8 + $0x24] ss:$16 sps:$4 sm:$0xff]   ;;  %vm225_vm0 = vcmask 261120   ;;  %v125_v50 = vlaneseq }
  0x3e   :  { %282 = vmatprep.mubr.bf16.mxu0 %v3593_v0  ;;  %342 = vmatprep.mubr.bf16.mxu1 %v3593_v0  ;;  %v2264_v2 = vld [vmem:[#allocation8 + $0x20] ss:$16 sps:$4 sm:$0xff]   ;;  %v2265_v3 = vld [vmem:[#allocation8 + $0x4] ss:$16 sps:$4 sm:$0xff]   ;;  %v2272_v6 = vld [vmem:[#allocation8 + $0x2c] ss:$16 sps:$4 sm:$0xff]  }
  0x3f   :  { %262 = vmatprep.subr.bf16.mxu0 %v2262_v1  ;;  %2242 = vmatprep.subr.bf16.mxu1 %v2262_v1  ;;  %v2267_v4 = vld [vmem:[#allocation8] ss:$16 sps:$4 sm:$0xff]   ;;  %v2270_v8 = vld [vmem:[#allocation8 + $0x28] ss:$16 sps:$4 sm:$0xff]   ;;  %v2277_v9 = vld [vmem:[#allocation8 + $0xc] ss:$16 sps:$4 sm:$0xff]  }
  0x40   :  { %263 = vmatpush1.bf16.msra.mxu0 %v2264_v2  ;;  %2244 = vmatpush1.bf16.msra.mxu1 %v2264_v2  ;;  %v2268_v5 = vld [vmem:[#allocation5] sm:$0xff]   ;;  %v2822_v7 = vld [vmem:[#allocation5 + $0x30] sm:$0xff]   ;;  %v2827_v10 = vld [vmem:[#allocation11 + $0xe4] ss:$16 sps:$4 sm:$0xff]   ;;  %v2764_v49 = vmov 0.0|0.0   ;;  %v126_v51 = vshrl.u32 %v125_v50, 7 }
  0x41   :  { %264 = vmatprep.subr.bf16.mxu0 %v2265_v3  ;;  %2243 = vmatprep.subr.bf16.mxu1 %v2265_v3  ;;  %v2829_v11 = vld [vmem:[#allocation11 + $0xe0] ss:$16 sps:$4 sm:$0xff]   ;;  %v2275_v12 = vld [vmem:[#allocation8 + $0x8] ss:$16 sps:$4 sm:$0xff]   ;;  %v2833_v14 = vld [vmem:[#allocation11 + $0xec] ss:$16 sps:$4 sm:$0xff]  }
  0x42   :  { %v2273_v13 = vld [vmem:[#allocation5 + $0x8] sm:$0xff]   ;;  %v2838_v16 = vld [vmem:[#allocation5 + $0x38] sm:$0xff]   ;;  %v2843_v17 = vld [vmem:[#allocation11 + $0xc0] ss:$16 sps:$4 sm:$0xff]   ;;  %v127_v52 = vsub.s32 0, %v126_v51  ;;  %v131_v54 = vsub.s32 1, %v126_v51 }
  0x43   :  { %v2836_v15 = vld [vmem:[#allocation11 + $0xc4] ss:$16 sps:$4 sm:$0xff]   ;;  %v2853_v19 = vld [vmem:[#allocation11 + $0xa0] ss:$16 sps:$4 sm:$0xff]   ;;  %v2858_v22 = vld [vmem:[#allocation11 + $0xe8] ss:$16 sps:$4 sm:$0xff]  }
  0x44   :  { %265 = vmatpush1.bf16.msra.mxu0 %v2267_v4  ;;  %2245 = vmatpush1.bf16.msra.mxu1 %v2267_v4  ;;  %v2845_v18 = vld [vmem:[#allocation11 + $0xa4] ss:$16 sps:$4 sm:$0xff]   ;;  %v2281_v21 = vld [vmem:[#allocation5 + $0x10] sm:$0xff]   ;;  %v2872_v26 = vld [vmem:[#allocation11 + $0xc8] ss:$16 sps:$4 sm:$0xff]   ;;  %vm2766_vm1 = vmmov 0  }
  0x45   :  { %375 = vmatprep.subr.bf16.mxu1 %v2272_v6  ;;  %745 = vmatprep.subr.bf16.mxu0 %v2827_v10  ;;  %v2856_v20 = vld [vmem:[#allocation11 + $0x84] ss:$16 sps:$4 sm:$0xff]   ;;  %v2860_v23 = vld [vmem:[#allocation11 + $0xcc] ss:$16 sps:$4 sm:$0xff]   ;;  %v2864_v24 = vld [vmem:[#allocation11 + $0x80] ss:$16 sps:$4 sm:$0xff]  }
  0x46   :  { %v2868_v25 = vld [vmem:[#allocation11 + $0x64] ss:$16 sps:$4 sm:$0xff]   ;;  %v2876_v27 = vld [vmem:[#allocation11 + $0xac] ss:$16 sps:$4 sm:$0xff]   ;;  %v2879_v28 = vld [vmem:[#allocation11 + $0x60] ss:$16 sps:$4 sm:$0xff]  }
  0x47   :  { %2108 = vmatmul.mubr.msk.bf16.vlgmr.msra.gmra.mxu0 %vm225_vm0, %v2268_v5  ;;  %2114 = vmatmul.mubr.msk.bf16.vlgmr.msra.gmra.mxu1 %vm225_vm0, %v2822_v7  ;;  %v2288_v29 = vld [vmem:[#allocation5 + $0x18] sm:$0xff]   ;;  %v2888_v32 = vld [vmem:[#allocation11 + $0x40] ss:$16 sps:$4 sm:$0xff]   ;;  %v2891_v33 = vld [vmem:[#allocation11 + $0x8c] ss:$16 sps:$4 sm:$0xff]   ;;  %s2767_s23 = smov [#allocation14]  }
  0x48   :  { %376 = vmatpush1.bf16.msra.mxu1 %v2270_v8  ;;  %292 = vmatprep.mubr.bf16.mxu0 %v3593_v0  ;;  %v2883_v30 = vld [vmem:[#allocation11 + $0xa8] ss:$16 sps:$4 sm:$0xff]   ;;  %v2885_v31 = vld [vmem:[#allocation11 + $0x44] ss:$16 sps:$4 sm:$0xff]   ;;  %v2901_v36 = vld [vmem:[#allocation11 + $0x20] ss:$16 sps:$4 sm:$0xff]  }
  0x49   :  { %352 = vmatprep.mubr.bf16.mxu1 %v3593_v0  ;;  %377 = vmatprep.subr.bf16.mxu1 %v2277_v9  ;;  %v2895_v34 = vld [vmem:[#allocation11 + $0x24] ss:$16 sps:$4 sm:$0xff]   ;;  %v2897_v35 = vld [vmem:[#allocation11 + $0x88] ss:$16 sps:$4 sm:$0xff]   ;;  %v2903_v37 = vld [vmem:[#allocation11 + $0x6c] ss:$16 sps:$4 sm:$0xff]  }
  0x4a   :  { %746 = vmatpush1.bf16.msra.mxu0 %v2829_v11  ;;  %v2298_v38 = vld [vmem:[#allocation5 + $0x20] sm:$0xff]   ;;  %v2911_v39 = vld [vmem:[#allocation11 + $0x4] ss:$16 sps:$4 sm:$0xff]   ;;  %v2913_v40 = vld [vmem:[#allocation11 + $0x68] ss:$16 sps:$4 sm:$0xff]   ;;  %s2078_s24 = sshll.u32 %s2767_s23, 4  ;;  %s2079_s24 = int_to_ptr.vmem [resolvable:$true] %s2078_s24 }
  0x4b   :  { %747 = vmatprep.subr.bf16.mxu0 %v2836_v15  ;;  %v2916_v41 = vld [vmem:[#allocation11] ss:$16 sps:$4 sm:$0xff]   ;;  %v2919_v42 = vld [vmem:[#allocation11 + $0x4c] ss:$16 sps:$4 sm:$0xff]   ;;  %v2927_v43 = vld [vmem:[#allocation11 + $0x48] ss:$16 sps:$4 sm:$0xff]   ;;  %p2731_p12 = scmp.lt.s32.totalorder %s2079_s24, %s2079_s24 }
  0x4c   :  { %378 = vmatpush1.bf16.msra.mxu1 %v2275_v12  ;;  %v2931_v44 = vld [vmem:[#allocation11 + $0x2c] ss:$16 sps:$4 sm:$0xff]   ;;  %v2308_v45 = vld [vmem:[#allocation5 + $0x28] sm:$0xff]   ;;  %s2726_s25 = scalar_lea.vmem %s2079_s24, 256 }
  0x4d   :  { %788 = vmatprep.subr.bf16.mxu1 %v2833_v14  ;;  %v2935_v46 = vld [vmem:[#allocation11 + $0x28] ss:$16 sps:$4 sm:$0xff]   ;;  %v2938_v47 = vld [vmem:[#allocation11 + $0xc] ss:$16 sps:$4 sm:$0xff]   ;;  %p2727_p11 = scmp.ne.s32.totalorder %s2079_s24, %s2726_s25  ;;  %p2732_p13 = scmp.lt.s32.totalorder %s2726_s25, %s2726_s25 }
  0x4e   :  { %748 = vmatpush1.bf16.msra.mxu0 %v2843_v17  ;;  %v2945_v48 = vld [vmem:[#allocation11 + $0x8] ss:$16 sps:$4 sm:$0xff]   ;;  %v123_v53 = vld [vmem:[#allocation10] sm:$0xf] }
  0x4f   :  { %2109 = vmatmul.mubr.msk.bf16.gmra.mxu0 %vm225_vm0, %v2273_v13  ;;  %2115 = vmatmul.mubr.msk.bf16.gmra.mxu1 %vm225_vm0, %v2838_v16  ;;  %v2994_v55 = vrot.slane %v123_v53, %v127_v52  ;;  %v2996_v56 = vrot.slane %v123_v53, %v131_v54  ;;  %p2733_p0 = por %p2732_p13, %p2731_p12 }
  0x50   :  { %302 = vmatprep.mubr.bf16.mxu0 %v3593_v0  ;;  %395 = vmatprep.mubr.bf16.mxu1 %v3593_v0 }
  0x51   :  { %749 = vmatprep.subr.bf16.mxu0 %v2845_v18  ;;  %p2734_p1 = pnand %p2733_p0, %p2727_p11 }
  0x52   :  { %750 = vmatpush1.bf16.msra.mxu0 %v2853_v19 }
  0x53   :  { %751 = vmatprep.subr.bf16.mxu0 %v2856_v20 }
  0x56   :  { %752 = vmatpush1.bf16.msra.mxu0 %v2864_v24 }
  0x57   :  { %2110 = vmatmul.mubr.msk.bf16.gmra.mxu0 %vm225_vm0, %v2281_v21  ;;  %2116 = vmatmul.mubr.msk.bf16.vlgmr.msra.gmra.mxu1 %vm225_vm0, %v2268_v5 }
  0x58   :  { %789 = vmatpush1.bf16.msra.mxu1 %v2858_v22  ;;  %312 = vmatprep.mubr.bf16.mxu0 %v3593_v0 }
  0x59   :  { %405 = vmatprep.mubr.bf16.mxu1 %v3593_v0  ;;  %790 = vmatprep.subr.bf16.mxu1 %v2860_v23 }
  0x5a   :  { %753 = vmatprep.subr.bf16.mxu0 %v2868_v25 }
  0x5b   :  { %754 = vmatpush1.bf16.msra.mxu0 %v2879_v28 }
  0x5c   :  { %791 = vmatpush1.bf16.msra.mxu1 %v2872_v26  ;;  %755 = vmatprep.subr.bf16.mxu0 %v2885_v31 }
  0x5d   :  { %792 = vmatprep.subr.bf16.mxu1 %v2876_v27 }
  0x5f   :  { %2111 = vmatmul.mubr.msk.bf16.gmra.mxu0 %vm225_vm0, %v2288_v29  ;;  %2117 = vmatmul.mubr.msk.bf16.gmra.mxu1 %vm225_vm0, %v2273_v13 }
  0x60   :  { %322 = vmatprep.mubr.bf16.mxu0 %v3593_v0  ;;  %415 = vmatprep.mubr.bf16.mxu1 %v3593_v0 }
  0x61   :  { %793 = vmatpush1.bf16.msra.mxu1 %v2883_v30  ;;  %756 = vmatpush1.bf16.msra.mxu0 %v2888_v32 }
  0x62   :  { %794 = vmatprep.subr.bf16.mxu1 %v2891_v33  ;;  %757 = vmatprep.subr.bf16.mxu0 %v2895_v34 }
  0x65   :  { %795 = vmatpush1.bf16.msra.mxu1 %v2897_v35  ;;  %758 = vmatpush1.bf16.msra.mxu0 %v2901_v36 }
  0x66   :  { %796 = vmatprep.subr.bf16.mxu1 %v2903_v37  ;;  %759 = vmatprep.subr.bf16.mxu0 %v2911_v39 }
  0x67   :  { %2112 = vmatmul.mubr.msk.bf16.gmra.mxu0 %vm225_vm0, %v2298_v38  ;;  %2118 = vmatmul.mubr.msk.bf16.gmra.mxu1 %vm225_vm0, %v2281_v21 }
  0x68   :  { %332 = vmatprep.mubr.bf16.mxu0 %v3593_v0  ;;  %425 = vmatprep.mubr.bf16.mxu1 %v3593_v0 }
  0x69   :  { %797 = vmatpush1.bf16.msra.mxu1 %v2913_v40  ;;  %760 = vmatpush1.bf16.msra.mxu0 %v2916_v41 }
  0x6a   :  { %798 = vmatprep.subr.bf16.mxu1 %v2919_v42  ;;  %897 = vmatprep.subr.bf16.mxu0 %v2827_v10 }
  0x6d   :  { %799 = vmatpush1.bf16.msra.mxu1 %v2927_v43 }
  0x6e   :  { %800 = vmatprep.subr.bf16.mxu1 %v2931_v44 }
  0x6f   :  { %2113 = vmatmul.mubr.msk.bf16.gmra.mxu0 %vm225_vm0, %v2308_v45  ;;  %2119 = vmatmul.mubr.msk.bf16.gmra.mxu1 %vm225_vm0, %v2288_v29 }
  0x70   :  { %435 = vmatprep.mubr.bf16.mxu1 %v3593_v0  ;;  %777 = vmatprep.mubr.bf16.mxu0 %v3593_v0 }
  0x71   :  { %801 = vmatpush1.bf16.msra.mxu1 %v2935_v46 }
  0x72   :  { %802 = vmatprep.subr.bf16.mxu1 %v2938_v47 }
  0x75   :  { %803 = vmatpush1.bf16.msra.mxu1 %v2945_v48 }
  0x76   :  { %940 = vmatprep.subr.bf16.mxu1 %v2833_v14 }
  0x77   :  { %2120 = vmatmul.mubr.msk.bf16.gmra.mxu1 %vm225_vm0, %v2298_v38  ;;  %778 = vmatmul.mubr.bf16.vlgmr.msra.gmra.mxu0 %v2764_v49 }
  0x78   :  { %445 = vmatprep.mubr.bf16.mxu1 %v3593_v0  ;;  %898 = vmatpush1.bf16.msra.mxu0 %v2829_v11 }
  0x79   :  { %899 = vmatprep.subr.bf16.mxu0 %v2836_v15  ;;  %929 = vmatprep.mubr.bf16.mxu0 %v3593_v0 }
  0x7c   :  { %900 = vmatpush1.bf16.msra.mxu0 %v2843_v17 }
  0x7d   :  { %901 = vmatprep.subr.bf16.mxu0 %v2845_v18 }
  0x7f   :  { %2121 = vmatmul.mubr.msk.bf16.gmra.mxu1 %vm225_vm0, %v2308_v45 }
  0x80   :  { %455 = vmatprep.mubr.bf16.mxu1 %v3593_v0  ;;  %902 = vmatpush1.bf16.msra.mxu0 %v2853_v19 }
  0x81   :  { %903 = vmatprep.subr.bf16.mxu0 %v2856_v20 }
  0x84   :  { %904 = vmatpush1.bf16.msra.mxu0 %v2864_v24 }
  0x85   :  { %905 = vmatprep.subr.bf16.mxu0 %v2868_v25 }
  0x87   :  { %2122 = vmatmul.mubr.msk.bf16.gmra.mxu1 %vm225_vm0, %v2822_v7 }
  0x88   :  { %465 = vmatprep.mubr.bf16.mxu1 %v3593_v0  ;;  %906 = vmatpush1.bf16.msra.mxu0 %v2879_v28 }
  0x89   :  { %907 = vmatprep.subr.bf16.mxu0 %v2885_v31 }
  0x8c   :  { %908 = vmatpush1.bf16.msra.mxu0 %v2888_v32 }
  0x8d   :  { %909 = vmatprep.subr.bf16.mxu0 %v2895_v34 }
  0x8f   :  { %2123 = vmatmul.mubr.msk.bf16.gmra.mxu1 %vm225_vm0, %v2838_v16 }
  0x90   :  { %820 = vmatprep.mubr.bf16.mxu1 %v3593_v0  ;;  %910 = vmatpush1.bf16.msra.mxu0 %v2901_v36 }
  0x91   :  { %911 = vmatprep.subr.bf16.mxu0 %v2911_v39 }
  0x94   :  { %912 = vmatpush1.bf16.msra.mxu0 %v2916_v41 }
  0x95   :  { %1049 = vmatprep.subr.bf16.mxu0 %v2827_v10 }
  0x97   :  { %821 = vmatmul.mubr.bf16.vlgmr.msra.gmra.mxu1 %v2764_v49 }
  0x98   :  { %941 = vmatpush1.bf16.msra.mxu1 %v2858_v22  ;;  %972 = vmatprep.mubr.bf16.mxu1 %v3593_v0 }
  0x99   :  { %942 = vmatprep.subr.bf16.mxu1 %v2860_v23 }
  0x9c   :  { %943 = vmatpush1.bf16.msra.mxu1 %v2872_v26 }
  0x9d   :  { %944 = vmatprep.subr.bf16.mxu1 %v2876_v27 }
  0xa0   :  { %945 = vmatpush1.bf16.msra.mxu1 %v2883_v30 }
  0xa1   :  { %946 = vmatprep.subr.bf16.mxu1 %v2891_v33 }
  0xa4   :  { %947 = vmatpush1.bf16.msra.mxu1 %v2897_v35 }
  0xa5   :  { %948 = vmatprep.subr.bf16.mxu1 %v2903_v37 }
  0xa8   :  { %949 = vmatpush1.bf16.msra.mxu1 %v2913_v40 }
  0xa9   :  { %950 = vmatprep.subr.bf16.mxu1 %v2919_v42 }
  0xac   :  { %951 = vmatpush1.bf16.msra.mxu1 %v2927_v43 }
  0xad   :  { %952 = vmatprep.subr.bf16.mxu1 %v2931_v44 }
  0xb0   :  { %953 = vmatpush1.bf16.msra.mxu1 %v2935_v46 }
  0xb1   :  { %954 = vmatprep.subr.bf16.mxu1 %v2938_v47 }
  0xb4   :  { %955 = vmatpush1.bf16.msra.mxu1 %v2945_v48 }
  0xb5   :  { %1092 = vmatprep.subr.bf16.mxu1 %v2833_v14 }
 0x107   :  { %v2998_v57 = vpop.f32.mrf.mxu0  ;;  %v344_v58 = vpop.f32.mrf.mxu1 }
 0x108   :  { %v3001_v59 = vadd.f32 %v344_v58, %v2994_v55 }
 0x109   :  { %v3003_v60 = vpop.f32.mrf.mxu0  ;;  %v346_v61 = vpop.f32.mrf.mxu1 }
 0x10a   :  { %3595 = vst [vmem:[#allocation19_spill] sm:$0xff] %v3001_v59  ;;  %v3006_v62 = vadd.f32 %v346_v61, %v2996_v56 }
 0x10b   :  { %v3008_v63 = vpop.f32.mrf.mxu0  ;;  %v348_v1 = vpop.f32.mrf.mxu1 }
 0x10c   :  { %3596 = vst [vmem:[#allocation20_spill] sm:$0xff] %v3006_v62  ;;  %v3011_v2 = vadd.f32 %v348_v1, %v2994_v55 }
 0x10d   :  { %v3013_v3 = vpop.f32.mrf.mxu0  ;;  %v350_v4 = vpop.f32.mrf.mxu1 }
 0x10e   :  { %3597 = vst [vmem:[#allocation21_spill] sm:$0xff] %v3011_v2  ;;  %v3016_v5 = vadd.f32 %v350_v4, %v2996_v56 }
 0x10f   :  { %v294_v6 = vpop.f32.mrf.mxu0  ;;  %v354_v7 = vpop.f32.mrf.mxu1 }
 0x110   :  { %3598 = vst [vmem:[#allocation22_spill] sm:$0xff] %v3016_v5  ;;  %v3019_v8 = vadd.f32 %v294_v6, %v2994_v55  ;;  %v3022_v9 = vadd.f32 %v354_v7, %v2994_v55 }
 0x111   :  { %v296_v12 = vpop.f32.mrf.mxu0  ;;  %v356_v13 = vpop.f32.mrf.mxu1 }
 0x112   :  { %3599 = vst [vmem:[#allocation23_spill] sm:$0xff] %v3022_v9  ;;  %v3025_v16 = vadd.f32 %v296_v12, %v2996_v56  ;;  %v3028_v21 = vadd.f32 %v356_v13, %v2996_v56  ;;  %v135_v12 = vsub.s32 2, %v126_v51 }
 0x113   :  { %v298_v29 = vpop.f32.mrf.mxu0  ;;  %v358_v38 = vpop.f32.mrf.mxu1 }
 0x114   :  { %3600 = vst [vmem:[#allocation24_spill] sm:$0xff] %v3028_v21  ;;  %v3031_v45 = vadd.f32 %v298_v29, %v2994_v55  ;;  %v3034_v49 = vadd.f32 %v358_v38, %v2994_v55 }
 0x115   :  { %v300_v50 = vpop.f32.mrf.mxu0  ;;  %v360_v52 = vpop.f32.mrf.mxu1 }
 0x116   :  { %3601 = vst [vmem:[#allocation25_spill] sm:$0xff] %v3034_v49  ;;  %v3037_v54 = vadd.f32 %v300_v50, %v2996_v56  ;;  %v3040_v58 = vadd.f32 %v360_v52, %v2996_v56  ;;  %v139_v50 = vsub.s32 3, %v126_v51  ;;  %v3059_v49 = vrot.slane %v123_v53, %v135_v12 }
 0x117   :  { %v304_v61 = vpop.f32.mrf.mxu0  ;;  %v3042_v1 = vpop.f32.mrf.mxu1 }
 0x118   :  { %3602 = vst [vmem:[#allocation26_spill] sm:$0xff] %v3040_v58  ;;  %v3045_v4 = vadd.f32 %v304_v61, %v2994_v55  ;;  %v3064_v5 = vrot.slane %v123_v53, %v139_v50 }
 0x119   :  { %v306_v6 = vpop.f32.mrf.mxu0  ;;  %v3047_v7 = vpop.f32.mrf.mxu1 }
 0x11a   :  { %3603 = vst [vmem:[#allocation27_spill] sm:$0xff] %v3045_v4  ;;  %v3050_v13 = vadd.f32 %v306_v6, %v2996_v56 }
 0x11b   :  { %v308_v29 = vpop.f32.mrf.mxu0  ;;  %v3052_v38 = vpop.f32.mrf.mxu1 }
 0x11c   :  { %3604 = vst [vmem:[#allocation28_spill] sm:$0xff] %v3050_v13  ;;  %v3055_v52 = vadd.f32 %v308_v29, %v2994_v55 }
 0x11d   :  { %v310_v0 = vpop.f32.mrf.mxu0  ;;  %v3057_v58 = vpop.f32.mrf.mxu1 }
 0x11e   :  { %3605 = vst [vmem:[#allocation29_spill] sm:$0xff] %v3055_v52  ;;  %v3062_v61 = vadd.f32 %v310_v0, %v2996_v56 }
 0x11f   :  { %v314_v21 = vpop.f32.mrf.mxu0  ;;  %v407_v9 = vpop.f32.mrf.mxu1 }
 0x120   :  { %3606 = vst [vmem:[#allocation30_spill] sm:$0xff] %v3062_v61  ;;  %v3067_v6 = vadd.f32 %v314_v21, %v2994_v55  ;;  %v3070_v51 = vadd.f32 %v407_v9, %v3059_v49 }
 0x121   :  { %v316_v29 = vpop.f32.mrf.mxu0  ;;  %v409_v2 = vpop.f32.mrf.mxu1 }
 0x122   :  { %3607 = vst [vmem:[#allocation31_spill] sm:$0xff] %v3067_v6  ;;  %3608 = vst [vmem:[#allocation32_spill] sm:$0xff] %v3070_v51  ;;  %v3073_v62 = vadd.f32 %v316_v29, %v2996_v56  ;;  %v3076_v12 = vadd.f32 %v409_v2, %v3064_v5 }
 0x123   :  { %v318_v0 = vpop.f32.mrf.mxu0  ;;  %v411_v59 = vpop.f32.mrf.mxu1 }
 0x124   :  { %3609 = vst [vmem:[#allocation33_spill] sm:$0xff] %v3073_v62  ;;  %v3079_v61 = vadd.f32 %v318_v0, %v2994_v55  ;;  %v3082_v53 = vadd.f32 %v411_v59, %v3059_v49 }
 0x125   :  { %v320_v21 = vpop.f32.mrf.mxu0  ;;  %v413_v50 = vpop.f32.mrf.mxu1 }
 0x126   :  { %3610 = vst [vmem:[#allocation34_spill] sm:$0xff] %v3079_v61  ;;  %3611 = vst [vmem:[#allocation35_spill] sm:$0xff] %v3082_v53  ;;  %v3085_v9 = vadd.f32 %v320_v21, %v2996_v56  ;;  %v3088_v6 = vadd.f32 %v413_v50, %v3064_v5 }
 0x127   :  { %v324_v29 = vpop.f32.mrf.mxu0  ;;  %v417_v62 = vpop.f32.mrf.mxu1 }
 0x128   :  { %3612 = vst [vmem:[#allocation36_spill] sm:$0xff] %v3085_v9  ;;  %3613 = vst [vmem:[#allocation37_spill] sm:$0xff] %v3088_v6  ;;  %v3091_v2 = vadd.f32 %v324_v29, %v2994_v55  ;;  %v3094_v52 = vadd.f32 %v417_v62, %v3059_v49 }
 0x129   :  { %v326_v0 = vpop.f32.mrf.mxu0  ;;  %v419_v61 = vpop.f32.mrf.mxu1 }
 0x12a   :  { %3614 = vst [vmem:[#allocation38_spill] sm:$0xff] %v3091_v2  ;;  %3615 = vst [vmem:[#allocation39_spill] sm:$0xff] %v3094_v52  ;;  %v3097_v59 = vadd.f32 %v326_v0, %v2996_v56  ;;  %v3100_v13 = vadd.f32 %v419_v61, %v3064_v5 }
 0x12b   :  { %v328_v21 = vpop.f32.mrf.mxu0  ;;  %v421_v9 = vpop.f32.mrf.mxu1 }
 0x12c   :  { %3616 = vst [vmem:[#allocation40_spill] sm:$0xff] %v3097_v59  ;;  %3617 = vst [vmem:[#allocation41_spill] sm:$0xff] %v3100_v13  ;;  %v3103_v50 = vadd.f32 %v328_v21, %v2994_v55  ;;  %v3106_v4 = vadd.f32 %v421_v9, %v3059_v49 }
 0x12d   :  { %v330_v29 = vpop.f32.mrf.mxu0  ;;  %v423_v2 = vpop.f32.mrf.mxu1 }
 0x12e   :  { %3618 = vst [vmem:[#allocation42_spill] sm:$0xff] %v3103_v50  ;;  %3619 = vst [vmem:[#allocation43_spill] sm:$0xff] %v3106_v4  ;;  %v3109_v62 = vadd.f32 %v330_v29, %v2996_v56  ;;  %v3112_v52 = vadd.f32 %v423_v2, %v3064_v5 }
 0x12f   :  { %v334_v0 = vpop.f32.mrf.mxu0  ;;  %v427_v59 = vpop.f32.mrf.mxu1 }
 0x130   :  { %3620 = vst [vmem:[#allocation44_spill] sm:$0xff] %v3109_v62  ;;  %3621 = vst [vmem:[#allocation45_spill] sm:$0xff] %v3112_v52  ;;  %v3115_v61 = vadd.f32 %v334_v0, %v2994_v55  ;;  %v3118_v13 = vadd.f32 %v427_v59, %v3059_v49 }
 0x131   :  { %v336_v21 = vpop.f32.mrf.mxu0  ;;  %v429_v50 = vpop.f32.mrf.mxu1 }
 0x132   :  { %3622 = vst [vmem:[#allocation46_spill] sm:$0xff] %v3115_v61  ;;  %3623 = vst [vmem:[#allocation47_spill] sm:$0xff] %v3118_v13  ;;  %v3121_v9 = vadd.f32 %v336_v21, %v2996_v56  ;;  %v3124_v4 = vadd.f32 %v429_v50, %v3064_v5 }
 0x133   :  { %v338_v29 = vpop.f32.mrf.mxu0  ;;  %v431_v62 = vpop.f32.mrf.mxu1 }
 0x134   :  { %3624 = vst [vmem:[#allocation48_spill] sm:$0xff] %v3121_v9  ;;  %3625 = vst [vmem:[#allocation49_spill] sm:$0xff] %v3124_v4  ;;  %v3127_v2 = vadd.f32 %v338_v29, %v2994_v55  ;;  %v3130_v52 = vadd.f32 %v431_v62, %v3059_v49  ;;  %v285_v29 = vadd.f32 %v2998_v57, %v2994_v55 }
 0x135   :  { %v340_v0 = vpop.f32.mrf.mxu0  ;;  %v433_v61 = vpop.f32.mrf.mxu1 }
 0x136   :  { %3626 = vst [vmem:[#allocation50_spill] sm:$0xff] %v3127_v2  ;;  %3627 = vst [vmem:[#allocation51_spill] sm:$0xff] %v3130_v52  ;;  %v3133_v59 = vadd.f32 %v340_v0, %v2996_v56  ;;  %v3136_v13 = vadd.f32 %v433_v61, %v3064_v5  ;;  %v287_v0 = vadd.f32 %v3003_v60, %v2996_v56 }
 0x137   :  { %v437_v21 = vpop.f32.mrf.mxu1  ;;  %v779_v9 = vpop.f32.mrf.mxu0 }
 0x138   :  { %3628 = vst [vmem:[#allocation52_spill] sm:$0xff] %v3133_v59  ;;  %3629 = vst [vmem:[#allocation53_spill] sm:$0xff] %v3136_v13  ;;  %v3139_v50 = vadd.f32 %v437_v21, %v3059_v49  ;;  %v831_v61 = vadd.f32 %v779_v9, %v285_v29 }
 0x139   :  { %v439_v4 = vpop.f32.mrf.mxu1  ;;  %v781_v53 = vpop.f32.mrf.mxu0 }
 0x13a   :  { %3630 = vst [vmem:[#allocation54_spill] sm:$0xff] %v3139_v50  ;;  %v3144_v62 = vadd.f32 %v439_v4, %v3064_v5  ;;  %v832_v13 = vadd.f32 %v781_v53, %v287_v0  ;;  %v289_v50 = vadd.f32 %v3008_v63, %v2994_v55  ;;  %v291_v4 = vadd.f32 %v3013_v3, %v2996_v56 }
 0x13b   :  { %v441_v59 = vpop.f32.mrf.mxu1  ;;  %v783_v2 = vpop.f32.mrf.mxu0  ;;  %v2156_v60 = vmul.f32 -1.442695, %v831_v61 }
 0x13c   :  { %3631 = vst [vmem:[#allocation55_spill] sm:$0xff] %v3144_v62  ;;  %v3149_v52 = vadd.f32 %v441_v59, %v3059_v49  ;;  %v835_v51 = vadd.f32 %v783_v2, %v289_v50  ;;  %v2158_v59 = vmul.f32 -1.442695, %v832_v13 }
 0x13d   :  { %v443_v21 = vpop.f32.mrf.mxu1  ;;  %v785_v57 = vpop.f32.mrf.mxu0  ;;  %2338 = vpow2.f32 %v2156_v60 }
 0x13e   :  { %v3154_v6 = vadd.f32 %v443_v21, %v3064_v5  ;;  %v836_v29 = vadd.f32 %v785_v57, %v291_v4  ;;  %v2157_v63 = vmul.f32 -1.442695, %v835_v51  ;;  %2340 = vpow2.f32 %v2158_v59 }
 0x13f   :  { %v447_v62 = vpop.f32.mrf.mxu1 }
 0x140   :  { %v3159_v9 = vadd.f32 %v447_v62, %v3059_v49  ;;  %v2159_v56 = vmul.f32 -1.442695, %v836_v29  ;;  %2342 = vpow2.f32 %v2157_v63 }
 0x141   :  { %v449_v53 = vpop.f32.mrf.mxu1 }
 0x142   :  { %v3162_v0 = vadd.f32 %v449_v53, %v3064_v5  ;;  %2344 = vpow2.f32 %v2159_v56 }
 0x143   :  { %v451_v55 = vpop.f32.mrf.mxu1 }
 0x144   :  { %v3165_v21 = vadd.f32 %v451_v55, %v3059_v49 }
 0x145   :  { %v453_v3 = vpop.f32.mrf.mxu1 }
 0x146   :  { %3632 = vst [vmem:[#allocation56_spill] sm:$0xff] %v3165_v21  ;;  %v3168_v2 = vadd.f32 %v453_v3, %v3064_v5 }
 0x147   :  { %v457_v50 = vpop.f32.mrf.mxu1 }
 0x148   :  { %v3171_v13 = vadd.f32 %v457_v50, %v3059_v49 }
 0x149   :  { %v459_v62 = vpop.f32.mrf.mxu1 }
 0x14a   :  { %3633 = vst [vmem:[#allocation57_spill] sm:$0xff] %v3171_v13  ;;  %v3174_v61 = vadd.f32 %v459_v62, %v3064_v5  ;;  %v2339_v53 = vpop.eup %2338 }
 0x14b   :  { %v461_v51 = vpop.f32.mrf.mxu1  ;;  %v2341_v63 = vpop.eup %2340  ;;  %v845_v50 = vadd.f32 1.0, %v2339_v53 }
 0x14c   :  { %3634 = vst [vmem:[#allocation58_spill] sm:$0xff] %v3174_v61  ;;  %v3177_v57 = vadd.f32 %v461_v51, %v3059_v49 }
 0x14d   :  { %v463_v4 = vpop.f32.mrf.mxu1  ;;  %v2343_v51 = vpop.eup %2342  ;;  %2346 = vrcp.f32 %v845_v50 }
 0x14e   :  { %3635 = vst [vmem:[#allocation59_spill] sm:$0xff] %v3177_v57  ;;  %v3180_v60 = vadd.f32 %v463_v4, %v3064_v5  ;;  %v857_v57 = vadd.f32 1.0, %v2341_v63  ;;  %v402_v63 = vadd.f32 %v3052_v38, %v3059_v49 }
 0x14f   :  { %v467_v59 = vpop.f32.mrf.mxu1  ;;  %v2345_v4 = vpop.eup %2344 }
 0x150   :  { %3636 = vst [vmem:[#allocation60_spill] sm:$0xff] %v3180_v60  ;;  %v3183_v29 = vadd.f32 %v467_v59, %v3059_v49  ;;  %v398_v60 = vadd.f32 %v3042_v1, %v3059_v49  ;;  %2348 = vrcp.f32 %v857_v57  ;;  %v404_v1 = vadd.f32 %v3057_v58, %v3064_v5 }
 0x151   :  { %v469_v55 = vpop.f32.mrf.mxu1 }
 0x152   :  { %3637 = vst [vmem:[#allocation61_spill] sm:$0xff] %v3183_v29  ;;  %v3186_v56 = vadd.f32 %v469_v55, %v3064_v5  ;;  %v400_v55 = vadd.f32 %v3047_v7, %v3064_v5 }
 0x153   :  { %v471_v3 = vpop.f32.mrf.mxu1 }
 0x154   :  { %3638 = vst [vmem:[#allocation62_spill] sm:$0xff] %v3186_v56  ;;  %v3189_v62 = vadd.f32 %v471_v3, %v3059_v49  ;;  %v846_v56 = vadd.f32 1.0, %v2343_v51  ;;  %v858_v3 = vadd.f32 1.0, %v2345_v4 }
 0x155   :  { %v473_v13 = vpop.f32.mrf.mxu1 }
 0x156   :  { %3639 = vst [vmem:[#allocation63_spill] sm:$0xff] %v3189_v62  ;;  %v3194_v59 = vadd.f32 %v473_v13, %v3064_v5 }
 0x157   :  { %v822_v29 = vpop.f32.mrf.mxu1 }
 0x158   :  { %3640 = vst [vmem:[#allocation64_spill] sm:$0xff] %v3194_v59  ;;  %v833_v53 = vadd.f32 %v822_v29, %v398_v60 }
 0x159   :  { %v824_v62 = vpop.f32.mrf.mxu1 }
 0x15a   :  { %2350 = vtanh.f32 %v833_v53  ;;  %v834_v61 = vadd.f32 %v824_v62, %v400_v55  ;;  %v2347_v60 = vpop.eup %2346 }
 0x15b   :  { %v826_v21 = vpop.f32.mrf.mxu1  ;;  %2352 = vrcp.f32 %v846_v56 }
 0x15c   :  { %v2160_v13 = vmul.f32 -1.442695, %v834_v61  ;;  %v837_v59 = vadd.f32 %v826_v21, %v402_v63  ;;  %2354 = vrcp.f32 %v858_v3 }
 0x15d   :  { %v828_v7 = vpop.f32.mrf.mxu1  ;;  %v2349_v29 = vpop.eup %2348 }
 0x15e   :  { %2356 = vpow2.f32 %v2160_v13  ;;  %v838_v50 = vadd.f32 %v828_v7, %v404_v1  ;;  %v877_v62 = vmul.f32 0.0, %v2349_v29  ;;  %v3641_v29 = vmov 0  }
 0x15f   :  { %2358 = vtanh.f32 %v837_v59 }
 0x160   :  { %v2161_v57 = vmul.f32 -1.442695, %v838_v50 }
 0x162   :  { %2360 = vpow2.f32 %v2161_v57 }
 0x167   :  { %v2351_v51 = vpop.eup %2350 }
 0x168   :  { %v879_v49 = vmul.f32 %v2351_v51, %v2347_v60  ;;  %v2353_v38 = vpop.eup %2352 }
 0x169   :  { %v2355_v4 = vpop.eup %2354 }
 0x16a   :  { %v3202_v53 = vadd.f32 %v879_v49, %v877_v62  ;;  %v878_v21 = vmul.f32 0.0, %v2355_v4 }
 0x16b   :  { %v2357_v55 = vpop.eup %2356 }
 0x16c   :  { %v2359_v5 = vpop.eup %2358  ;;  %v871_v58 = vadd.f32 1.0, %v2357_v55  ;;  %2362 = vtanh.f32 %v3202_v53 }
 0x16d   :  { %v880_v61 = vmul.f32 %v2359_v5, %v2353_v38 }
 0x16e   :  { %2364 = vrcp.f32 %v871_v58 }
 0x16f   :  { %v2361_v56 = vpop.eup %2360  ;;  %v3205_v59 = vadd.f32 %v880_v61, %v878_v21 }
 0x170   :  { %v872_v3 = vadd.f32 1.0, %v2361_v56 }
 0x171   :  { %2366 = vtanh.f32 %v3205_v59 }
 0x172   :  { %2368 = vrcp.f32 %v872_v3 }
 0x179   :  { %v2363_v63 = vpop.eup %2362 }
 0x17b   :  { %v2365_v1 = vpop.eup %2364 }
 0x17c   :  { %v885_v50 = vmul.f32 %v2365_v1, %v2363_v63 }
 0x17e   :  { %v2367_v13 = vpop.eup %2366 }
 0x17f   :  { %v2369_v7 = vpop.eup %2368 }
 0x180   :  { %v886_v57 = vmul.f32 %v2369_v7, %v2367_v13  ;;  %v3642_v13 = vld [vmem:[#allocation32_spill] sm:$0xff] }
 0x182   :  { %v896_v60 = vpack.c.bf16 %v886_v57, %v885_v50  ;;  %v3643_v50 = vld [vmem:[#allocation37_spill] sm:$0xff] }
 0x184   :  { %930 = vmatmul.mubr.bf16.vlgmr.msra.gmra.mxu0 %v896_v60  ;;  %973 = vmatmul.mubr.bf16.vlgmr.msra.gmra.mxu1 %v896_v60 }
 0x185   :  { %1050 = vmatpush1.bf16.msra.mxu0 %v2829_v11  ;;  %1093 = vmatpush1.bf16.msra.mxu1 %v2858_v22 }
 0x186   :  { %1051 = vmatprep.subr.bf16.mxu0 %v2836_v15  ;;  %1094 = vmatprep.subr.bf16.mxu1 %v2860_v23 }
 0x187   :  { %1081 = vmatprep.mubr.bf16.mxu0 %v3641_v29  ;;  %1124 = vmatprep.mubr.bf16.mxu1 %v3641_v29 }
 0x189   :  { %1052 = vmatpush1.bf16.msra.mxu0 %v2843_v17  ;;  %1095 = vmatpush1.bf16.msra.mxu1 %v2872_v26 }
 0x18a   :  { %1053 = vmatprep.subr.bf16.mxu0 %v2845_v18  ;;  %1096 = vmatprep.subr.bf16.mxu1 %v2876_v27 }
 0x18d   :  { %1054 = vmatpush1.bf16.msra.mxu0 %v2853_v19  ;;  %1097 = vmatpush1.bf16.msra.mxu1 %v2883_v30 }
 0x18e   :  { %1055 = vmatprep.subr.bf16.mxu0 %v2856_v20  ;;  %1098 = vmatprep.subr.bf16.mxu1 %v2891_v33 }
 0x191   :  { %1056 = vmatpush1.bf16.msra.mxu0 %v2864_v24  ;;  %1099 = vmatpush1.bf16.msra.mxu1 %v2897_v35 }
 0x192   :  { %1057 = vmatprep.subr.bf16.mxu0 %v2868_v25  ;;  %1100 = vmatprep.subr.bf16.mxu1 %v2903_v37 }
 0x195   :  { %1058 = vmatpush1.bf16.msra.mxu0 %v2879_v28  ;;  %1101 = vmatpush1.bf16.msra.mxu1 %v2913_v40 }
 0x196   :  { %1059 = vmatprep.subr.bf16.mxu0 %v2885_v31  ;;  %1102 = vmatprep.subr.bf16.mxu1 %v2919_v42 }
 0x199   :  { %1060 = vmatpush1.bf16.msra.mxu0 %v2888_v32  ;;  %1103 = vmatpush1.bf16.msra.mxu1 %v2927_v43 }
 0x19a   :  { %1061 = vmatprep.subr.bf16.mxu0 %v2895_v34  ;;  %1104 = vmatprep.subr.bf16.mxu1 %v2931_v44 }
 0x19d   :  { %1062 = vmatpush1.bf16.msra.mxu0 %v2901_v36  ;;  %1105 = vmatpush1.bf16.msra.mxu1 %v2935_v46 }
 0x19e   :  { %1063 = vmatprep.subr.bf16.mxu0 %v2911_v39  ;;  %1106 = vmatprep.subr.bf16.mxu1 %v2938_v47 }
 0x1a1   :  { %1064 = vmatpush1.bf16.msra.mxu0 %v2916_v41  ;;  %1107 = vmatpush1.bf16.msra.mxu1 %v2945_v48 }
 0x1a2   :  { %1201 = vmatprep.subr.bf16.mxu0 %v2827_v10  ;;  %1244 = vmatprep.subr.bf16.mxu1 %v2833_v14 }
 0x244   :  { %v931_v51 = vpop.f32.mrf.mxu0  ;;  %v974_v38 = vpop.f32.mrf.mxu1 }
 0x245   :  { %v983_v49 = vadd.f32 %v931_v51, %v3019_v8  ;;  %v3644_v51 = vld [vmem:[#allocation35_spill] sm:$0xff] }
 0x246   :  { %v933_v62 = vpop.f32.mrf.mxu0  ;;  %v976_v21 = vpop.f32.mrf.mxu1 }
 0x247   :  { %v2162_v4 = vmul.f32 -1.442695, %v983_v49  ;;  %v984_v55 = vadd.f32 %v933_v62, %v3025_v16  ;;  %v986_v8 = vadd.f32 %v976_v21, %v3076_v12  ;;  %v985_v16 = vadd.f32 %v974_v38, %v3642_v13 }
 0x248   :  { %v935_v5 = vpop.f32.mrf.mxu0  ;;  %v978_v14 = vpop.f32.mrf.mxu1 }
 0x249   :  { %2370 = vpow2.f32 %v2162_v4  ;;  %v2164_v58 = vmul.f32 -1.442695, %v984_v55  ;;  %v987_v61 = vadd.f32 %v935_v5, %v3031_v45  ;;  %v2166_v7 = vmul.f32 -1.442695, %v986_v8 }
 0x24a   :  { %v937_v56 = vpop.f32.mrf.mxu0  ;;  %v980_v1 = vpop.f32.mrf.mxu1  ;;  %v989_v45 = vadd.f32 %v978_v14, %v3644_v51 }
 0x24b   :  { %2372 = vpow2.f32 %v2164_v58  ;;  %v2163_v3 = vmul.f32 -1.442695, %v987_v61  ;;  %v988_v10 = vadd.f32 %v937_v56, %v3037_v54  ;;  %v990_v57 = vadd.f32 %v980_v1, %v3643_v50 }
 0x24d   :  { %2374 = vpow2.f32 %v2163_v3  ;;  %v2165_v63 = vmul.f32 -1.442695, %v988_v10  ;;  %v2167_v54 = vmul.f32 -1.442695, %v990_v57 }
 0x24f   :  { %2376 = vpow2.f32 %v2165_v63 }
 0x250   :  { %2378 = vtanh.f32 %v985_v16 }
 0x251   :  { %2380 = vpow2.f32 %v2166_v7 }
 0x256   :  { %v2371_v60 = vpop.eup %2370 }
 0x257   :  { %v997_v49 = vadd.f32 1.0, %v2371_v60 }
 0x258   :  { %v2373_v62 = vpop.eup %2372 }
 0x259   :  { %2382 = vrcp.f32 %v997_v49  ;;  %v1009_v4 = vadd.f32 1.0, %v2373_v62 }
 0x25a   :  { %v2375_v55 = vpop.eup %2374  ;;  %2384 = vtanh.f32 %v989_v45 }
 0x25b   :  { %2386 = vrcp.f32 %v1009_v4  ;;  %v998_v12 = vadd.f32 1.0, %v2375_v55 }
 0x25c   :  { %v2377_v5 = vpop.eup %2376  ;;  %2388 = vpow2.f32 %v2167_v54 }
 0x25d   :  { %2390 = vrcp.f32 %v998_v12  ;;  %v1010_v38 = vadd.f32 1.0, %v2377_v5  ;;  %v2379_v58 = vpop.eup %2378  ;;  %v3651_v12 = vld [vmem:[#allocation45_spill] sm:$0xff] }
 0x25e   :  { %v2381_v21 = vpop.eup %2380 }
 0x25f   :  { %2392 = vrcp.f32 %v1010_v38  ;;  %v1023_v1 = vadd.f32 1.0, %v2381_v21 }
 0x261   :  { %2394 = vrcp.f32 %v1023_v1 }
 0x266   :  { %v2383_v61 = vpop.eup %2382 }
 0x267   :  { %v2385_v56 = vpop.eup %2384  ;;  %v1031_v3 = vmul.f32 %v2383_v61, %v2379_v58  ;;  %v3652_v58 = vld [vmem:[#allocation43_spill] sm:$0xff] }
 0x268   :  { %v2387_v10 = vpop.eup %2386 }
 0x269   :  { %v2389_v14 = vpop.eup %2388  ;;  %v1029_v63 = vmul.f32 %v2387_v10, %v3202_v53 }
 0x26a   :  { %v2391_v8 = vpop.eup %2390  ;;  %v1024_v50 = vadd.f32 1.0, %v2389_v14 }
 0x26b   :  { %v3251_v13 = vadd.f32 %v1031_v3, %v1029_v63  ;;  %v1032_v16 = vmul.f32 %v2391_v8, %v2385_v56 }
 0x26c   :  { %v2393_v7 = vpop.eup %2392 }
 0x26d   :  { %v1030_v57 = vmul.f32 %v2393_v7, %v3205_v59  ;;  %2396 = vtanh.f32 %v3251_v13 }
 0x26e   :  { %2398 = vrcp.f32 %v1024_v50  ;;  %v2395_v51 = vpop.eup %2394 }
 0x26f   :  { %v3254_v60 = vadd.f32 %v1032_v16, %v1030_v57 }
 0x271   :  { %2400 = vtanh.f32 %v3254_v60 }
 0x27a   :  { %v2397_v45 = vpop.eup %2396 }
 0x27b   :  { %v2399_v53 = vpop.eup %2398  ;;  %v1037_v62 = vmul.f32 %v2397_v45, %v2395_v51 }
 0x27e   :  { %v2401_v49 = vpop.eup %2400 }
 0x27f   :  { %v1038_v54 = vmul.f32 %v2401_v49, %v2399_v53 }
 0x281   :  { %v1048_v4 = vpack.c.bf16 %v1038_v54, %v1037_v62 }
 0x283   :  { %1082 = vmatmul.mubr.bf16.vlgmr.msra.gmra.mxu0 %v1048_v4  ;;  %1125 = vmatmul.mubr.bf16.vlgmr.msra.gmra.mxu1 %v1048_v4 }
 0x284   :  { %1202 = vmatpush1.bf16.msra.mxu0 %v2829_v11  ;;  %1245 = vmatpush1.bf16.msra.mxu1 %v2858_v22  ;;  %v3290_v11 = vld [vmem:[#allocation11 + $0xe4] ss:$16 sps:$4 sm:$0xff]  }
 0x285   :  { %1203 = vmatprep.subr.bf16.mxu0 %v2836_v15  ;;  %1246 = vmatprep.subr.bf16.mxu1 %v2860_v23  ;;  %v3293_v15 = vld [vmem:[#allocation11 + $0xec] ss:$16 sps:$4 sm:$0xff]  }
 0x286   :  { %1233 = vmatprep.mubr.bf16.mxu0 %v3641_v29  ;;  %1276 = vmatprep.mubr.bf16.mxu1 %v3641_v29 }
 0x288   :  { %1204 = vmatpush1.bf16.msra.mxu0 %v2843_v17  ;;  %1247 = vmatpush1.bf16.msra.mxu1 %v2872_v26 }
 0x289   :  { %1205 = vmatprep.subr.bf16.mxu0 %v2845_v18  ;;  %1248 = vmatprep.subr.bf16.mxu1 %v2876_v27  ;;  %v3645_v18 = vld [vmem:[#allocation27_spill] sm:$0xff] }
 0x28c   :  { %1206 = vmatpush1.bf16.msra.mxu0 %v2853_v19  ;;  %1249 = vmatpush1.bf16.msra.mxu1 %v2883_v30  ;;  %v3647_v30 = vld [vmem:[#allocation29_spill] sm:$0xff] }
 0x28d   :  { %1207 = vmatprep.subr.bf16.mxu0 %v2856_v20  ;;  %1250 = vmatprep.subr.bf16.mxu1 %v2891_v33 }
 0x290   :  { %1208 = vmatpush1.bf16.msra.mxu0 %v2864_v24  ;;  %1251 = vmatpush1.bf16.msra.mxu1 %v2897_v35  ;;  %v3646_v24 = vld [vmem:[#allocation28_spill] sm:$0xff] }
 0x291   :  { %1209 = vmatprep.subr.bf16.mxu0 %v2868_v25  ;;  %1252 = vmatprep.subr.bf16.mxu1 %v2903_v37 }
 0x294   :  { %1210 = vmatpush1.bf16.msra.mxu0 %v2879_v28  ;;  %1253 = vmatpush1.bf16.msra.mxu1 %v2913_v40 }
 0x295   :  { %1211 = vmatprep.subr.bf16.mxu0 %v2885_v31  ;;  %1254 = vmatprep.subr.bf16.mxu1 %v2919_v42  ;;  %v3650_v42 = vld [vmem:[#allocation39_spill] sm:$0xff] }
 0x298   :  { %1212 = vmatpush1.bf16.msra.mxu0 %v2888_v32  ;;  %1255 = vmatpush1.bf16.msra.mxu1 %v2927_v43 }
 0x299   :  { %1213 = vmatprep.subr.bf16.mxu0 %v2895_v34  ;;  %1256 = vmatprep.subr.bf16.mxu1 %v2931_v44  ;;  %v3648_v34 = vld [vmem:[#allocation30_spill] sm:$0xff] }
 0x29c   :  { %1214 = vmatpush1.bf16.msra.mxu0 %v2901_v36  ;;  %1257 = vmatpush1.bf16.msra.mxu1 %v2935_v46 }
 0x29d   :  { %1215 = vmatprep.subr.bf16.mxu0 %v2911_v39  ;;  %1258 = vmatprep.subr.bf16.mxu1 %v2938_v47  ;;  %v3649_v39 = vld [vmem:[#allocation41_spill] sm:$0xff] }
 0x2a0   :  { %1216 = vmatpush1.bf16.msra.mxu0 %v2916_v41  ;;  %1259 = vmatpush1.bf16.msra.mxu1 %v2945_v48 }
 0x2a1   :  { %1353 = vmatprep.subr.bf16.mxu0 %v3290_v11  ;;  %1396 = vmatprep.subr.bf16.mxu1 %v3293_v15 }
 0x343   :  { %v1083_v17 = vpop.f32.mrf.mxu0  ;;  %v1126_v20 = vpop.f32.mrf.mxu1 }
 0x344   :  { %v1135_v19 = vadd.f32 %v1083_v17, %v3645_v18  ;;  %v1137_v59 = vadd.f32 %v1126_v20, %v3650_v42  ;;  %v3350_v42 = vld [vmem:[#allocation11 + $0x80] ss:$16 sps:$4 sm:$0xff]  }
 0x345   :  { %v1085_v22 = vpop.f32.mrf.mxu0  ;;  %v1128_v28 = vpop.f32.mrf.mxu1 }
 0x346   :  { %v2168_v23 = vmul.f32 -1.442695, %v1135_v19  ;;  %v1136_v25 = vadd.f32 %v1085_v22, %v3646_v24  ;;  %v1138_v40 = vadd.f32 %v1128_v28, %v3649_v39  ;;  %v3341_v39 = vld [vmem:[#allocation11 + $0xa8] ss:$16 sps:$4 sm:$0xff]  }
 0x347   :  { %v1087_v26 = vpop.f32.mrf.mxu0  ;;  %v1130_v36 = vpop.f32.mrf.mxu1 }
 0x348   :  { %2402 = vpow2.f32 %v2168_v23  ;;  %v2170_v27 = vmul.f32 -1.442695, %v1136_v25  ;;  %v1139_v31 = vadd.f32 %v1087_v26, %v3647_v30  ;;  %v2172_v55 = vmul.f32 -1.442695, %v1138_v40  ;;  %v3312_v30 = vld [vmem:[#allocation11 + $0xe0] ss:$16 sps:$4 sm:$0xff]  }
 0x349   :  { %v1089_v32 = vpop.f32.mrf.mxu0  ;;  %v1132_v41 = vpop.f32.mrf.mxu1  ;;  %v1141_v21 = vadd.f32 %v1130_v36, %v3652_v58  ;;  %v3335_v36 = vld [vmem:[#allocation11 + $0xac] ss:$16 sps:$4 sm:$0xff]   ;;  %v3344_v40 = vld [vmem:[#allocation11 + $0x84] ss:$16 sps:$4 sm:$0xff]  }
 0x34a   :  { %2404 = vpow2.f32 %v2170_v27  ;;  %v2169_v33 = vmul.f32 -1.442695, %v1139_v31  ;;  %v1140_v35 = vadd.f32 %v1089_v32, %v3648_v34  ;;  %v1142_v5 = vadd.f32 %v1132_v41, %v3651_v12  ;;  %v3318_v31 = vld [vmem:[#allocation11 + $0xc4] ss:$16 sps:$4 sm:$0xff]   ;;  %v3321_v32 = vld [vmem:[#allocation11 + $0xcc] ss:$16 sps:$4 sm:$0xff]  }
 0x34b   :  { %v3329_v34 = vld [vmem:[#allocation11 + $0xc8] ss:$16 sps:$4 sm:$0xff]   ;;  %v3347_v41 = vld [vmem:[#allocation11 + $0x8c] ss:$16 sps:$4 sm:$0xff]   ;;  %v3368_v58 = vld [vmem:[#allocation11 + $0x44] ss:$16 sps:$4 sm:$0xff]  }
 0x34c   :  { %2406 = vpow2.f32 %v2169_v33  ;;  %v2171_v37 = vmul.f32 -1.442695, %v1140_v35  ;;  %v2173_v3 = vmul.f32 -1.442695, %v1142_v5  ;;  %v3326_v33 = vld [vmem:[#allocation11 + $0xc0] ss:$16 sps:$4 sm:$0xff]  }
 0x34d   :  { %v3332_v35 = vld [vmem:[#allocation11 + $0xa4] ss:$16 sps:$4 sm:$0xff]   ;;  %v3359_v12 = vld [vmem:[#allocation11 + $0x6c] ss:$16 sps:$4 sm:$0xff]   ;;  %v3362_v5 = vld [vmem:[#allocation11 + $0x60] ss:$16 sps:$4 sm:$0xff]  }
 0x34e   :  { %2408 = vpow2.f32 %v2171_v37  ;;  %v3338_v37 = vld [vmem:[#allocation11 + $0xa0] ss:$16 sps:$4 sm:$0xff]  }
 0x34f   :  { %2410 = vtanh.f32 %v1137_v59  ;;  %v3353_v59 = vld [vmem:[#allocation11 + $0x88] ss:$16 sps:$4 sm:$0xff]  }
 0x350   :  { %2412 = vpow2.f32 %v2172_v55  ;;  %v3356_v55 = vld [vmem:[#allocation11 + $0x64] ss:$16 sps:$4 sm:$0xff]  }
 0x355   :  { %v2403_v38 = vpop.eup %2402 }
 0x356   :  { %v1149_v61 = vadd.f32 1.0, %v2403_v38  ;;  %v3365_v38 = vld [vmem:[#allocation11 + $0x68] ss:$16 sps:$4 sm:$0xff]  }
 0x357   :  { %v2405_v56 = vpop.eup %2404 }
 0x358   :  { %2414 = vrcp.f32 %v1149_v61  ;;  %v1161_v10 = vadd.f32 1.0, %v2405_v56  ;;  %v3374_v61 = vld [vmem:[#allocation11 + $0x40] ss:$16 sps:$4 sm:$0xff]   ;;  %v3378_v56 = vld [vmem:[#allocation11 + $0x24] ss:$16 sps:$4 sm:$0xff]  }
 0x359   :  { %v2407_v14 = vpop.eup %2406  ;;  %2416 = vtanh.f32 %v1141_v21  ;;  %v3371_v21 = vld [vmem:[#allocation11 + $0x4c] ss:$16 sps:$4 sm:$0xff]  }
 0x35a   :  { %2418 = vrcp.f32 %v1161_v10  ;;  %v1150_v63 = vadd.f32 1.0, %v2407_v14  ;;  %v3386_v10 = vld [vmem:[#allocation11 + $0x4] ss:$16 sps:$4 sm:$0xff]   ;;  %v3390_v14 = vld [vmem:[#allocation11] ss:$16 sps:$4 sm:$0xff]  }
 0x35b   :  { %v2409_v8 = vpop.eup %2408  ;;  %2420 = vpow2.f32 %v2173_v3  ;;  %v3382_v3 = vld [vmem:[#allocation11 + $0x20] ss:$16 sps:$4 sm:$0xff]  }
 0x35c   :  { %2422 = vrcp.f32 %v1150_v63  ;;  %v1162_v1 = vadd.f32 1.0, %v2409_v8  ;;  %v2411_v16 = vpop.eup %2410 }
 0x35d   :  { %v2413_v7 = vpop.eup %2412 }
 0x35e   :  { %2424 = vrcp.f32 %v1162_v1  ;;  %v1175_v54 = vadd.f32 1.0, %v2413_v7 }
 0x360   :  { %2426 = vrcp.f32 %v1175_v54 }
 0x365   :  { %v2415_v50 = vpop.eup %2414 }
 0x366   :  { %v2417_v57 = vpop.eup %2416  ;;  %v1183_v51 = vmul.f32 %v2415_v50, %v2411_v16  ;;  %v3654_v16 = vld [vmem:[#allocation33_spill] sm:$0xff] }
 0x367   :  { %v2419_v45 = vpop.eup %2418 }
 0x368   :  { %v2421_v53 = vpop.eup %2420  ;;  %v1181_v49 = vmul.f32 %v2419_v45, %v3251_v13 }
 0x369   :  { %v2423_v62 = vpop.eup %2422  ;;  %v1176_v19 = vadd.f32 1.0, %v2421_v53 }
 0x36a   :  { %v3305_v4 = vadd.f32 %v1183_v51, %v1181_v49  ;;  %v1184_v17 = vmul.f32 %v2423_v62, %v2417_v57  ;;  %v3655_v51 = vld [vmem:[#allocation34_spill] sm:$0xff]  ;;  %v3656_v49 = vld [vmem:[#allocation36_spill] sm:$0xff] }
 0x36b   :  { %v2425_v18 = vpop.eup %2424 }
 0x36c   :  { %v1182_v20 = vmul.f32 %v2425_v18, %v3254_v60  ;;  %2428 = vtanh.f32 %v3305_v4  ;;  %v3315_v60 = vld [vmem:[#allocation11 + $0xe8] ss:$16 sps:$4 sm:$0xff]   ;;  %v3657_v18 = vld [vmem:[#allocation49_spill] sm:$0xff] }
 0x36d   :  { %2430 = vrcp.f32 %v1176_v19  ;;  %v2427_v23 = vpop.eup %2426 }
 0x36e   :  { %v3308_v22 = vadd.f32 %v1184_v17, %v1182_v20 }
 0x370   :  { %2432 = vtanh.f32 %v3308_v22 }
 0x379   :  { %v2429_v24 = vpop.eup %2428 }
 0x37a   :  { %v2431_v13 = vpop.eup %2430  ;;  %v1189_v26 = vmul.f32 %v2429_v24, %v2427_v23  ;;  %v3658_v23 = vld [vmem:[#allocation47_spill] sm:$0xff] }
 0x37d   :  { %v2433_v25 = vpop.eup %2432 }
 0x37e   :  { %v1190_v27 = vmul.f32 %v2433_v25, %v2431_v13  ;;  %v3659_v25 = vld [vmem:[#allocation53_spill] sm:$0xff] }
 0x380   :  { %v1200_v28 = vpack.c.bf16 %v1190_v27, %v1189_v26 }
 0x382   :  { %1234 = vmatmul.mubr.bf16.vlgmr.msra.gmra.mxu0 %v1200_v28  ;;  %1277 = vmatmul.mubr.bf16.vlgmr.msra.gmra.mxu1 %v1200_v28  ;;  %v3660_v28 = vld [vmem:[#allocation51_spill] sm:$0xff] }
 0x383   :  { %1354 = vmatpush1.bf16.msra.mxu0 %v3312_v30  ;;  %1397 = vmatpush1.bf16.msra.mxu1 %v3315_v60 }
 0x384   :  { %1355 = vmatprep.subr.bf16.mxu0 %v3318_v31  ;;  %1398 = vmatprep.subr.bf16.mxu1 %v3321_v32 }
 0x385   :  { %1385 = vmatprep.mubr.bf16.mxu0 %v3641_v29  ;;  %1428 = vmatprep.mubr.bf16.mxu1 %v3641_v29 }
 0x387   :  { %1356 = vmatpush1.bf16.msra.mxu0 %v3326_v33  ;;  %1399 = vmatpush1.bf16.msra.mxu1 %v3329_v34 }
 0x388   :  { %1357 = vmatprep.subr.bf16.mxu0 %v3332_v35  ;;  %1400 = vmatprep.subr.bf16.mxu1 %v3335_v36 }
 0x38b   :  { %1358 = vmatpush1.bf16.msra.mxu0 %v3338_v37  ;;  %1401 = vmatpush1.bf16.msra.mxu1 %v3341_v39 }
 0x38c   :  { %1359 = vmatprep.subr.bf16.mxu0 %v3344_v40  ;;  %1402 = vmatprep.subr.bf16.mxu1 %v3347_v41 }
 0x38f   :  { %1360 = vmatpush1.bf16.msra.mxu0 %v3350_v42  ;;  %1403 = vmatpush1.bf16.msra.mxu1 %v3353_v59 }
 0x390   :  { %1361 = vmatprep.subr.bf16.mxu0 %v3356_v55  ;;  %1404 = vmatprep.subr.bf16.mxu1 %v3359_v12 }
 0x393   :  { %1362 = vmatpush1.bf16.msra.mxu0 %v3362_v5  ;;  %1405 = vmatpush1.bf16.msra.mxu1 %v3365_v38 }
 0x394   :  { %1363 = vmatprep.subr.bf16.mxu0 %v3368_v58  ;;  %1406 = vmatprep.subr.bf16.mxu1 %v3371_v21 }
 0x397   :  { %1364 = vmatpush1.bf16.msra.mxu0 %v3374_v61  ;;  %1407 = vmatpush1.bf16.msra.mxu1 %v2927_v43 }
 0x398   :  { %1365 = vmatprep.subr.bf16.mxu0 %v3378_v56  ;;  %1408 = vmatprep.subr.bf16.mxu1 %v2931_v44  ;;  %v3653_v44 = vld [vmem:[#allocation31_spill] sm:$0xff] }
 0x39b   :  { %1366 = vmatpush1.bf16.msra.mxu0 %v3382_v3  ;;  %1409 = vmatpush1.bf16.msra.mxu1 %v2935_v46 }
 0x39c   :  { %1367 = vmatprep.subr.bf16.mxu0 %v3386_v10  ;;  %1410 = vmatprep.subr.bf16.mxu1 %v2938_v47 }
 0x39f   :  { %1368 = vmatpush1.bf16.msra.mxu0 %v3390_v14  ;;  %1411 = vmatpush1.bf16.msra.mxu1 %v2945_v48 }
 0x3a0   :  { %1505 = vmatprep.subr.bf16.mxu0 %v3290_v11  ;;  %1548 = vmatprep.subr.bf16.mxu1 %v3293_v15 }
 0x442   :  { %v1235_v43 = vpop.f32.mrf.mxu0  ;;  %v1278_v46 = vpop.f32.mrf.mxu1 }
 0x443   :  { %v1287_v63 = vadd.f32 %v1235_v43, %v3653_v44  ;;  %v1289_v24 = vadd.f32 %v1278_v46, %v3658_v23 }
 0x444   :  { %v1237_v8 = vpop.f32.mrf.mxu0  ;;  %v1280_v57 = vpop.f32.mrf.mxu1 }
 0x445   :  { %v2174_v1 = vmul.f32 -1.442695, %v1287_v63  ;;  %v1288_v7 = vadd.f32 %v1237_v8, %v3654_v16  ;;  %v1290_v19 = vadd.f32 %v1280_v57, %v3657_v18 }
 0x446   :  { %v1239_v50 = vpop.f32.mrf.mxu0  ;;  %v1282_v54 = vpop.f32.mrf.mxu1 }
 0x447   :  { %2434 = vpow2.f32 %v2174_v1  ;;  %v2176_v47 = vmul.f32 -1.442695, %v1288_v7  ;;  %v1291_v45 = vadd.f32 %v1239_v50, %v3655_v51  ;;  %v2178_v13 = vmul.f32 -1.442695, %v1290_v19 }
 0x448   :  { %v1241_v53 = vpop.f32.mrf.mxu0  ;;  %v1284_v20 = vpop.f32.mrf.mxu1  ;;  %v1293_v43 = vadd.f32 %v1282_v54, %v3660_v28 }
 0x449   :  { %2436 = vpow2.f32 %v2176_v47  ;;  %v2175_v48 = vmul.f32 -1.442695, %v1291_v45  ;;  %v1292_v62 = vadd.f32 %v1241_v53, %v3656_v49  ;;  %v1294_v26 = vadd.f32 %v1284_v20, %v3659_v25 }
 0x44b   :  { %2438 = vpow2.f32 %v2175_v48  ;;  %v2177_v17 = vmul.f32 -1.442695, %v1292_v62  ;;  %v2179_v8 = vmul.f32 -1.442695, %v1294_v26 }
 0x44d   :  { %2440 = vpow2.f32 %v2177_v17 }
 0x44e   :  { %2442 = vtanh.f32 %v1289_v24 }
 0x44f   :  { %2444 = vpow2.f32 %v2178_v13 }
 0x454   :  { %v2435_v27 = vpop.eup %2434 }
 0x455   :  { %v1301_v44 = vadd.f32 1.0, %v2435_v27 }
 0x456   :  { %v2437_v63 = vpop.eup %2436 }
 0x457   :  { %2446 = vrcp.f32 %v1301_v44  ;;  %v1313_v1 = vadd.f32 1.0, %v2437_v63  ;;  %v3439_v63 = vld [vmem:[#allocation11 + $0x2c] ss:$16 sps:$4 sm:$0xff]  }
 0x458   :  { %v2439_v16 = vpop.eup %2438  ;;  %2448 = vtanh.f32 %v1293_v43 }
 0x459   :  { %2450 = vrcp.f32 %v1313_v1  ;;  %v1302_v7 = vadd.f32 1.0, %v2439_v16  ;;  %v3447_v1 = vld [vmem:[#allocation11 + $0xc] ss:$16 sps:$4 sm:$0xff]   ;;  %v3451_v16 = vld [vmem:[#allocation11 + $0x8] ss:$16 sps:$4 sm:$0xff]  }
 0x45a   :  { %v2441_v50 = vpop.eup %2440  ;;  %2452 = vpow2.f32 %v2179_v8  ;;  %v3443_v8 = vld [vmem:[#allocation11 + $0x28] ss:$16 sps:$4 sm:$0xff]  }
 0x45b   :  { %2454 = vrcp.f32 %v1302_v7  ;;  %v1314_v46 = vadd.f32 1.0, %v2441_v50  ;;  %v2443_v47 = vpop.eup %2442  ;;  %v3661_v50 = vld [vmem:[#allocation38_spill] sm:$0xff] }
 0x45c   :  { %v2445_v57 = vpop.eup %2444 }
 0x45d   :  { %2456 = vrcp.f32 %v1314_v46  ;;  %v1327_v17 = vadd.f32 1.0, %v2445_v57 }
 0x45f   :  { %2458 = vrcp.f32 %v1327_v17 }
 0x464   :  { %v2447_v51 = vpop.eup %2446 }
 0x465   :  { %v2449_v45 = vpop.eup %2448  ;;  %v1335_v53 = vmul.f32 %v2447_v51, %v2443_v47 }
 0x466   :  { %v2451_v48 = vpop.eup %2450 }
 0x467   :  { %v2453_v49 = vpop.eup %2452  ;;  %v1333_v62 = vmul.f32 %v2451_v48, %v3305_v4 }
 0x468   :  { %v2455_v54 = vpop.eup %2454  ;;  %v1328_v23 = vadd.f32 1.0, %v2453_v49 }
 0x469   :  { %v3405_v18 = vadd.f32 %v1335_v53, %v1333_v62  ;;  %v1336_v19 = vmul.f32 %v2455_v54, %v2449_v45  ;;  %v3662_v45 = vld [vmem:[#allocation40_spill] sm:$0xff]  ;;  %v3663_v54 = vld [vmem:[#allocation42_spill] sm:$0xff] }
 0x46a   :  { %v2457_v20 = vpop.eup %2456 }
 0x46b   :  { %v1334_v24 = vmul.f32 %v2457_v20, %v3308_v22  ;;  %2460 = vtanh.f32 %v3405_v18  ;;  %v3435_v22 = vld [vmem:[#allocation11 + $0x48] ss:$16 sps:$4 sm:$0xff]  }
 0x46c   :  { %2462 = vrcp.f32 %v1328_v23  ;;  %v2459_v25 = vpop.eup %2458  ;;  %v3664_v23 = vld [vmem:[#allocation44_spill] sm:$0xff] }
 0x46d   :  { %v3408_v13 = vadd.f32 %v1336_v19, %v1334_v24 }
 0x46f   :  { %2464 = vtanh.f32 %v3408_v13 }
 0x478   :  { %v2461_v26 = vpop.eup %2460 }
 0x479   :  { %v2463_v4 = vpop.eup %2462  ;;  %v1341_v28 = vmul.f32 %v2461_v26, %v2459_v25 }
 0x47c   :  { %v2465_v27 = vpop.eup %2464 }
 0x47d   :  { %v1342_v43 = vmul.f32 %v2465_v27, %v2463_v4  ;;  %v3665_v4 = vld [vmem:[#allocation55_spill] sm:$0xff] }
 0x47f   :  { %v1352_v44 = vpack.c.bf16 %v1342_v43, %v1341_v28  ;;  %v3666_v43 = vld [vmem:[#allocation54_spill] sm:$0xff] }
 0x481   :  { %1386 = vmatmul.mubr.bf16.vlgmr.msra.gmra.mxu0 %v1352_v44  ;;  %1429 = vmatmul.mubr.bf16.vlgmr.msra.gmra.mxu1 %v1352_v44 }
 0x482   :  { %1506 = vmatpush1.bf16.msra.mxu0 %v3312_v30  ;;  %1549 = vmatpush1.bf16.msra.mxu1 %v3315_v60 }
 0x483   :  { %1507 = vmatprep.subr.bf16.mxu0 %v3318_v31  ;;  %1550 = vmatprep.subr.bf16.mxu1 %v3321_v32 }
 0x484   :  { %1537 = vmatprep.mubr.bf16.mxu0 %v3641_v29  ;;  %1580 = vmatprep.mubr.bf16.mxu1 %v3641_v29 }
 0x486   :  { %1508 = vmatpush1.bf16.msra.mxu0 %v3326_v33  ;;  %1551 = vmatpush1.bf16.msra.mxu1 %v3329_v34 }
 0x487   :  { %1509 = vmatprep.subr.bf16.mxu0 %v3332_v35  ;;  %1552 = vmatprep.subr.bf16.mxu1 %v3335_v36 }
 0x48a   :  { %1510 = vmatpush1.bf16.msra.mxu0 %v3338_v37  ;;  %1553 = vmatpush1.bf16.msra.mxu1 %v3341_v39 }
 0x48b   :  { %1511 = vmatprep.subr.bf16.mxu0 %v3344_v40  ;;  %1554 = vmatprep.subr.bf16.mxu1 %v3347_v41 }
 0x48e   :  { %1512 = vmatpush1.bf16.msra.mxu0 %v3350_v42  ;;  %1555 = vmatpush1.bf16.msra.mxu1 %v3353_v59 }
 0x48f   :  { %1513 = vmatprep.subr.bf16.mxu0 %v3356_v55  ;;  %1556 = vmatprep.subr.bf16.mxu1 %v3359_v12 }
 0x492   :  { %1514 = vmatpush1.bf16.msra.mxu0 %v3362_v5  ;;  %1557 = vmatpush1.bf16.msra.mxu1 %v3365_v38 }
 0x493   :  { %1515 = vmatprep.subr.bf16.mxu0 %v3368_v58  ;;  %1558 = vmatprep.subr.bf16.mxu1 %v3371_v21 }
 0x496   :  { %1516 = vmatpush1.bf16.msra.mxu0 %v3374_v61  ;;  %1559 = vmatpush1.bf16.msra.mxu1 %v3435_v22 }
 0x497   :  { %1517 = vmatprep.subr.bf16.mxu0 %v3378_v56  ;;  %1560 = vmatprep.subr.bf16.mxu1 %v3439_v63 }
 0x49a   :  { %1518 = vmatpush1.bf16.msra.mxu0 %v3382_v3  ;;  %1561 = vmatpush1.bf16.msra.mxu1 %v3443_v8 }
 0x49b   :  { %1519 = vmatprep.subr.bf16.mxu0 %v3386_v10  ;;  %1562 = vmatprep.subr.bf16.mxu1 %v3447_v1 }
 0x49e   :  { %1520 = vmatpush1.bf16.msra.mxu0 %v3390_v14  ;;  %1563 = vmatpush1.bf16.msra.mxu1 %v3451_v16 }
 0x49f   :  { %1657 = vmatprep.subr.bf16.mxu0 %v3290_v11  ;;  %1700 = vmatprep.subr.bf16.mxu1 %v3293_v15 }
 0x541   :  { %v1387_v7 = vpop.f32.mrf.mxu0  ;;  %v1430_v47 = vpop.f32.mrf.mxu1 }
 0x542   :  { %v1439_v46 = vadd.f32 %v1387_v7, %v3661_v50  ;;  %v1441_v44 = vadd.f32 %v1430_v47, %v3666_v43 }
 0x543   :  { %v1389_v57 = vpop.f32.mrf.mxu0  ;;  %v1432_v62 = vpop.f32.mrf.mxu1 }
 0x544   :  { %v2180_v51 = vmul.f32 -1.442695, %v1439_v46  ;;  %v1440_v53 = vadd.f32 %v1389_v57, %v3662_v45  ;;  %v1442_v27 = vadd.f32 %v1432_v62, %v3665_v4 }
 0x545   :  { %v1391_v48 = vpop.f32.mrf.mxu0  ;;  %v1434_v25 = vpop.f32.mrf.mxu1 }
 0x546   :  { %2466 = vpow2.f32 %v2180_v51  ;;  %v2182_v49 = vmul.f32 -1.442695, %v1440_v53  ;;  %v1443_v17 = vadd.f32 %v1391_v48, %v3663_v54  ;;  %v2184_v7 = vmul.f32 -1.442695, %v1442_v27 }
 0x547   :  { %v1393_v19 = vpop.f32.mrf.mxu0  ;;  %v1436_v28 = vpop.f32.mrf.mxu1  ;;  %v1445_v57 = vadd.f32 %v1434_v25, %v3149_v52 }
 0x548   :  { %2468 = vpow2.f32 %v2182_v49  ;;  %v2181_v20 = vmul.f32 -1.442695, %v1443_v17  ;;  %v1444_v24 = vadd.f32 %v1393_v19, %v3664_v23  ;;  %v1446_v50 = vadd.f32 %v1436_v28, %v3154_v6 }
 0x54a   :  { %2470 = vpow2.f32 %v2181_v20  ;;  %v2183_v26 = vmul.f32 -1.442695, %v1444_v24  ;;  %v2185_v53 = vmul.f32 -1.442695, %v1446_v50 }
 0x54c   :  { %2472 = vpow2.f32 %v2183_v26 }
 0x54d   :  { %2474 = vtanh.f32 %v1441_v44 }
 0x54e   :  { %2476 = vpow2.f32 %v2184_v7 }
 0x553   :  { %v2467_v46 = vpop.eup %2466 }
 0x554   :  { %v1453_v51 = vadd.f32 1.0, %v2467_v46 }
 0x555   :  { %v2469_v45 = vpop.eup %2468 }
 0x556   :  { %2478 = vrcp.f32 %v1453_v51  ;;  %v1465_v48 = vadd.f32 1.0, %v2469_v45 }
 0x557   :  { %v2471_v49 = vpop.eup %2470  ;;  %2480 = vtanh.f32 %v1445_v57 }
 0x558   :  { %2482 = vrcp.f32 %v1465_v48  ;;  %v1454_v62 = vadd.f32 1.0, %v2471_v49  ;;  %v3667_v49 = vld [vmem:[#allocation46_spill] sm:$0xff] }
 0x559   :  { %v2473_v54 = vpop.eup %2472  ;;  %2484 = vpow2.f32 %v2185_v53 }
 0x55a   :  { %2486 = vrcp.f32 %v1454_v62  ;;  %v1466_v47 = vadd.f32 1.0, %v2473_v54  ;;  %v2475_v6 = vpop.eup %2474 }
 0x55b   :  { %v2477_v17 = vpop.eup %2476 }
 0x55c   :  { %2488 = vrcp.f32 %v1466_v47  ;;  %v1479_v4 = vadd.f32 1.0, %v2477_v17  ;;  %v3668_v17 = vld [vmem:[#allocation48_spill] sm:$0xff] }
 0x55e   :  { %2490 = vrcp.f32 %v1479_v4 }
 0x563   :  { %v2479_v19 = vpop.eup %2478 }
 0x564   :  { %v2481_v52 = vpop.eup %2480  ;;  %v1487_v20 = vmul.f32 %v2479_v19, %v2475_v6 }
 0x565   :  { %v2483_v23 = vpop.eup %2482 }
 0x566   :  { %v2485_v24 = vpop.eup %2484  ;;  %v1485_v25 = vmul.f32 %v2483_v23, %v3405_v18 }
 0x567   :  { %v2487_v26 = vpop.eup %2486  ;;  %v1480_v44 = vadd.f32 1.0, %v2485_v24  ;;  %v3669_v24 = vld [vmem:[#allocation50_spill] sm:$0xff] }
 0x568   :  { %v3465_v27 = vadd.f32 %v1487_v20, %v1485_v25  ;;  %v1488_v28 = vmul.f32 %v2487_v26, %v2481_v52 }
 0x569   :  { %v2489_v43 = vpop.eup %2488 }
 0x56a   :  { %v1486_v7 = vmul.f32 %v2489_v43, %v3408_v13  ;;  %2492 = vtanh.f32 %v3465_v27 }
 0x56b   :  { %2494 = vrcp.f32 %v1480_v44  ;;  %v2491_v46 = vpop.eup %2490 }
 0x56c   :  { %v3468_v50 = vadd.f32 %v1488_v28, %v1486_v7 }
 0x56e   :  { %2496 = vtanh.f32 %v3468_v50 }
 0x577   :  { %v2493_v57 = vpop.eup %2492 }
 0x578   :  { %v2495_v18 = vpop.eup %2494  ;;  %v1493_v45 = vmul.f32 %v2493_v57, %v2491_v46 }
 0x57b   :  { %v2497_v51 = vpop.eup %2496 }
 0x57c   :  { %v1494_v53 = vmul.f32 %v2497_v51, %v2495_v18 }
 0x57e   :  { %v1504_v48 = vpack.c.bf16 %v1494_v53, %v1493_v45  ;;  %v3671_v45 = vld [vmem:[#allocation56_spill] sm:$0xff] }
 0x580   :  { %1538 = vmatmul.mubr.bf16.vlgmr.msra.gmra.mxu0 %v1504_v48  ;;  %1581 = vmatmul.mubr.bf16.vlgmr.msra.gmra.mxu1 %v1504_v48 }
 0x581   :  { %1658 = vmatpush1.bf16.msra.mxu0 %v3312_v30  ;;  %1701 = vmatpush1.bf16.msra.mxu1 %v3315_v60 }
 0x582   :  { %1659 = vmatprep.subr.bf16.mxu0 %v3318_v31  ;;  %1702 = vmatprep.subr.bf16.mxu1 %v3321_v32 }
 0x583   :  { %1689 = vmatprep.mubr.bf16.mxu0 %v3641_v29  ;;  %1732 = vmatprep.mubr.bf16.mxu1 %v3641_v29 }
 0x585   :  { %1660 = vmatpush1.bf16.msra.mxu0 %v3326_v33  ;;  %1703 = vmatpush1.bf16.msra.mxu1 %v3329_v34 }
 0x586   :  { %1661 = vmatprep.subr.bf16.mxu0 %v3332_v35  ;;  %1704 = vmatprep.subr.bf16.mxu1 %v3335_v36 }
 0x589   :  { %1662 = vmatpush1.bf16.msra.mxu0 %v3338_v37  ;;  %1705 = vmatpush1.bf16.msra.mxu1 %v3341_v39 }
 0x58a   :  { %1663 = vmatprep.subr.bf16.mxu0 %v3344_v40  ;;  %1706 = vmatprep.subr.bf16.mxu1 %v3347_v41 }
 0x58d   :  { %1664 = vmatpush1.bf16.msra.mxu0 %v3350_v42  ;;  %1707 = vmatpush1.bf16.msra.mxu1 %v3353_v59 }
 0x58e   :  { %1665 = vmatprep.subr.bf16.mxu0 %v3356_v55  ;;  %1708 = vmatprep.subr.bf16.mxu1 %v3359_v12 }
 0x591   :  { %1666 = vmatpush1.bf16.msra.mxu0 %v3362_v5  ;;  %1709 = vmatpush1.bf16.msra.mxu1 %v3365_v38 }
 0x592   :  { %1667 = vmatprep.subr.bf16.mxu0 %v3368_v58  ;;  %1710 = vmatprep.subr.bf16.mxu1 %v3371_v21 }
 0x595   :  { %1668 = vmatpush1.bf16.msra.mxu0 %v3374_v61  ;;  %1711 = vmatpush1.bf16.msra.mxu1 %v3435_v22 }
 0x596   :  { %1669 = vmatprep.subr.bf16.mxu0 %v3378_v56  ;;  %1712 = vmatprep.subr.bf16.mxu1 %v3439_v63 }
 0x599   :  { %1670 = vmatpush1.bf16.msra.mxu0 %v3382_v3  ;;  %1713 = vmatpush1.bf16.msra.mxu1 %v3443_v8 }
 0x59a   :  { %1671 = vmatprep.subr.bf16.mxu0 %v3386_v10  ;;  %1714 = vmatprep.subr.bf16.mxu1 %v3447_v1 }
 0x59d   :  { %1672 = vmatpush1.bf16.msra.mxu0 %v3390_v14  ;;  %1715 = vmatpush1.bf16.msra.mxu1 %v3451_v16 }
 0x59e   :  { %1809 = vmatprep.subr.bf16.mxu0 %v3290_v11  ;;  %1852 = vmatprep.subr.bf16.mxu1 %v3293_v15  ;;  %v3670_v11 = vld [vmem:[#allocation52_spill] sm:$0xff] }
 0x640   :  { %v1539_v13 = vpop.f32.mrf.mxu0  ;;  %v1582_v54 = vpop.f32.mrf.mxu1 }
 0x641   :  { %v1591_v62 = vadd.f32 %v1539_v13, %v3667_v49  ;;  %v1593_v46 = vadd.f32 %v1582_v54, %v3159_v9 }
 0x642   :  { %v1541_v47 = vpop.f32.mrf.mxu0  ;;  %v1584_v23 = vpop.f32.mrf.mxu1 }
 0x643   :  { %v2186_v6 = vmul.f32 -1.442695, %v1591_v62  ;;  %v1592_v19 = vadd.f32 %v1541_v47, %v3668_v17  ;;  %v1594_v44 = vadd.f32 %v1584_v23, %v3162_v0 }
 0x644   :  { %v1543_v52 = vpop.f32.mrf.mxu0  ;;  %v1586_v15 = vpop.f32.mrf.mxu1 }
 0x645   :  { %2498 = vpow2.f32 %v2186_v6  ;;  %v2188_v20 = vmul.f32 -1.442695, %v1592_v19  ;;  %v1595_v25 = vadd.f32 %v1543_v52, %v3669_v24  ;;  %v2190_v57 = vmul.f32 -1.442695, %v1594_v44 }
 0x646   :  { %v1545_v26 = vpop.f32.mrf.mxu0  ;;  %v1588_v7 = vpop.f32.mrf.mxu1  ;;  %v1597_v53 = vadd.f32 %v1586_v15, %v3671_v45 }
 0x647   :  { %2500 = vpow2.f32 %v2188_v20  ;;  %v2187_v4 = vmul.f32 -1.442695, %v1595_v25  ;;  %v1596_v28 = vadd.f32 %v1545_v26, %v3670_v11  ;;  %v1598_v18 = vadd.f32 %v1588_v7, %v3168_v2 }
 0x649   :  { %2502 = vpow2.f32 %v2187_v4  ;;  %v2189_v43 = vmul.f32 -1.442695, %v1596_v28  ;;  %v2191_v49 = vmul.f32 -1.442695, %v1598_v18 }
 0x64b   :  { %2504 = vpow2.f32 %v2189_v43 }
 0x64c   :  { %2506 = vtanh.f32 %v1593_v46 }
 0x64d   :  { %2508 = vpow2.f32 %v2190_v57 }
 0x652   :  { %v2499_v51 = vpop.eup %2498 }
 0x653   :  { %v1605_v48 = vadd.f32 1.0, %v2499_v51 }
 0x654   :  { %v2501_v13 = vpop.eup %2500 }
 0x655   :  { %2510 = vrcp.f32 %v1605_v48  ;;  %v1617_v62 = vadd.f32 1.0, %v2501_v13 }
 0x656   :  { %v2503_v47 = vpop.eup %2502  ;;  %2512 = vtanh.f32 %v1597_v53 }
 0x657   :  { %2514 = vrcp.f32 %v1617_v62  ;;  %v1606_v0 = vadd.f32 1.0, %v2503_v47 }
 0x658   :  { %v2505_v6 = vpop.eup %2504  ;;  %2516 = vpow2.f32 %v2191_v49 }
 0x659   :  { %2518 = vrcp.f32 %v1606_v0  ;;  %v1618_v9 = vadd.f32 1.0, %v2505_v6  ;;  %v2507_v2 = vpop.eup %2506 }
 0x65a   :  { %v2509_v54 = vpop.eup %2508 }
 0x65b   :  { %2520 = vrcp.f32 %v1618_v9  ;;  %v1631_v26 = vadd.f32 1.0, %v2509_v54 }
 0x65d   :  { %2522 = vrcp.f32 %v1631_v26 }
 0x662   :  { %v2511_v17 = vpop.eup %2510 }
 0x663   :  { %v2513_v19 = vpop.eup %2512  ;;  %v1639_v52 = vmul.f32 %v2511_v17, %v2507_v2 }
 0x664   :  { %v2515_v20 = vpop.eup %2514 }
 0x665   :  { %v2517_v23 = vpop.eup %2516  ;;  %v1637_v24 = vmul.f32 %v2515_v20, %v3465_v27 }
 0x666   :  { %v2519_v25 = vpop.eup %2518  ;;  %v1632_v15 = vadd.f32 1.0, %v2517_v23 }
 0x667   :  { %v3515_v4 = vadd.f32 %v1639_v52, %v1637_v24  ;;  %v1640_v11 = vmul.f32 %v2519_v25, %v2513_v19 }
 0x668   :  { %v2521_v28 = vpop.eup %2520 }
 0x669   :  { %v1638_v43 = vmul.f32 %v2521_v28, %v3468_v50  ;;  %2524 = vtanh.f32 %v3515_v4 }
 0x66a   :  { %2526 = vrcp.f32 %v1632_v15  ;;  %v2523_v7 = vpop.eup %2522 }
 0x66b   :  { %v3518_v44 = vadd.f32 %v1640_v11, %v1638_v43 }
 0x66d   :  { %2528 = vtanh.f32 %v3518_v44 }
 0x676   :  { %v2525_v46 = vpop.eup %2524 }
 0x677   :  { %v2527_v27 = vpop.eup %2526  ;;  %v1645_v18 = vmul.f32 %v2525_v46, %v2523_v7 }
 0x67a   :  { %v2529_v57 = vpop.eup %2528 }
 0x67b   :  { %v1646_v51 = vmul.f32 %v2529_v57, %v2527_v27 }
 0x67d   :  { %v1656_v45 = vpack.c.bf16 %v1646_v51, %v1645_v18  ;;  %v2330_v51 = vld [vmem:[#allocation13 + $0x38] sm:$0xff]  }
 0x67f   :  { %1690 = vmatmul.mubr.bf16.vlgmr.msra.gmra.mxu0 %v1656_v45  ;;  %1733 = vmatmul.mubr.bf16.vlgmr.msra.gmra.mxu1 %v1656_v45  ;;  %v2765_v45 = vmov 0.0  }
 0x680   :  { %1810 = vmatpush1.bf16.msra.mxu0 %v3312_v30  ;;  %1853 = vmatpush1.bf16.msra.mxu1 %v3315_v60  ;;  %v3672_v30 = vld [vmem:[#allocation19_spill] sm:$0xff] }
 0x681   :  { %1811 = vmatprep.subr.bf16.mxu0 %v3318_v31  ;;  %1854 = vmatprep.subr.bf16.mxu1 %v3321_v32 }
 0x682   :  { %1841 = vmatprep.mubr.bf16.mxu0 %v3641_v29  ;;  %1884 = vmatprep.mubr.bf16.mxu1 %v3641_v29 }
 0x684   :  { %1812 = vmatpush1.bf16.msra.mxu0 %v3326_v33  ;;  %1855 = vmatpush1.bf16.msra.mxu1 %v3329_v34  ;;  %v3673_v34 = vld [vmem:[#allocation20_spill] sm:$0xff] }
 0x685   :  { %1813 = vmatprep.subr.bf16.mxu0 %v3332_v35  ;;  %1856 = vmatprep.subr.bf16.mxu1 %v3335_v36 }
 0x688   :  { %1814 = vmatpush1.bf16.msra.mxu0 %v3338_v37  ;;  %1857 = vmatpush1.bf16.msra.mxu1 %v3341_v39 }
 0x689   :  { %1815 = vmatprep.subr.bf16.mxu0 %v3344_v40  ;;  %1858 = vmatprep.subr.bf16.mxu1 %v3347_v41  ;;  %v3674_v40 = vld [vmem:[#allocation21_spill] sm:$0xff] }
 0x68c   :  { %1816 = vmatpush1.bf16.msra.mxu0 %v3350_v42  ;;  %1859 = vmatpush1.bf16.msra.mxu1 %v3353_v59 }
 0x68d   :  { %1817 = vmatprep.subr.bf16.mxu0 %v3356_v55  ;;  %1860 = vmatprep.subr.bf16.mxu1 %v3359_v12  ;;  %v3675_v55 = vld [vmem:[#allocation22_spill] sm:$0xff] }
 0x690   :  { %1818 = vmatpush1.bf16.msra.mxu0 %v3362_v5  ;;  %1861 = vmatpush1.bf16.msra.mxu1 %v3365_v38 }
 0x691   :  { %1819 = vmatprep.subr.bf16.mxu0 %v3368_v58  ;;  %1862 = vmatprep.subr.bf16.mxu1 %v3371_v21  ;;  %v3676_v58 = vld [vmem:[#allocation58_spill] sm:$0xff] }
 0x694   :  { %1820 = vmatpush1.bf16.msra.mxu0 %v3374_v61  ;;  %1863 = vmatpush1.bf16.msra.mxu1 %v3435_v22 }
 0x695   :  { %1821 = vmatprep.subr.bf16.mxu0 %v3378_v56  ;;  %1864 = vmatprep.subr.bf16.mxu1 %v3439_v63  ;;  %v3677_v56 = vld [vmem:[#allocation57_spill] sm:$0xff] }
 0x698   :  { %1822 = vmatpush1.bf16.msra.mxu0 %v3382_v3  ;;  %1865 = vmatpush1.bf16.msra.mxu1 %v3443_v8  ;;  %v3679_v8 = vld [vmem:[#allocation59_spill] sm:$0xff] }
 0x699   :  { %1823 = vmatprep.subr.bf16.mxu0 %v3386_v10  ;;  %1866 = vmatprep.subr.bf16.mxu1 %v3447_v1 }
 0x69c   :  { %1824 = vmatpush1.bf16.msra.mxu0 %v3390_v14  ;;  %1867 = vmatpush1.bf16.msra.mxu1 %v3451_v16  ;;  %v3678_v14 = vld [vmem:[#allocation60_spill] sm:$0xff] }
 0x69d   :  { %2222 = vmatprep.subr.bf16.mxu0 %v2765_v45 }
 0x73f   :  { %v1691_v29 = vpop.f32.mrf.mxu0  ;;  %v1734_v31 = vpop.f32.mrf.mxu1 }
 0x740   :  { %v1743_v60 = vadd.f32 %v1691_v29, %v3672_v30  ;;  %v1745_v3 = vadd.f32 %v1734_v31, %v3677_v56  ;;  %v2332_v29 = vld [vmem:[#allocation13 + $0x28] sm:$0xff]   ;;  %v2333_v30 = vld [vmem:[#allocation13 + $0x20] sm:$0xff]   ;;  %v2335_v31 = vld [vmem:[#allocation13 + $0x10] sm:$0xff]  }
 0x741   :  { %v1693_v32 = vpop.f32.mrf.mxu0  ;;  %v1736_v39 = vpop.f32.mrf.mxu1 }
 0x742   :  { %v2192_v33 = vmul.f32 -1.442695, %v1743_v60  ;;  %v1744_v35 = vadd.f32 %v1693_v32, %v3673_v34  ;;  %v1746_v21 = vadd.f32 %v1736_v39, %v3676_v58  ;;  %v2334_v60 = vld [vmem:[#allocation13 + $0x18] sm:$0xff]   ;;  %v2336_v32 = vld [vmem:[#allocation13 + $0x8] sm:$0xff]  }
 0x743   :  { %v1695_v36 = vpop.f32.mrf.mxu0  ;;  %v1738_v5 = vpop.f32.mrf.mxu1 }
 0x744   :  { %2530 = vpow2.f32 %v2192_v33  ;;  %v2194_v37 = vmul.f32 -1.442695, %v1744_v35  ;;  %v1747_v41 = vadd.f32 %v1695_v36, %v3674_v40  ;;  %v2196_v10 = vmul.f32 -1.442695, %v1746_v21  ;;  %v2337_v33 = vld [vmem:[#allocation13] sm:$0xff]   ;;  %v3680_v35 = vld [vmem:[#allocation23_spill] sm:$0xff] }
 0x745   :  { %v1697_v42 = vpop.f32.mrf.mxu0  ;;  %v1740_v61 = vpop.f32.mrf.mxu1  ;;  %v1749_v1 = vadd.f32 %v1738_v5, %v3679_v8  ;;  %v3682_v5 = vld [vmem:[#allocation25_spill] sm:$0xff] }
 0x746   :  { %2532 = vpow2.f32 %v2194_v37  ;;  %v2193_v59 = vmul.f32 -1.442695, %v1747_v41  ;;  %v1748_v12 = vadd.f32 %v1697_v42, %v3675_v55  ;;  %v1750_v22 = vadd.f32 %v1740_v61, %v3678_v14  ;;  %v3681_v41 = vld [vmem:[#allocation24_spill] sm:$0xff]  ;;  %v3683_v61 = vld [vmem:[#allocation26_spill] sm:$0xff]  ;;  %v3685_v8 = vld [vmem:[#allocation61_spill] sm:$0xff] }
 0x747   :  { %v3684_v14 = vld [vmem:[#allocation62_spill] sm:$0xff] }
 0x748   :  { %2534 = vpow2.f32 %v2193_v59  ;;  %v2195_v38 = vmul.f32 -1.442695, %v1748_v12  ;;  %v2197_v53 = vmul.f32 -1.442695, %v1750_v22 }
 0x74a   :  { %2536 = vpow2.f32 %v2195_v38 }
 0x74b   :  { %2538 = vtanh.f32 %v1745_v3 }
 0x74c   :  { %2540 = vpow2.f32 %v2196_v10 }
 0x751   :  { %v2531_v63 = vpop.eup %2530 }
 0x752   :  { %v1757_v16 = vadd.f32 1.0, %v2531_v63 }
 0x753   :  { %v2533_v50 = vpop.eup %2532 }
 0x754   :  { %2542 = vrcp.f32 %v1757_v16  ;;  %v1769_v48 = vadd.f32 1.0, %v2533_v50  ;;  %v3686_v50 = vld [vmem:[#allocation64_spill] sm:$0xff] }
 0x755   :  { %v2535_v13 = vpop.eup %2534  ;;  %2544 = vtanh.f32 %v1749_v1 }
 0x756   :  { %2546 = vrcp.f32 %v1769_v48  ;;  %v1758_v49 = vadd.f32 1.0, %v2535_v13  ;;  %v3687_v13 = vld [vmem:[#allocation63_spill] sm:$0xff] }
 0x757   :  { %v2537_v62 = vpop.eup %2536  ;;  %2548 = vpow2.f32 %v2197_v53 }
 0x758   :  { %2550 = vrcp.f32 %v1758_v49  ;;  %v1770_v47 = vadd.f32 1.0, %v2537_v62  ;;  %v2539_v0 = vpop.eup %2538 }
 0x759   :  { %v2541_v6 = vpop.eup %2540 }
 0x75a   :  { %2552 = vrcp.f32 %v1770_v47  ;;  %v1783_v23 = vadd.f32 1.0, %v2541_v6 }
 0x75c   :  { %2554 = vrcp.f32 %v1783_v23 }
 0x761   :  { %v2543_v9 = vpop.eup %2542 }
 0x762   :  { %v2545_v2 = vpop.eup %2544  ;;  %v1791_v54 = vmul.f32 %v2543_v9, %v2539_v0 }
 0x763   :  { %v2547_v17 = vpop.eup %2546 }
 0x764   :  { %v2549_v19 = vpop.eup %2548  ;;  %v1789_v52 = vmul.f32 %v2547_v17, %v3515_v4 }
 0x765   :  { %v2551_v20 = vpop.eup %2550  ;;  %v1784_v11 = vadd.f32 1.0, %v2549_v19 }
 0x766   :  { %v3563_v24 = vadd.f32 %v1791_v54, %v1789_v52  ;;  %v1792_v25 = vmul.f32 %v2551_v20, %v2545_v2 }
 0x767   :  { %v2553_v26 = vpop.eup %2552 }
 0x768   :  { %v1790_v28 = vmul.f32 %v2553_v26, %v3518_v44  ;;  %2556 = vtanh.f32 %v3563_v24  ;;  %v2331_v44 = vld [vmem:[#allocation13 + $0x30] sm:$0xff]  }
 0x769   :  { %2558 = vrcp.f32 %v1784_v11  ;;  %v2555_v43 = vpop.eup %2554 }
 0x76a   :  { %v3566_v15 = vadd.f32 %v1792_v25, %v1790_v28 }
 0x76c   :  { %2560 = vtanh.f32 %v3566_v15 }
 0x775   :  { %v2557_v7 = vpop.eup %2556 }
 0x776   :  { %v2559_v4 = vpop.eup %2558  ;;  %v1797_v27 = vmul.f32 %v2557_v7, %v2555_v43 }
 0x779   :  { %v2561_v46 = vpop.eup %2560 }
 0x77a   :  { %v1798_v57 = vmul.f32 %v2561_v46, %v2559_v4 }
 0x77c   :  { %v1808_v18 = vpack.c.bf16 %v1798_v57, %v1797_v27 }
 0x77e   :  { %1842 = vmatmul.mubr.bf16.vlgmr.msra.gmra.mxu0 %v1808_v18  ;;  %1885 = vmatmul.mubr.bf16.vlgmr.msra.gmra.mxu1 %v1808_v18 }
 0x77f   :  { %2223 = vmatpush3.bf16.msra.mxu0 %v2330_v51  ;;  %2238 = vmatprep.mubr.msk.bf16.mxu0 %vm2766_vm1, %v2765_v45 }
 0x780   :  { %2224 = vmatprep.subr.bf16.mxu0 %v2765_v45 }
 0x783   :  { %2225 = vmatpush3.bf16.msra.mxu0 %v2331_v44 }
 0x784   :  { %2226 = vmatprep.subr.bf16.mxu0 %v2765_v45 }
 0x787   :  { %2227 = vmatpush3.bf16.msra.mxu0 %v2332_v29 }
 0x788   :  { %2228 = vmatprep.subr.bf16.mxu0 %v2765_v45 }
 0x78b   :  { %2229 = vmatpush3.bf16.msra.mxu0 %v2333_v30 }
 0x78c   :  { %2230 = vmatprep.subr.bf16.mxu0 %v2765_v45 }
 0x78f   :  { %2231 = vmatpush3.bf16.msra.mxu0 %v2334_v60 }
 0x790   :  { %2232 = vmatprep.subr.bf16.mxu0 %v2765_v45 }
 0x793   :  { %2233 = vmatpush3.bf16.msra.mxu0 %v2335_v31 }
 0x794   :  { %2234 = vmatprep.subr.bf16.mxu0 %v2765_v45 }
 0x797   :  { %2235 = vmatpush3.bf16.msra.mxu0 %v2336_v32 }
 0x798   :  { %2236 = vmatprep.subr.bf16.mxu0 %v2765_v45 }
 0x79b   :  { %2237 = vmatpush3.bf16.msra.mxu0 %v2337_v33 }
 0x83e   :  { %v1843_v34 = vpop.f32.mrf.mxu0  ;;  %v1886_v37 = vpop.f32.mrf.mxu1 }
 0x83f   :  { %v1895_v36 = vadd.f32 %v1843_v34, %v3680_v35  ;;  %v1897_v1 = vadd.f32 %v1886_v37, %v3685_v8 }
 0x840   :  { %v1845_v39 = vpop.f32.mrf.mxu0  ;;  %v1888_v12 = vpop.f32.mrf.mxu1 }
 0x841   :  { %v2198_v40 = vmul.f32 -1.442695, %v1895_v36  ;;  %v1896_v42 = vadd.f32 %v1845_v39, %v3681_v41  ;;  %v1898_v22 = vadd.f32 %v1888_v12, %v3684_v14 }
 0x842   :  { %v1847_v59 = vpop.f32.mrf.mxu0  ;;  %v1890_v3 = vpop.f32.mrf.mxu1 }
 0x843   :  { %2562 = vpow2.f32 %v2198_v40  ;;  %v2200_v55 = vmul.f32 -1.442695, %v1896_v42  ;;  %v1899_v38 = vadd.f32 %v1847_v59, %v3682_v5  ;;  %v2202_v16 = vmul.f32 -1.442695, %v1898_v22 }
 0x844   :  { %v1849_v58 = vpop.f32.mrf.mxu0  ;;  %v1892_v63 = vpop.f32.mrf.mxu1  ;;  %v1901_v49 = vadd.f32 %v1890_v3, %v3687_v13 }
 0x845   :  { %2564 = vpow2.f32 %v2200_v55  ;;  %v2199_v21 = vmul.f32 -1.442695, %v1899_v38  ;;  %v1900_v56 = vadd.f32 %v1849_v58, %v3683_v61  ;;  %v1902_v53 = vadd.f32 %v1892_v63, %v3686_v50 }
 0x847   :  { %2566 = vpow2.f32 %v2199_v21  ;;  %v2201_v10 = vmul.f32 -1.442695, %v1900_v56  ;;  %v2203_v0 = vmul.f32 -1.442695, %v1902_v53 }
 0x849   :  { %2568 = vpow2.f32 %v2201_v10 }
 0x84a   :  { %2570 = vtanh.f32 %v1897_v1 }
 0x84b   :  { %2572 = vpow2.f32 %v2202_v16 }
 0x850   :  { %v2563_v48 = vpop.eup %2562 }
 0x851   :  { %v1909_v62 = vadd.f32 1.0, %v2563_v48 }
 0x852   :  { %v2565_v47 = vpop.eup %2564 }
 0x853   :  { %2574 = vrcp.f32 %v1909_v62  ;;  %v1921_v6 = vadd.f32 1.0, %v2565_v47 }
 0x854   :  { %v2567_v9 = vpop.eup %2566  ;;  %2576 = vtanh.f32 %v1901_v49 }
 0x855   :  { %2578 = vrcp.f32 %v1921_v6  ;;  %v1910_v2 = vadd.f32 1.0, %v2567_v9 }
 0x856   :  { %v2569_v54 = vpop.eup %2568  ;;  %2580 = vpow2.f32 %v2203_v0 }
 0x857   :  { %2582 = vrcp.f32 %v1910_v2  ;;  %v1922_v17 = vadd.f32 1.0, %v2569_v54  ;;  %v2571_v19 = vpop.eup %2570 }
 0x858   :  { %v2573_v52 = vpop.eup %2572 }
 0x859   :  { %2584 = vrcp.f32 %v1922_v17  ;;  %v1935_v11 = vadd.f32 1.0, %v2573_v52 }
 0x85b   :  { %2586 = vrcp.f32 %v1935_v11 }
 0x860   :  { %v2575_v20 = vpop.eup %2574 }
 0x861   :  { %v2577_v23 = vpop.eup %2576  ;;  %v1943_v25 = vmul.f32 %v2575_v20, %v2571_v19 }
 0x862   :  { %v2579_v26 = vpop.eup %2578 }
 0x863   :  { %v2581_v28 = vpop.eup %2580  ;;  %v1941_v43 = vmul.f32 %v2579_v26, %v3563_v24  ;;  %v2204_v24 = vld [vmem:[%s3591_s5] ss:$0 sm:$0xff] }
 0x864   :  { %v2583_v7 = vpop.eup %2582  ;;  %v1936_v57 = vadd.f32 1.0, %v2581_v28 }
 0x865   :  { %v1945_v4 = vadd.f32 %v1943_v25, %v1941_v43  ;;  %v1944_v46 = vmul.f32 %v2583_v7, %v2577_v23 }
 0x866   :  { %v2585_v27 = vpop.eup %2584 }
 0x867   :  { %2588 = vtanh.f32 %v1945_v4  ;;  %v1942_v18 = vmul.f32 %v2585_v27, %v3566_v15 }
 0x868   :  { %2590 = vrcp.f32 %v1936_v57  ;;  %v2587_v45 = vpop.eup %2586 }
 0x869   :  { %v1946_v51 = vadd.f32 %v1944_v46, %v1942_v18 }
 0x86b   :  { %2592 = vtanh.f32 %v1946_v51 }
 0x874   :  { %v2589_v44 = vpop.eup %2588 }
 0x875   :  { %v1949_v29 = vmul.f32 %v2589_v44, %v2587_v45  ;;  %v2591_v30 = vpop.eup %2590 }
 0x878   :  { %v2593_v60 = vpop.eup %2592 }
 0x879   :  { %v1950_v31 = vmul.f32 %v2593_v60, %v2591_v30 }
 0x87b   :  { %v1958_v32 = vpack.c.bf16 %v1950_v31, %v1949_v29 }
 0x87d   :  { %2239 = vmatmul.mubr.bf16.vlgmr.msra.gmra.mxu0 %v1958_v32 }
 0x93d   :  { %v2064_v33 = vpop.f32.mrf.mxu0 }
 0x93e   :  { %v2065_v34 = vadd.f32 %v2204_v24, %v2064_v33 }
 0x93f   :  { %v2240_v35 = vpop.f32.mrf.mxu0 }
 0x940   :  { %2071 = vst [vmem:[#allocation14] sm:$0xff] %v2065_v34 }
 0x941   :  { %v2067_v15 = vpop.f32.mrf.mxu0 }
 0x942   :  { %v2068_v36 = vadd.f32 %v2204_v24, %v2067_v15 }
 0x943   :  { %v2241_v37 = vpop.f32.mrf.mxu0 }
 0x944   :  { %2072 = vst [vmem:[#allocation14 + $0x8] sm:$0xff] %v2068_v36 }
 0x945   :  { %2737 = shalt.err (!%p2734_p1)
}
 0x946   :  { %s2768_s26 = smov 128   ;;  %s2769_s5 = smov 8  }
 0x947   :  { %2084 = dma.vmem_to_hbm [thread:$0]  %s2079_s24, 256, %s3592_s6, [#allocation7], %s2768_s26, %s2768_s26, %s2769_s5  }
 0x948   :  { %2752 = dma.done.wait [#allocation7], 256  }
 0x949   :  { %2753 = vsyncadd [#allocation7], 4294967040 }
 0x94a   :  { %2088 = vsyncpa [#allocation6], 1 }
 0x94b   :  { %2089 = vsyncpa [#allocation9], 1 }
 0x94c   :  { %2090 = vsyncpa [#allocation12], 1 }
 0x94d   :  { %2091 = vsyncpa [#allocation7], 1 }

</bundles_post_ra>
